<compile_context>
chip_gen: v6e
topology: v6e:2x2x1
jax: 0.10.0
libtpu: 0.0.40
codegen_flags: <defaults>
</compile_context>

<pallas_src>
import numpy as np
import jax
import jax.numpy as jnp
from jax import lax
from jax.experimental import pallas as pl
from jax.experimental.pallas import tpu as pltpu


# ----------------------------------------------------------------------------
# Fused kernel: BiLSTM (both streams) + mean pooling + MLP head
# ----------------------------------------------------------------------------
def make_fused_kernel(T, Bp, B, H):
    """T: padded seq len, Bp: padded stacked batch (mult of 8), B: real batch."""
    H4 = 4 * H

    def kernel(x_ref, lens_ref, wih_ref, bih_ref, whh_f_ref, whh_b_ref,
               w1_ref, b1_ref, w2_ref, b2_ref, w3_ref, b3_ref,
               out_ref, gx_ref):
        lens = lens_ref[...]                                   # (Bp, 1) f32

        # ---- hoisted input projection (both directions, one big matmul) ----
        gx_ref[...] = (jnp.dot(x_ref[...], wih_ref[...],
                               preferred_element_type=jnp.float32)
                       + bih_ref[...])                         # (T*Bp, 8H)

        whh_f = whh_f_ref[...]                                 # (H, 4H)
        whh_b = whh_b_ref[...]

        def sigm(v):                                           # 1 EUP push
            return 0.5 * (jnp.tanh(0.5 * v) + 1.0)

        def cell(gates, c_prev):
            i_g = sigm(gates[:, 0 * H:1 * H])
            f_g = sigm(gates[:, 1 * H:2 * H])
            g_g = jnp.tanh(gates[:, 2 * H:3 * H])
            o_g = sigm(gates[:, 3 * H:4 * H])
            c_new = f_g * c_prev + i_g * g_g
            h_new = o_g * jnp.tanh(c_new)
            return h_new, c_new

        # ---- fused fwd/bwd recurrence, state in vregs (loop carry) ----
        def step(t, carry):
            h_f, c_f, acc_f, h_b, c_b, acc_b = carry
            tb = T - 1 - t
            rf = pl.multiple_of(t * Bp, 8)
            rb = pl.multiple_of(tb * Bp, 8)
            gx_f = gx_ref[pl.ds(rf, Bp), 0:H4]                 # (Bp, 4H)
            gx_b = gx_ref[pl.ds(rb, Bp), H4:2 * H4]            # (Bp, 4H)

            gates_f = gx_f + jnp.dot(h_f, whh_f,
                                     preferred_element_type=jnp.float32)
            gates_b = gx_b + jnp.dot(h_b, whh_b,
                                     preferred_element_type=jnp.float32)

            hf_n, cf_n = cell(gates_f, c_f)
            hb_n, cb_n = cell(gates_b, c_b)

            m_f = (lens > t).astype(jnp.float32)               # (Bp, 1)
            m_b = (lens > tb).astype(jnp.float32)
            h_f = m_f * hf_n + (1.0 - m_f) * h_f
            c_f = m_f * cf_n + (1.0 - m_f) * c_f
            acc_f = acc_f + m_f * hf_n
            h_b = m_b * hb_n + (1.0 - m_b) * h_b
            c_b = m_b * cb_n + (1.0 - m_b) * c_b
            acc_b = acc_b + m_b * hb_n
            return h_f, c_f, acc_f, h_b, c_b, acc_b

        z = jnp.zeros((Bp, H), jnp.float32)
        init = (z, z, z, z, z, z)
        _, _, acc_f, _, _, acc_b = lax.fori_loop(0, T, step, init, unroll=True)

        # ---- length-masked mean pooling ----
        inv_len = 1.0 / jnp.maximum(lens, 1.0)                 # clamp: no NaN
        pooled = jnp.concatenate([acc_f * inv_len, acc_b * inv_len],
                                 axis=-1)                      # (Bp, 2H)

        # ---- split streams + MLP head (fused, no HBM round-trip) ----
        prem = pooled[0:B]                                     # (B, 2H)
        hypo = pooled[B:2 * B]                                 # (B, 2H)
        comb = jnp.concatenate(
            [prem, hypo, jnp.abs(prem - hypo), prem * hypo], axis=-1)  # (B, 8H)
        h1 = jnp.maximum(
            jnp.dot(comb, w1_ref[...], preferred_element_type=jnp.float32)
            + b1_ref[...], 0.0)
        h2 = jnp.maximum(
            jnp.dot(h1, w2_ref[...], preferred_element_type=jnp.float32)
            + b2_ref[...], 0.0)
        out_ref[...] = (jnp.dot(h2, w3_ref[...],
                                preferred_element_type=jnp.float32)
                        + b3_ref[...])

    return kernel


# ----------------------------------------------------------------------------
# Wrapper: full forward pass (one pallas_call)
# ----------------------------------------------------------------------------
def twostream_bilstm_forward(params, x1, x1_lens, x2, x2_lens, num_labels):
    emb = params["embed"]                                      # (V, E)
    B, T1 = x1.shape
    _, T2 = x2.shape
    E = emb.shape[1]
    H = params["whh_f"].shape[0]                               # whh: (H, 4H)

    T = max(T1, T2)
    B2 = 2 * B
    Bp = ((B2 + 7) // 8) * 8                                   # pad to 8 sublanes

    # stack both streams on the batch axis, pad time and batch
    x1p = jnp.pad(x1, ((0, 0), (0, T - T1)))
    x2p = jnp.pad(x2, ((0, 0), (0, T - T2)))
    x_all = jnp.concatenate([x1p, x2p], axis=0)                # (2B, T)
    x_all = jnp.pad(x_all, ((0, Bp - B2), (0, 0)))             # (Bp, T)

    lens = jnp.concatenate([x1_lens, x2_lens]).astype(jnp.float32)
    lens = jnp.pad(lens, (0, Bp - B2))[:, None]                # (Bp, 1)

    # embedding gather directly into time-major flattened layout (T*Bp, E):
    # only the tiny int32 index matrix gets transposed, not the activations.
    idx = jnp.transpose(x_all).reshape(-1)                     # (T*Bp,)
    x_emb = jnp.take(emb, idx, axis=0)                         # (T*Bp, E)

    # concatenate the two direction input-projections into one matmul
    wih = jnp.concatenate([params["wih_f"], params["wih_b"]], axis=1)  # (E, 8H)
    bih = jnp.concatenate([params["b_f"], params["b_b"]], axis=1)      # (1, 8H)

    vmem = pl.BlockSpec(memory_space=pltpu.MemorySpace.VMEM)
    kernel = make_fused_kernel(T, Bp, B, H)

    return pl.pallas_call(
        kernel,
        out_shape=jax.ShapeDtypeStruct((B, num_labels), jnp.float32),
        in_specs=[vmem] * 12,
        out_specs=vmem,
        scratch_shapes=[pltpu.VMEM((T * Bp, 8 * H), jnp.float32)],
    )(x_emb, lens, wih, bih,
      params["whh_f"], params["whh_b"],
      params["w1"], params["b1"], params["w2"], params["b2"],
      params["w3"], params["b3"])


# ----------------------------------------------------------------------------
# Pure-JAX reference (for validation)
# ----------------------------------------------------------------------------
def reference_forward(params, x1, x1_lens, x2, x2_lens):
    emb = params["embed"]

    def lstm_dir(x_bte, lens, wih, whh, b, reverse):
        B, T, E = x_bte.shape
        H = whh.shape[0]
        h = jnp.zeros((B, H)); c = jnp.zeros((B, H)); acc = jnp.zeros((B, H))

        def body(s, carry):
            h, c, acc = carry
            t = T - 1 - s if reverse else s
            x_t = x_bte[:, t, :]
            gates = x_t @ wih + h @ whh + b
            i = jax.nn.sigmoid(gates[:, 0:H])
            f = jax.nn.sigmoid(gates[:, H:2 * H])
            g = jnp.tanh(gates[:, 2 * H:3 * H])
            o = jax.nn.sigmoid(gates[:, 3 * H:4 * H])
            c_new = f * c + i * g
            h_new = o * jnp.tanh(c_new)
            m = (lens[:, None] > t).astype(jnp.float32)
            h = m * h_new + (1 - m) * h
            c = m * c_new + (1 - m) * c
            acc = acc + m * h_new
            return h, c, acc

        _, _, acc = lax.fori_loop(0, T, body, (h, c, acc))
        return acc

    def stream(x, lens):
        x_emb = jnp.take(emb, x, axis=0)
        lf = lens.astype(jnp.float32)
        a_f = lstm_dir(x_emb, lf, params["wih_f"], params["whh_f"],
                       params["b_f"], False)
        a_b = lstm_dir(x_emb, lf, params["wih_b"], params["whh_b"],
                       params["b_b"], True)
        return jnp.concatenate([a_f, a_b], axis=-1) / lf[:, None]

    p = stream(x1, x1_lens)
    h = stream(x2, x2_lens)
    comb = jnp.concatenate([p, h, jnp.abs(p - h), p * h], axis=-1)
    h1 = jnp.maximum(comb @ params["w1"] + params["b1"], 0.0)
    h2 = jnp.maximum(h1 @ params["w2"] + params["b2"], 0.0)
    return h2 @ params["w3"] + params["b3"]


# ----------------------------------------------------------------------------
# Deterministic parameter init
# ----------------------------------------------------------------------------
def init_params(key, vocab_size, embed_size, hidden_size, num_labels):
    H, E = hidden_size, embed_size
    ks = jax.random.split(key, 12)
    bound = 1.0 / np.sqrt(H)

    def uni(k, shape, b):
        return jax.random.uniform(k, shape, jnp.float32, -b, b)

    def xavier(k, fan_in, fan_out):
        b = np.sqrt(6.0 / (fan_in + fan_out))
        return jax.random.uniform(k, (fan_in, fan_out), jnp.float32, -b, b)

    params = {
        "embed": jax.random.normal(ks[0], (vocab_size, E), jnp.float32) * 0.1,
        # LSTM weights stored pre-transposed: wih (E,4H), whh (H,4H), bias (1,4H)
        "wih_f": uni(ks[1], (E, 4 * H), bound),
        "whh_f": uni(ks[2], (H, 4 * H), bound),
        "b_f": uni(ks[3], (1, 4 * H), bound) + uni(ks[4], (1, 4 * H), bound),
        "wih_b": uni(ks[5], (E, 4 * H), bound),
        "whh_b": uni(ks[6], (H, 4 * H), bound),
        "b_b": uni(ks[7], (1, 4 * H), bound) + uni(ks[8], (1, 4 * H), bound),
        # MLP head: weights pre-transposed (in, out), xavier-uniform, zero bias
        "w1": xavier(ks[9], 8 * H, H),
        "b1": jnp.zeros((1, H), jnp.float32),
        "w2": xavier(ks[10], H, H),
        "b2": jnp.zeros((1, H), jnp.float32),
        "w3": xavier(ks[11], H, num_labels),
        "b3": jnp.zeros((1, num_labels), jnp.float32),
    }
    return params


if __name__ == "__main__":
    vocab_size, embed_size, hidden_size, num_labels = 50, 32, 32, 3
    B, T1, T2 = 2, 8, 10

    key = jax.random.PRNGKey(0)
    k_p, k_x1, k_x2 = jax.random.split(key, 3)
    params = init_params(k_p, vocab_size, embed_size, hidden_size, num_labels)

    x1 = jax.random.randint(k_x1, (B, T1), 0, vocab_size, dtype=jnp.int32)
    x2 = jax.random.randint(k_x2, (B, T2), 0, vocab_size, dtype=jnp.int32)
    x1_lens = jnp.array([T1, 5], dtype=jnp.int32)
    x2_lens = jnp.array([T2, 7], dtype=jnp.int32)

    fwd = jax.jit(twostream_bilstm_forward, static_argnames=("num_labels",))
    logits = fwd(params, x1, x1_lens, x2, x2_lens, num_labels=num_labels)
    logits = jax.block_until_ready(logits)

    ref = jax.block_until_ready(
        reference_forward(params, x1, x1_lens, x2, x2_lens))

    assert logits.shape == (B, num_labels)
    np.testing.assert_allclose(np.asarray(logits), np.asarray(ref),
                               rtol=1e-4, atol=1e-4)
    print("KERNEL_OK")
</pallas_src>

<mosaic_0001>
module attributes {stable_mosaic.version = 11 : i64} {
  func.func @kernel(%arg0: memref<80x32xf32, #tpu.memory_space<vmem>>, %arg1: memref<8x1xf32, #tpu.memory_space<vmem>>, %arg2: memref<32x256xf32, #tpu.memory_space<vmem>>, %arg3: memref<1x256xf32, #tpu.memory_space<vmem>>, %arg4: memref<32x128xf32, #tpu.memory_space<vmem>>, %arg5: memref<32x128xf32, #tpu.memory_space<vmem>>, %arg6: memref<256x32xf32, #tpu.memory_space<vmem>>, %arg7: memref<1x32xf32, #tpu.memory_space<vmem>>, %arg8: memref<32x32xf32, #tpu.memory_space<vmem>>, %arg9: memref<1x32xf32, #tpu.memory_space<vmem>>, %arg10: memref<32x3xf32, #tpu.memory_space<vmem>>, %arg11: memref<1x3xf32, #tpu.memory_space<vmem>>, %arg12: memref<2x3xf32, #tpu.memory_space<vmem>>, %arg13: memref<80x256xf32, #tpu.memory_space<vmem>>) attributes {dimension_semantics = [], scalar_prefetch = 0 : i64, scratch_operands = 1 : i64, tpu.core_type = #tpu.core_type<tc>} {
    %c0 = arith.constant 0 : index
    %c0_0 = arith.constant 0 : index
    %0 = vector.load %arg1[%c0, %c0_0] : memref<8x1xf32, #tpu.memory_space<vmem>>, vector<8x1xf32>
    %c0_1 = arith.constant 0 : index
    %c0_2 = arith.constant 0 : index
    %1 = vector.load %arg0[%c0_1, %c0_2] : memref<80x32xf32, #tpu.memory_space<vmem>>, vector<80x32xf32>
    %c0_3 = arith.constant 0 : index
    %c0_4 = arith.constant 0 : index
    %2 = vector.load %arg2[%c0_3, %c0_4] : memref<32x256xf32, #tpu.memory_space<vmem>>, vector<32x256xf32>
    %cst = arith.constant dense<0.000000e+00> : vector<80x256xf32>
    %3 = tpu.matmul %1, %2, %cst {dimension_numbers = #tpu.dot_dimension_numbers<[1], [0], [0], [1], [0, 0, 1, 1], [], []>} : vector<80x32xf32>, vector<32x256xf32>, vector<80x256xf32> -> vector<80x256xf32>
    %c0_5 = arith.constant 0 : index
    %c0_6 = arith.constant 0 : index
    %4 = vector.load %arg3[%c0_5, %c0_6] : memref<1x256xf32, #tpu.memory_space<vmem>>, vector<1x256xf32>
    %5 = vector.broadcast %4 : vector<1x256xf32> to vector<80x256xf32>
    %6 = arith.addf %3, %5 : vector<80x256xf32>
    %c0_7 = arith.constant 0 : index
    %c0_8 = arith.constant 0 : index
    %7 = vector.load %arg13[%c0_7, %c0_8] : memref<80x256xf32, #tpu.memory_space<vmem>>, vector<80x256xf32>
    tpu.vector_store %arg13[%c0_7, %c0_8], %6 {strides = array<i32>} : memref<80x256xf32, #tpu.memory_space<vmem>>, vector<80x256xf32>,
    %c0_9 = arith.constant 0 : index
    %c0_10 = arith.constant 0 : index
    %8 = vector.load %arg4[%c0_9, %c0_10] : memref<32x128xf32, #tpu.memory_space<vmem>>, vector<32x128xf32>
    %c0_11 = arith.constant 0 : index
    %c0_12 = arith.constant 0 : index
    %9 = vector.load %arg5[%c0_11, %c0_12] : memref<32x128xf32, #tpu.memory_space<vmem>>, vector<32x128xf32>
    %cst_13 = arith.constant 0.000000e+00 : f32
    %10 = vector.broadcast %cst_13 : f32 to vector<8x32xf32>
    %c0_i32 = arith.constant 0 : i32
    %c9_i32 = arith.constant 9 : i32
    %11 = arith.subi %c9_i32, %c0_i32 : i32
    %c8_i32 = arith.constant 8 : i32
    %12 = arith.muli %c0_i32, %c8_i32 : i32
    %13 = tpu.assume_multiple %12, 8 : i32
    %c8_i32_14 = arith.constant 8 : i32
    %14 = arith.muli %11, %c8_i32_14 : i32
    %15 = tpu.assume_multiple %14, 8 : i32
    %16 = arith.index_cast %13 : i32 to index
    %c0_15 = arith.constant 0 : index
    %17 = vector.load %arg13[%16, %c0_15] : memref<80x256xf32, #tpu.memory_space<vmem>>, vector<8x128xf32>
    %18 = arith.index_cast %15 : i32 to index
    %c128 = arith.constant 128 : index
    %19 = vector.load %arg13[%18, %c128] : memref<80x256xf32, #tpu.memory_space<vmem>>, vector<8x128xf32>
    %cst_16 = arith.constant dense<0.000000e+00> : vector<8x128xf32>
    %20 = tpu.matmul %10, %8, %cst_16 {dimension_numbers = #tpu.dot_dimension_numbers<[1], [0], [0], [1], [0, 0, 1, 1], [], []>} : vector<8x32xf32>, vector<32x128xf32>, vector<8x128xf32> -> vector<8x128xf32>
    %21 = arith.addf %17, %20 : vector<8x128xf32>
    %cst_17 = arith.constant dense<0.000000e+00> : vector<8x128xf32>
    %22 = tpu.matmul %10, %9, %cst_17 {dimension_numbers = #tpu.dot_dimension_numbers<[1], [0], [0], [1], [0, 0, 1, 1], [], []>} : vector<8x32xf32>, vector<32x128xf32>, vector<8x128xf32> -> vector<8x128xf32>
    %23 = arith.addf %19, %22 : vector<8x128xf32>
    %24 = vector.extract_strided_slice %21 {offsets = [0, 0], sizes = [8, 32], strides = [1, 1]} : vector<8x128xf32> to vector<8x32xf32>
    %cst_18 = arith.constant 5.000000e-01 : f32
    %25 = vector.broadcast %cst_18 : f32 to vector<8x32xf32>
    %26 = arith.mulf %25, %24 : vector<8x32xf32>
    %27 = math.tanh %26 : vector<8x32xf32>
    %cst_19 = arith.constant 1.000000e+00 : f32
    %28 = vector.broadcast %cst_19 : f32 to vector<8x32xf32>
    %29 = arith.addf %27, %28 : vector<8x32xf32>
    %cst_20 = arith.constant 5.000000e-01 : f32
    %30 = vector.broadcast %cst_20 : f32 to vector<8x32xf32>
    %31 = arith.mulf %30, %29 : vector<8x32xf32>
    %32 = vector.extract_strided_slice %21 {offsets = [0, 32], sizes = [8, 32], strides = [1, 1]} : vector<8x128xf32> to vector<8x32xf32>
    %cst_21 = arith.constant 5.000000e-01 : f32
    %33 = vector.broadcast %cst_21 : f32 to vector<8x32xf32>
    %34 = arith.mulf %33, %32 : vector<8x32xf32>
    %35 = math.tanh %34 : vector<8x32xf32>
    %cst_22 = arith.constant 1.000000e+00 : f32
    %36 = vector.broadcast %cst_22 : f32 to vector<8x32xf32>
    %37 = arith.addf %35, %36 : vector<8x32xf32>
    %cst_23 = arith.constant 5.000000e-01 : f32
    %38 = vector.broadcast %cst_23 : f32 to vector<8x32xf32>
    %39 = arith.mulf %38, %37 : vector<8x32xf32>
    %40 = vector.extract_strided_slice %21 {offsets = [0, 64], sizes = [8, 32], strides = [1, 1]} : vector<8x128xf32> to vector<8x32xf32>
    %41 = math.tanh %40 : vector<8x32xf32>
    %42 = vector.extract_strided_slice %21 {offsets = [0, 96], sizes = [8, 32], strides = [1, 1]} : vector<8x128xf32> to vector<8x32xf32>
    %cst_24 = arith.constant 5.000000e-01 : f32
    %43 = vector.broadcast %cst_24 : f32 to vector<8x32xf32>
    %44 = arith.mulf %43, %42 : vector<8x32xf32>
    %45 = math.tanh %44 : vector<8x32xf32>
    %cst_25 = arith.constant 1.000000e+00 : f32
    %46 = vector.broadcast %cst_25 : f32 to vector<8x32xf32>
    %47 = arith.addf %45, %46 : vector<8x32xf32>
    %cst_26 = arith.constant 5.000000e-01 : f32
    %48 = vector.broadcast %cst_26 : f32 to vector<8x32xf32>
    %49 = arith.mulf %48, %47 : vector<8x32xf32>
    %50 = arith.mulf %39, %10 : vector<8x32xf32>
    %51 = arith.mulf %31, %41 : vector<8x32xf32>
    %52 = arith.addf %50, %51 : vector<8x32xf32>
    %53 = math.tanh %52 : vector<8x32xf32>
    %54 = arith.mulf %49, %53 : vector<8x32xf32>
    %55 = vector.extract_strided_slice %23 {offsets = [0, 0], sizes = [8, 32], strides = [1, 1]} : vector<8x128xf32> to vector<8x32xf32>
    %cst_27 = arith.constant 5.000000e-01 : f32
    %56 = vector.broadcast %cst_27 : f32 to vector<8x32xf32>
    %57 = arith.mulf %56, %55 : vector<8x32xf32>
    %58 = math.tanh %57 : vector<8x32xf32>
    %cst_28 = arith.constant 1.000000e+00 : f32
    %59 = vector.broadcast %cst_28 : f32 to vector<8x32xf32>
    %60 = arith.addf %58, %59 : vector<8x32xf32>
    %cst_29 = arith.constant 5.000000e-01 : f32
    %61 = vector.broadcast %cst_29 : f32 to vector<8x32xf32>
    %62 = arith.mulf %61, %60 : vector<8x32xf32>
    %63 = vector.extract_strided_slice %23 {offsets = [0, 32], sizes = [8, 32], strides = [1, 1]} : vector<8x128xf32> to vector<8x32xf32>
    %cst_30 = arith.constant 5.000000e-01 : f32
    %64 = vector.broadcast %cst_30 : f32 to vector<8x32xf32>
    %65 = arith.mulf %64, %63 : vector<8x32xf32>
    %66 = math.tanh %65 : vector<8x32xf32>
    %cst_31 = arith.constant 1.000000e+00 : f32
    %67 = vector.broadcast %cst_31 : f32 to vector<8x32xf32>
    %68 = arith.addf %66, %67 : vector<8x32xf32>
    %cst_32 = arith.constant 5.000000e-01 : f32
    %69 = vector.broadcast %cst_32 : f32 to vector<8x32xf32>
    %70 = arith.mulf %69, %68 : vector<8x32xf32>
    %71 = vector.extract_strided_slice %23 {offsets = [0, 64], sizes = [8, 32], strides = [1, 1]} : vector<8x128xf32> to vector<8x32xf32>
    %72 = math.tanh %71 : vector<8x32xf32>
    %73 = vector.extract_strided_slice %23 {offsets = [0, 96], sizes = [8, 32], strides = [1, 1]} : vector<8x128xf32> to vector<8x32xf32>
    %cst_33 = arith.constant 5.000000e-01 : f32
    %74 = vector.broadcast %cst_33 : f32 to vector<8x32xf32>
    %75 = arith.mulf %74, %73 : vector<8x32xf32>
    %76 = math.tanh %75 : vector<8x32xf32>
    %cst_34 = arith.constant 1.000000e+00 : f32
    %77 = vector.broadcast %cst_34 : f32 to vector<8x32xf32>
    %78 = arith.addf %76, %77 : vector<8x32xf32>
    %cst_35 = arith.constant 5.000000e-01 : f32
    %79 = vector.broadcast %cst_35 : f32 to vector<8x32xf32>
    %80 = arith.mulf %79, %78 : vector<8x32xf32>
    %81 = arith.mulf %70, %10 : vector<8x32xf32>
    %82 = arith.mulf %62, %72 : vector<8x32xf32>
    %83 = arith.addf %81, %82 : vector<8x32xf32>
    %84 = math.tanh %83 : vector<8x32xf32>
    %85 = arith.mulf %80, %84 : vector<8x32xf32>
    %86 = arith.sitofp %c0_i32 : i32 to f32
    %87 = vector.broadcast %86 : f32 to vector<8x1xf32>
    %88 = arith.cmpf ogt, %0, %87 : vector<8x1xf32>
    %89 = arith.extui %88 : vector<8x1xi1> to vector<8x1xi32>
    %90 = arith.sitofp %89 : vector<8x1xi32> to vector<8x1xf32>
    %91 = arith.sitofp %11 : i32 to f32
    %92 = vector.broadcast %91 : f32 to vector<8x1xf32>
    %93 = arith.cmpf ogt, %0, %92 : vector<8x1xf32>
    %94 = arith.extui %93 : vector<8x1xi1> to vector<8x1xi32>
    %95 = arith.sitofp %94 : vector<8x1xi32> to vector<8x1xf32>
    %96 = vector.broadcast %90 : vector<8x1xf32> to vector<8x32xf32>
    %97 = arith.mulf %96, %54 : vector<8x32xf32>
    %cst_36 = arith.constant 1.000000e+00 : f32
    %98 = vector.broadcast %cst_36 : f32 to vector<8x1xf32>
    %99 = arith.subf %98, %90 : vector<8x1xf32>
    %100 = vector.broadcast %99 : vector<8x1xf32> to vector<8x32xf32>
    %101 = arith.mulf %100, %10 : vector<8x32xf32>
    %102 = arith.addf %97, %101 : vector<8x32xf32>
    %103 = vector.broadcast %90 : vector<8x1xf32> to vector<8x32xf32>
    %104 = arith.mulf %103, %52 : vector<8x32xf32>
    %cst_37 = arith.constant 1.000000e+00 : f32
    %105 = vector.broadcast %cst_37 : f32 to vector<8x1xf32>
    %106 = arith.subf %105, %90 : vector<8x1xf32>
    %107 = vector.broadcast %106 : vector<8x1xf32> to vector<8x32xf32>
    %108 = arith.mulf %107, %10 : vector<8x32xf32>
    %109 = arith.addf %104, %108 : vector<8x32xf32>
    %110 = vector.broadcast %90 : vector<8x1xf32> to vector<8x32xf32>
    %111 = arith.mulf %110, %54 : vector<8x32xf32>
    %112 = arith.addf %10, %111 : vector<8x32xf32>
    %113 = vector.broadcast %95 : vector<8x1xf32> to vector<8x32xf32>
    %114 = arith.mulf %113, %85 : vector<8x32xf32>
    %cst_38 = arith.constant 1.000000e+00 : f32
    %115 = vector.broadcast %cst_38 : f32 to vector<8x1xf32>
    %116 = arith.subf %115, %95 : vector<8x1xf32>
    %117 = vector.broadcast %116 : vector<8x1xf32> to vector<8x32xf32>
    %118 = arith.mulf %117, %10 : vector<8x32xf32>
    %119 = arith.addf %114, %118 : vector<8x32xf32>
    %120 = vector.broadcast %95 : vector<8x1xf32> to vector<8x32xf32>
    %121 = arith.mulf %120, %83 : vector<8x32xf32>
    %cst_39 = arith.constant 1.000000e+00 : f32
    %122 = vector.broadcast %cst_39 : f32 to vector<8x1xf32>
    %123 = arith.subf %122, %95 : vector<8x1xf32>
    %124 = vector.broadcast %123 : vector<8x1xf32> to vector<8x32xf32>
    %125 = arith.mulf %124, %10 : vector<8x32xf32>
    %126 = arith.addf %121, %125 : vector<8x32xf32>
    %127 = vector.broadcast %95 : vector<8x1xf32> to vector<8x32xf32>
    %128 = arith.mulf %127, %85 : vector<8x32xf32>
    %129 = arith.addf %10, %128 : vector<8x32xf32>
    %c1_i32 = arith.constant 1 : i32
    %c9_i32_40 = arith.constant 9 : i32
    %130 = arith.subi %c9_i32_40, %c1_i32 : i32
    %c8_i32_41 = arith.constant 8 : i32
    %131 = arith.muli %c1_i32, %c8_i32_41 : i32
    %132 = tpu.assume_multiple %131, 8 : i32
    %c8_i32_42 = arith.constant 8 : i32
    %133 = arith.muli %130, %c8_i32_42 : i32
    %134 = tpu.assume_multiple %133, 8 : i32
    %135 = arith.index_cast %132 : i32 to index
    %c0_43 = arith.constant 0 : index
    %136 = vector.load %arg13[%135, %c0_43] : memref<80x256xf32, #tpu.memory_space<vmem>>, vector<8x128xf32>
    %137 = arith.index_cast %134 : i32 to index
    %c128_44 = arith.constant 128 : index
    %138 = vector.load %arg13[%137, %c128_44] : memref<80x256xf32, #tpu.memory_space<vmem>>, vector<8x128xf32>
    %cst_45 = arith.constant dense<0.000000e+00> : vector<8x128xf32>
    %139 = tpu.matmul %102, %8, %cst_45 {dimension_numbers = #tpu.dot_dimension_numbers<[1], [0], [0], [1], [0, 0, 1, 1], [], []>} : vector<8x32xf32>, vector<32x128xf32>, vector<8x128xf32> -> vector<8x128xf32>
    %140 = arith.addf %136, %139 : vector<8x128xf32>
    %cst_46 = arith.constant dense<0.000000e+00> : vector<8x128xf32>
    %141 = tpu.matmul %119, %9, %cst_46 {dimension_numbers = #tpu.dot_dimension_numbers<[1], [0], [0], [1], [0, 0, 1, 1], [], []>} : vector<8x32xf32>, vector<32x128xf32>, vector<8x128xf32> -> vector<8x128xf32>
    %142 = arith.addf %138, %141 : vector<8x128xf32>
    %143 = vector.extract_strided_slice %140 {offsets = [0, 0], sizes = [8, 32], strides = [1, 1]} : vector<8x128xf32> to vector<8x32xf32>
    %cst_47 = arith.constant 5.000000e-01 : f32
    %144 = vector.broadcast %cst_47 : f32 to vector<8x32xf32>
    %145 = arith.mulf %144, %143 : vector<8x32xf32>
    %146 = math.tanh %145 : vector<8x32xf32>
    %cst_48 = arith.constant 1.000000e+00 : f32
    %147 = vector.broadcast %cst_48 : f32 to vector<8x32xf32>
    %148 = arith.addf %146, %147 : vector<8x32xf32>
    %cst_49 = arith.constant 5.000000e-01 : f32
    %149 = vector.broadcast %cst_49 : f32 to vector<8x32xf32>
    %150 = arith.mulf %149, %148 : vector<8x32xf32>
    %151 = vector.extract_strided_slice %140 {offsets = [0, 32], sizes = [8, 32], strides = [1, 1]} : vector<8x128xf32> to vector<8x32xf32>
    %cst_50 = arith.constant 5.000000e-01 : f32
    %152 = vector.broadcast %cst_50 : f32 to vector<8x32xf32>
    %153 = arith.mulf %152, %151 : vector<8x32xf32>
    %154 = math.tanh %153 : vector<8x32xf32>
    %cst_51 = arith.constant 1.000000e+00 : f32
    %155 = vector.broadcast %cst_51 : f32 to vector<8x32xf32>
    %156 = arith.addf %154, %155 : vector<8x32xf32>
    %cst_52 = arith.constant 5.000000e-01 : f32
    %157 = vector.broadcast %cst_52 : f32 to vector<8x32xf32>
    %158 = arith.mulf %157, %156 : vector<8x32xf32>
    %159 = vector.extract_strided_slice %140 {offsets = [0, 64], sizes = [8, 32], strides = [1, 1]} : vector<8x128xf32> to vector<8x32xf32>
    %160 = math.tanh %159 : vector<8x32xf32>
    %161 = vector.extract_strided_slice %140 {offsets = [0, 96], sizes = [8, 32], strides = [1, 1]} : vector<8x128xf32> to vector<8x32xf32>
    %cst_53 = arith.constant 5.000000e-01 : f32
    %162 = vector.broadcast %cst_53 : f32 to vector<8x32xf32>
    %163 = arith.mulf %162, %161 : vector<8x32xf32>
    %164 = math.tanh %163 : vector<8x32xf32>
    %cst_54 = arith.constant 1.000000e+00 : f32
    %165 = vector.broadcast %cst_54 : f32 to vector<8x32xf32>
    %166 = arith.addf %164, %165 : vector<8x32xf32>
    %cst_55 = arith.constant 5.000000e-01 : f32
    %167 = vector.broadcast %cst_55 : f32 to vector<8x32xf32>
    %168 = arith.mulf %167, %166 : vector<8x32xf32>
    %169 = arith.mulf %158, %109 : vector<8x32xf32>
    %170 = arith.mulf %150, %160 : vector<8x32xf32>
    %171 = arith.addf %169, %170 : vector<8x32xf32>
    %172 = math.tanh %171 : vector<8x32xf32>
    %173 = arith.mulf %168, %172 : vector<8x32xf32>
    %174 = vector.extract_strided_slice %142 {offsets = [0, 0], sizes = [8, 32], strides = [1, 1]} : vector<8x128xf32> to vector<8x32xf32>
    %cst_56 = arith.constant 5.000000e-01 : f32
    %175 = vector.broadcast %cst_56 : f32 to vector<8x32xf32>
    %176 = arith.mulf %175, %174 : vector<8x32xf32>
    %177 = math.tanh %176 : vector<8x32xf32>
    %cst_57 = arith.constant 1.000000e+00 : f32
    %178 = vector.broadcast %cst_57 : f32 to vector<8x32xf32>
    %179 = arith.addf %177, %178 : vector<8x32xf32>
    %cst_58 = arith.constant 5.000000e-01 : f32
    %180 = vector.broadcast %cst_58 : f32 to vector<8x32xf32>
    %181 = arith.mulf %180, %179 : vector<8x32xf32>
    %182 = vector.extract_strided_slice %142 {offsets = [0, 32], sizes = [8, 32], strides = [1, 1]} : vector<8x128xf32> to vector<8x32xf32>
    %cst_59 = arith.constant 5.000000e-01 : f32
    %183 = vector.broadcast %cst_59 : f32 to vector<8x32xf32>
    %184 = arith.mulf %183, %182 : vector<8x32xf32>
    %185 = math.tanh %184 : vector<8x32xf32>
    %cst_60 = arith.constant 1.000000e+00 : f32
    %186 = vector.broadcast %cst_60 : f32 to vector<8x32xf32>
    %187 = arith.addf %185, %186 : vector<8x32xf32>
    %cst_61 = arith.constant 5.000000e-01 : f32
    %188 = vector.broadcast %cst_61 : f32 to vector<8x32xf32>
    %189 = arith.mulf %188, %187 : vector<8x32xf32>
    %190 = vector.extract_strided_slice %142 {offsets = [0, 64], sizes = [8, 32], strides = [1, 1]} : vector<8x128xf32> to vector<8x32xf32>
    %191 = math.tanh %190 : vector<8x32xf32>
    %192 = vector.extract_strided_slice %142 {offsets = [0, 96], sizes = [8, 32], strides = [1, 1]} : vector<8x128xf32> to vector<8x32xf32>
    %cst_62 = arith.constant 5.000000e-01 : f32
    %193 = vector.broadcast %cst_62 : f32 to vector<8x32xf32>
    %194 = arith.mulf %193, %192 : vector<8x32xf32>
    %195 = math.tanh %194 : vector<8x32xf32>
    %cst_63 = arith.constant 1.000000e+00 : f32
    %196 = vector.broadcast %cst_63 : f32 to vector<8x32xf32>
    %197 = arith.addf %195, %196 : vector<8x32xf32>
    %cst_64 = arith.constant 5.000000e-01 : f32
    %198 = vector.broadcast %cst_64 : f32 to vector<8x32xf32>
    %199 = arith.mulf %198, %197 : vector<8x32xf32>
    %200 = arith.mulf %189, %126 : vector<8x32xf32>
    %201 = arith.mulf %181, %191 : vector<8x32xf32>
    %202 = arith.addf %200, %201 : vector<8x32xf32>
    %203 = math.tanh %202 : vector<8x32xf32>
    %204 = arith.mulf %199, %203 : vector<8x32xf32>
    %205 = arith.sitofp %c1_i32 : i32 to f32
    %206 = vector.broadcast %205 : f32 to vector<8x1xf32>
    %207 = arith.cmpf ogt, %0, %206 : vector<8x1xf32>
    %208 = arith.extui %207 : vector<8x1xi1> to vector<8x1xi32>
    %209 = arith.sitofp %208 : vector<8x1xi32> to vector<8x1xf32>
    %210 = arith.sitofp %130 : i32 to f32
    %211 = vector.broadcast %210 : f32 to vector<8x1xf32>
    %212 = arith.cmpf ogt, %0, %211 : vector<8x1xf32>
    %213 = arith.extui %212 : vector<8x1xi1> to vector<8x1xi32>
    %214 = arith.sitofp %213 : vector<8x1xi32> to vector<8x1xf32>
    %215 = vector.broadcast %209 : vector<8x1xf32> to vector<8x32xf32>
    %216 = arith.mulf %215, %173 : vector<8x32xf32>
    %cst_65 = arith.constant 1.000000e+00 : f32
    %217 = vector.broadcast %cst_65 : f32 to vector<8x1xf32>
    %218 = arith.subf %217, %209 : vector<8x1xf32>
    %219 = vector.broadcast %218 : vector<8x1xf32> to vector<8x32xf32>
    %220 = arith.mulf %219, %102 : vector<8x32xf32>
    %221 = arith.addf %216, %220 : vector<8x32xf32>
    %222 = vector.broadcast %209 : vector<8x1xf32> to vector<8x32xf32>
    %223 = arith.mulf %222, %171 : vector<8x32xf32>
    %cst_66 = arith.constant 1.000000e+00 : f32
    %224 = vector.broadcast %cst_66 : f32 to vector<8x1xf32>
    %225 = arith.subf %224, %209 : vector<8x1xf32>
    %226 = vector.broadcast %225 : vector<8x1xf32> to vector<8x32xf32>
    %227 = arith.mulf %226, %109 : vector<8x32xf32>
    %228 = arith.addf %223, %227 : vector<8x32xf32>
    %229 = vector.broadcast %209 : vector<8x1xf32> to vector<8x32xf32>
    %230 = arith.mulf %229, %173 : vector<8x32xf32>
    %231 = arith.addf %112, %230 : vector<8x32xf32>
    %232 = vector.broadcast %214 : vector<8x1xf32> to vector<8x32xf32>
    %233 = arith.mulf %232, %204 : vector<8x32xf32>
    %cst_67 = arith.constant 1.000000e+00 : f32
    %234 = vector.broadcast %cst_67 : f32 to vector<8x1xf32>
    %235 = arith.subf %234, %214 : vector<8x1xf32>
    %236 = vector.broadcast %235 : vector<8x1xf32> to vector<8x32xf32>
    %237 = arith.mulf %236, %119 : vector<8x32xf32>
    %238 = arith.addf %233, %237 : vector<8x32xf32>
    %239 = vector.broadcast %214 : vector<8x1xf32> to vector<8x32xf32>
    %240 = arith.mulf %239, %202 : vector<8x32xf32>
    %cst_68 = arith.constant 1.000000e+00 : f32
    %241 = vector.broadcast %cst_68 : f32 to vector<8x1xf32>
    %242 = arith.subf %241, %214 : vector<8x1xf32>
    %243 = vector.broadcast %242 : vector<8x1xf32> to vector<8x32xf32>
    %244 = arith.mulf %243, %126 : vector<8x32xf32>
    %245 = arith.addf %240, %244 : vector<8x32xf32>
    %246 = vector.broadcast %214 : vector<8x1xf32> to vector<8x32xf32>
    %247 = arith.mulf %246, %204 : vector<8x32xf32>
    %248 = arith.addf %129, %247 : vector<8x32xf32>
    %c2_i32 = arith.constant 2 : i32
    %c9_i32_69 = arith.constant 9 : i32
    %249 = arith.subi %c9_i32_69, %c2_i32 : i32
    %c8_i32_70 = arith.constant 8 : i32
    %250 = arith.muli %c2_i32, %c8_i32_70 : i32
    %251 = tpu.assume_multiple %250, 8 : i32
    %c8_i32_71 = arith.constant 8 : i32
    %252 = arith.muli %249, %c8_i32_71 : i32
    %253 = tpu.assume_multiple %252, 8 : i32
    %254 = arith.index_cast %251 : i32 to index
    %c0_72 = arith.constant 0 : index
    %255 = vector.load %arg13[%254, %c0_72] : memref<80x256xf32, #tpu.memory_space<vmem>>, vector<8x128xf32>
    %256 = arith.index_cast %253 : i32 to index
    %c128_73 = arith.constant 128 : index
    %257 = vector.load %arg13[%256, %c128_73] : memref<80x256xf32, #tpu.memory_space<vmem>>, vector<8x128xf32>
    %cst_74 = arith.constant dense<0.000000e+00> : vector<8x128xf32>
    %258 = tpu.matmul %221, %8, %cst_74 {dimension_numbers = #tpu.dot_dimension_numbers<[1], [0], [0], [1], [0, 0, 1, 1], [], []>} : vector<8x32xf32>, vector<32x128xf32>, vector<8x128xf32> -> vector<8x128xf32>
    %259 = arith.addf %255, %258 : vector<8x128xf32>
    %cst_75 = arith.constant dense<0.000000e+00> : vector<8x128xf32>
    %260 = tpu.matmul %238, %9, %cst_75 {dimension_numbers = #tpu.dot_dimension_numbers<[1], [0], [0], [1], [0, 0, 1, 1], [], []>} : vector<8x32xf32>, vector<32x128xf32>, vector<8x128xf32> -> vector<8x128xf32>
    %261 = arith.addf %257, %260 : vector<8x128xf32>
    %262 = vector.extract_strided_slice %259 {offsets = [0, 0], sizes = [8, 32], strides = [1, 1]} : vector<8x128xf32> to vector<8x32xf32>
    %cst_76 = arith.constant 5.000000e-01 : f32
    %263 = vector.broadcast %cst_76 : f32 to vector<8x32xf32>
    %264 = arith.mulf %263, %262 : vector<8x32xf32>
    %265 = math.tanh %264 : vector<8x32xf32>
    %cst_77 = arith.constant 1.000000e+00 : f32
    %266 = vector.broadcast %cst_77 : f32 to vector<8x32xf32>
    %267 = arith.addf %265, %266 : vector<8x32xf32>
    %cst_78 = arith.constant 5.000000e-01 : f32
    %268 = vector.broadcast %cst_78 : f32 to vector<8x32xf32>
    %269 = arith.mulf %268, %267 : vector<8x32xf32>
    %270 = vector.extract_strided_slice %259 {offsets = [0, 32], sizes = [8, 32], strides = [1, 1]} : vector<8x128xf32> to vector<8x32xf32>
    %cst_79 = arith.constant 5.000000e-01 : f32
    %271 = vector.broadcast %cst_79 : f32 to vector<8x32xf32>
    %272 = arith.mulf %271, %270 : vector<8x32xf32>
    %273 = math.tanh %272 : vector<8x32xf32>
    %cst_80 = arith.constant 1.000000e+00 : f32
    %274 = vector.broadcast %cst_80 : f32 to vector<8x32xf32>
    %275 = arith.addf %273, %274 : vector<8x32xf32>
    %cst_81 = arith.constant 5.000000e-01 : f32
    %276 = vector.broadcast %cst_81 : f32 to vector<8x32xf32>
    %277 = arith.mulf %276, %275 : vector<8x32xf32>
    %278 = vector.extract_strided_slice %259 {offsets = [0, 64], sizes = [8, 32], strides = [1, 1]} : vector<8x128xf32> to vector<8x32xf32>
    %279 = math.tanh %278 : vector<8x32xf32>
    %280 = vector.extract_strided_slice %259 {offsets = [0, 96], sizes = [8, 32], strides = [1, 1]} : vector<8x128xf32> to vector<8x32xf32>
    %cst_82 = arith.constant 5.000000e-01 : f32
    %281 = vector.broadcast %cst_82 : f32 to vector<8x32xf32>
    %282 = arith.mulf %281, %280 : vector<8x32xf32>
    %283 = math.tanh %282 : vector<8x32xf32>
    %cst_83 = arith.constant 1.000000e+00 : f32
    %284 = vector.broadcast %cst_83 : f32 to vector<8x32xf32>
    %285 = arith.addf %283, %284 : vector<8x32xf32>
    %cst_84 = arith.constant 5.000000e-01 : f32
    %286 = vector.broadcast %cst_84 : f32 to vector<8x32xf32>
    %287 = arith.mulf %286, %285 : vector<8x32xf32>
    %288 = arith.mulf %277, %228 : vector<8x32xf32>
    %289 = arith.mulf %269, %279 : vector<8x32xf32>
    %290 = arith.addf %288, %289 : vector<8x32xf32>
    %291 = math.tanh %290 : vector<8x32xf32>
    %292 = arith.mulf %287, %291 : vector<8x32xf32>
    %293 = vector.extract_strided_slice %261 {offsets = [0, 0], sizes = [8, 32], strides = [1, 1]} : vector<8x128xf32> to vector<8x32xf32>
    %cst_85 = arith.constant 5.000000e-01 : f32
    %294 = vector.broadcast %cst_85 : f32 to vector<8x32xf32>
    %295 = arith.mulf %294, %293 : vector<8x32xf32>
    %296 = math.tanh %295 : vector<8x32xf32>
    %cst_86 = arith.constant 1.000000e+00 : f32
    %297 = vector.broadcast %cst_86 : f32 to vector<8x32xf32>
    %298 = arith.addf %296, %297 : vector<8x32xf32>
    %cst_87 = arith.constant 5.000000e-01 : f32
    %299 = vector.broadcast %cst_87 : f32 to vector<8x32xf32>
    %300 = arith.mulf %299, %298 : vector<8x32xf32>
    %301 = vector.extract_strided_slice %261 {offsets = [0, 32], sizes = [8, 32], strides = [1, 1]} : vector<8x128xf32> to vector<8x32xf32>
    %cst_88 = arith.constant 5.000000e-01 : f32
    %302 = vector.broadcast %cst_88 : f32 to vector<8x32xf32>
    %303 = arith.mulf %302, %301 : vector<8x32xf32>
    %304 = math.tanh %303 : vector<8x32xf32>
    %cst_89 = arith.constant 1.000000e+00 : f32
    %305 = vector.broadcast %cst_89 : f32 to vector<8x32xf32>
    %306 = arith.addf %304, %305 : vector<8x32xf32>
    %cst_90 = arith.constant 5.000000e-01 : f32
    %307 = vector.broadcast %cst_90 : f32 to vector<8x32xf32>
    %308 = arith.mulf %307, %306 : vector<8x32xf32>
    %309 = vector.extract_strided_slice %261 {offsets = [0, 64], sizes = [8, 32], strides = [1, 1]} : vector<8x128xf32> to vector<8x32xf32>
    %310 = math.tanh %309 : vector<8x32xf32>
    %311 = vector.extract_strided_slice %261 {offsets = [0, 96], sizes = [8, 32], strides = [1, 1]} : vector<8x128xf32> to vector<8x32xf32>
    %cst_91 = arith.constant 5.000000e-01 : f32
    %312 = vector.broadcast %cst_91 : f32 to vector<8x32xf32>
    %313 = arith.mulf %312, %311 : vector<8x32xf32>
    %314 = math.tanh %313 : vector<8x32xf32>
    %cst_92 = arith.constant 1.000000e+00 : f32
    %315 = vector.broadcast %cst_92 : f32 to vector<8x32xf32>
    %316 = arith.addf %314, %315 : vector<8x32xf32>
    %cst_93 = arith.constant 5.000000e-01 : f32
    %317 = vector.broadcast %cst_93 : f32 to vector<8x32xf32>
    %318 = arith.mulf %317, %316 : vector<8x32xf32>
    %319 = arith.mulf %308, %245 : vector<8x32xf32>
    %320 = arith.mulf %300, %310 : vector<8x32xf32>
    %321 = arith.addf %319, %320 : vector<8x32xf32>
    %322 = math.tanh %321 : vector<8x32xf32>
    %323 = arith.mulf %318, %322 : vector<8x32xf32>
    %324 = arith.sitofp %c2_i32 : i32 to f32
    %325 = vector.broadcast %324 : f32 to vector<8x1xf32>
    %326 = arith.cmpf ogt, %0, %325 : vector<8x1xf32>
    %327 = arith.extui %326 : vector<8x1xi1> to vector<8x1xi32>
    %328 = arith.sitofp %327 : vector<8x1xi32> to vector<8x1xf32>
    %329 = arith.sitofp %249 : i32 to f32
    %330 = vector.broadcast %329 : f32 to vector<8x1xf32>
    %331 = arith.cmpf ogt, %0, %330 : vector<8x1xf32>
    %332 = arith.extui %331 : vector<8x1xi1> to vector<8x1xi32>
    %333 = arith.sitofp %332 : vector<8x1xi32> to vector<8x1xf32>
    %334 = vector.broadcast %328 : vector<8x1xf32> to vector<8x32xf32>
    %335 = arith.mulf %334, %292 : vector<8x32xf32>
    %cst_94 = arith.constant 1.000000e+00 : f32
    %336 = vector.broadcast %cst_94 : f32 to vector<8x1xf32>
    %337 = arith.subf %336, %328 : vector<8x1xf32>
    %338 = vector.broadcast %337 : vector<8x1xf32> to vector<8x32xf32>
    %339 = arith.mulf %338, %221 : vector<8x32xf32>
    %340 = arith.addf %335, %339 : vector<8x32xf32>
    %341 = vector.broadcast %328 : vector<8x1xf32> to vector<8x32xf32>
    %342 = arith.mulf %341, %290 : vector<8x32xf32>
    %cst_95 = arith.constant 1.000000e+00 : f32
    %343 = vector.broadcast %cst_95 : f32 to vector<8x1xf32>
    %344 = arith.subf %343, %328 : vector<8x1xf32>
    %345 = vector.broadcast %344 : vector<8x1xf32> to vector<8x32xf32>
    %346 = arith.mulf %345, %228 : vector<8x32xf32>
    %347 = arith.addf %342, %346 : vector<8x32xf32>
    %348 = vector.broadcast %328 : vector<8x1xf32> to vector<8x32xf32>
    %349 = arith.mulf %348, %292 : vector<8x32xf32>
    %350 = arith.addf %231, %349 : vector<8x32xf32>
    %351 = vector.broadcast %333 : vector<8x1xf32> to vector<8x32xf32>
    %352 = arith.mulf %351, %323 : vector<8x32xf32>
    %cst_96 = arith.constant 1.000000e+00 : f32
    %353 = vector.broadcast %cst_96 : f32 to vector<8x1xf32>
    %354 = arith.subf %353, %333 : vector<8x1xf32>
    %355 = vector.broadcast %354 : vector<8x1xf32> to vector<8x32xf32>
    %356 = arith.mulf %355, %238 : vector<8x32xf32>
    %357 = arith.addf %352, %356 : vector<8x32xf32>
    %358 = vector.broadcast %333 : vector<8x1xf32> to vector<8x32xf32>
    %359 = arith.mulf %358, %321 : vector<8x32xf32>
    %cst_97 = arith.constant 1.000000e+00 : f32
    %360 = vector.broadcast %cst_97 : f32 to vector<8x1xf32>
    %361 = arith.subf %360, %333 : vector<8x1xf32>
    %362 = vector.broadcast %361 : vector<8x1xf32> to vector<8x32xf32>
    %363 = arith.mulf %362, %245 : vector<8x32xf32>
    %364 = arith.addf %359, %363 : vector<8x32xf32>
    %365 = vector.broadcast %333 : vector<8x1xf32> to vector<8x32xf32>
    %366 = arith.mulf %365, %323 : vector<8x32xf32>
    %367 = arith.addf %248, %366 : vector<8x32xf32>
    %c3_i32 = arith.constant 3 : i32
    %c9_i32_98 = arith.constant 9 : i32
    %368 = arith.subi %c9_i32_98, %c3_i32 : i32
    %c8_i32_99 = arith.constant 8 : i32
    %369 = arith.muli %c3_i32, %c8_i32_99 : i32
    %370 = tpu.assume_multiple %369, 8 : i32
    %c8_i32_100 = arith.constant 8 : i32
    %371 = arith.muli %368, %c8_i32_100 : i32
    %372 = tpu.assume_multiple %371, 8 : i32
    %373 = arith.index_cast %370 : i32 to index
    %c0_101 = arith.constant 0 : index
    %374 = vector.load %arg13[%373, %c0_101] : memref<80x256xf32, #tpu.memory_space<vmem>>, vector<8x128xf32>
    %375 = arith.index_cast %372 : i32 to index
    %c128_102 = arith.constant 128 : index
    %376 = vector.load %arg13[%375, %c128_102] : memref<80x256xf32, #tpu.memory_space<vmem>>, vector<8x128xf32>
    %cst_103 = arith.constant dense<0.000000e+00> : vector<8x128xf32>
    %377 = tpu.matmul %340, %8, %cst_103 {dimension_numbers = #tpu.dot_dimension_numbers<[1], [0], [0], [1], [0, 0, 1, 1], [], []>} : vector<8x32xf32>, vector<32x128xf32>, vector<8x128xf32> -> vector<8x128xf32>
    %378 = arith.addf %374, %377 : vector<8x128xf32>
    %cst_104 = arith.constant dense<0.000000e+00> : vector<8x128xf32>
    %379 = tpu.matmul %357, %9, %cst_104 {dimension_numbers = #tpu.dot_dimension_numbers<[1], [0], [0], [1], [0, 0, 1, 1], [], []>} : vector<8x32xf32>, vector<32x128xf32>, vector<8x128xf32> -> vector<8x128xf32>
    %380 = arith.addf %376, %379 : vector<8x128xf32>
    %381 = vector.extract_strided_slice %378 {offsets = [0, 0], sizes = [8, 32], strides = [1, 1]} : vector<8x128xf32> to vector<8x32xf32>
    %cst_105 = arith.constant 5.000000e-01 : f32
    %382 = vector.broadcast %cst_105 : f32 to vector<8x32xf32>
    %383 = arith.mulf %382, %381 : vector<8x32xf32>
    %384 = math.tanh %383 : vector<8x32xf32>
    %cst_106 = arith.constant 1.000000e+00 : f32
    %385 = vector.broadcast %cst_106 : f32 to vector<8x32xf32>
    %386 = arith.addf %384, %385 : vector<8x32xf32>
    %cst_107 = arith.constant 5.000000e-01 : f32
    %387 = vector.broadcast %cst_107 : f32 to vector<8x32xf32>
    %388 = arith.mulf %387, %386 : vector<8x32xf32>
    %389 = vector.extract_strided_slice %378 {offsets = [0, 32], sizes = [8, 32], strides = [1, 1]} : vector<8x128xf32> to vector<8x32xf32>
    %cst_108 = arith.constant 5.000000e-01 : f32
    %390 = vector.broadcast %cst_108 : f32 to vector<8x32xf32>
    %391 = arith.mulf %390, %389 : vector<8x32xf32>
    %392 = math.tanh %391 : vector<8x32xf32>
    %cst_109 = arith.constant 1.000000e+00 : f32
    %393 = vector.broadcast %cst_109 : f32 to vector<8x32xf32>
    %394 = arith.addf %392, %393 : vector<8x32xf32>
    %cst_110 = arith.constant 5.000000e-01 : f32
    %395 = vector.broadcast %cst_110 : f32 to vector<8x32xf32>
    %396 = arith.mulf %395, %394 : vector<8x32xf32>
    %397 = vector.extract_strided_slice %378 {offsets = [0, 64], sizes = [8, 32], strides = [1, 1]} : vector<8x128xf32> to vector<8x32xf32>
    %398 = math.tanh %397 : vector<8x32xf32>
    %399 = vector.extract_strided_slice %378 {offsets = [0, 96], sizes = [8, 32], strides = [1, 1]} : vector<8x128xf32> to vector<8x32xf32>
    %cst_111 = arith.constant 5.000000e-01 : f32
    %400 = vector.broadcast %cst_111 : f32 to vector<8x32xf32>
    %401 = arith.mulf %400, %399 : vector<8x32xf32>
    %402 = math.tanh %401 : vector<8x32xf32>
    %cst_112 = arith.constant 1.000000e+00 : f32
    %403 = vector.broadcast %cst_112 : f32 to vector<8x32xf32>
    %404 = arith.addf %402, %403 : vector<8x32xf32>
    %cst_113 = arith.constant 5.000000e-01 : f32
    %405 = vector.broadcast %cst_113 : f32 to vector<8x32xf32>
    %406 = arith.mulf %405, %404 : vector<8x32xf32>
    %407 = arith.mulf %396, %347 : vector<8x32xf32>
    %408 = arith.mulf %388, %398 : vector<8x32xf32>
    %409 = arith.addf %407, %408 : vector<8x32xf32>
    %410 = math.tanh %409 : vector<8x32xf32>
    %411 = arith.mulf %406, %410 : vector<8x32xf32>
    %412 = vector.extract_strided_slice %380 {offsets = [0, 0], sizes = [8, 32], strides = [1, 1]} : vector<8x128xf32> to vector<8x32xf32>
    %cst_114 = arith.constant 5.000000e-01 : f32
    %413 = vector.broadcast %cst_114 : f32 to vector<8x32xf32>
    %414 = arith.mulf %413, %412 : vector<8x32xf32>
    %415 = math.tanh %414 : vector<8x32xf32>
    %cst_115 = arith.constant 1.000000e+00 : f32
    %416 = vector.broadcast %cst_115 : f32 to vector<8x32xf32>
    %417 = arith.addf %415, %416 : vector<8x32xf32>
    %cst_116 = arith.constant 5.000000e-01 : f32
    %418 = vector.broadcast %cst_116 : f32 to vector<8x32xf32>
    %419 = arith.mulf %418, %417 : vector<8x32xf32>
    %420 = vector.extract_strided_slice %380 {offsets = [0, 32], sizes = [8, 32], strides = [1, 1]} : vector<8x128xf32> to vector<8x32xf32>
    %cst_117 = arith.constant 5.000000e-01 : f32
    %421 = vector.broadcast %cst_117 : f32 to vector<8x32xf32>
    %422 = arith.mulf %421, %420 : vector<8x32xf32>
    %423 = math.tanh %422 : vector<8x32xf32>
    %cst_118 = arith.constant 1.000000e+00 : f32
    %424 = vector.broadcast %cst_118 : f32 to vector<8x32xf32>
    %425 = arith.addf %423, %424 : vector<8x32xf32>
    %cst_119 = arith.constant 5.000000e-01 : f32
    %426 = vector.broadcast %cst_119 : f32 to vector<8x32xf32>
    %427 = arith.mulf %426, %425 : vector<8x32xf32>
    %428 = vector.extract_strided_slice %380 {offsets = [0, 64], sizes = [8, 32], strides = [1, 1]} : vector<8x128xf32> to vector<8x32xf32>
    %429 = math.tanh %428 : vector<8x32xf32>
    %430 = vector.extract_strided_slice %380 {offsets = [0, 96], sizes = [8, 32], strides = [1, 1]} : vector<8x128xf32> to vector<8x32xf32>
    %cst_120 = arith.constant 5.000000e-01 : f32
    %431 = vector.broadcast %cst_120 : f32 to vector<8x32xf32>
    %432 = arith.mulf %431, %430 : vector<8x32xf32>
    %433 = math.tanh %432 : vector<8x32xf32>
    %cst_121 = arith.constant 1.000000e+00 : f32
    %434 = vector.broadcast %cst_121 : f32 to vector<8x32xf32>
    %435 = arith.addf %433, %434 : vector<8x32xf32>
    %cst_122 = arith.constant 5.000000e-01 : f32
    %436 = vector.broadcast %cst_122 : f32 to vector<8x32xf32>
    %437 = arith.mulf %436, %435 : vector<8x32xf32>
    %438 = arith.mulf %427, %364 : vector<8x32xf32>
    %439 = arith.mulf %419, %429 : vector<8x32xf32>
    %440 = arith.addf %438, %439 : vector<8x32xf32>
    %441 = math.tanh %440 : vector<8x32xf32>
    %442 = arith.mulf %437, %441 : vector<8x32xf32>
    %443 = arith.sitofp %c3_i32 : i32 to f32
    %444 = vector.broadcast %443 : f32 to vector<8x1xf32>
    %445 = arith.cmpf ogt, %0, %444 : vector<8x1xf32>
    %446 = arith.extui %445 : vector<8x1xi1> to vector<8x1xi32>
    %447 = arith.sitofp %446 : vector<8x1xi32> to vector<8x1xf32>
    %448 = arith.sitofp %368 : i32 to f32
    %449 = vector.broadcast %448 : f32 to vector<8x1xf32>
    %450 = arith.cmpf ogt, %0, %449 : vector<8x1xf32>
    %451 = arith.extui %450 : vector<8x1xi1> to vector<8x1xi32>
    %452 = arith.sitofp %451 : vector<8x1xi32> to vector<8x1xf32>
    %453 = vector.broadcast %447 : vector<8x1xf32> to vector<8x32xf32>
    %454 = arith.mulf %453, %411 : vector<8x32xf32>
    %cst_123 = arith.constant 1.000000e+00 : f32
    %455 = vector.broadcast %cst_123 : f32 to vector<8x1xf32>
    %456 = arith.subf %455, %447 : vector<8x1xf32>
    %457 = vector.broadcast %456 : vector<8x1xf32> to vector<8x32xf32>
    %458 = arith.mulf %457, %340 : vector<8x32xf32>
    %459 = arith.addf %454, %458 : vector<8x32xf32>
    %460 = vector.broadcast %447 : vector<8x1xf32> to vector<8x32xf32>
    %461 = arith.mulf %460, %409 : vector<8x32xf32>
    %cst_124 = arith.constant 1.000000e+00 : f32
    %462 = vector.broadcast %cst_124 : f32 to vector<8x1xf32>
    %463 = arith.subf %462, %447 : vector<8x1xf32>
    %464 = vector.broadcast %463 : vector<8x1xf32> to vector<8x32xf32>
    %465 = arith.mulf %464, %347 : vector<8x32xf32>
    %466 = arith.addf %461, %465 : vector<8x32xf32>
    %467 = vector.broadcast %447 : vector<8x1xf32> to vector<8x32xf32>
    %468 = arith.mulf %467, %411 : vector<8x32xf32>
    %469 = arith.addf %350, %468 : vector<8x32xf32>
    %470 = vector.broadcast %452 : vector<8x1xf32> to vector<8x32xf32>
    %471 = arith.mulf %470, %442 : vector<8x32xf32>
    %cst_125 = arith.constant 1.000000e+00 : f32
    %472 = vector.broadcast %cst_125 : f32 to vector<8x1xf32>
    %473 = arith.subf %472, %452 : vector<8x1xf32>
    %474 = vector.broadcast %473 : vector<8x1xf32> to vector<8x32xf32>
    %475 = arith.mulf %474, %357 : vector<8x32xf32>
    %476 = arith.addf %471, %475 : vector<8x32xf32>
    %477 = vector.broadcast %452 : vector<8x1xf32> to vector<8x32xf32>
    %478 = arith.mulf %477, %440 : vector<8x32xf32>
    %cst_126 = arith.constant 1.000000e+00 : f32
    %479 = vector.broadcast %cst_126 : f32 to vector<8x1xf32>
    %480 = arith.subf %479, %452 : vector<8x1xf32>
    %481 = vector.broadcast %480 : vector<8x1xf32> to vector<8x32xf32>
    %482 = arith.mulf %481, %364 : vector<8x32xf32>
    %483 = arith.addf %478, %482 : vector<8x32xf32>
    %484 = vector.broadcast %452 : vector<8x1xf32> to vector<8x32xf32>
    %485 = arith.mulf %484, %442 : vector<8x32xf32>
    %486 = arith.addf %367, %485 : vector<8x32xf32>
    %c4_i32 = arith.constant 4 : i32
    %c9_i32_127 = arith.constant 9 : i32
    %487 = arith.subi %c9_i32_127, %c4_i32 : i32
    %c8_i32_128 = arith.constant 8 : i32
    %488 = arith.muli %c4_i32, %c8_i32_128 : i32
    %489 = tpu.assume_multiple %488, 8 : i32
    %c8_i32_129 = arith.constant 8 : i32
    %490 = arith.muli %487, %c8_i32_129 : i32
    %491 = tpu.assume_multiple %490, 8 : i32
    %492 = arith.index_cast %489 : i32 to index
    %c0_130 = arith.constant 0 : index
    %493 = vector.load %arg13[%492, %c0_130] : memref<80x256xf32, #tpu.memory_space<vmem>>, vector<8x128xf32>
    %494 = arith.index_cast %491 : i32 to index
    %c128_131 = arith.constant 128 : index
    %495 = vector.load %arg13[%494, %c128_131] : memref<80x256xf32, #tpu.memory_space<vmem>>, vector<8x128xf32>
    %cst_132 = arith.constant dense<0.000000e+00> : vector<8x128xf32>
    %496 = tpu.matmul %459, %8, %cst_132 {dimension_numbers = #tpu.dot_dimension_numbers<[1], [0], [0], [1], [0, 0, 1, 1], [], []>} : vector<8x32xf32>, vector<32x128xf32>, vector<8x128xf32> -> vector<8x128xf32>
    %497 = arith.addf %493, %496 : vector<8x128xf32>
    %cst_133 = arith.constant dense<0.000000e+00> : vector<8x128xf32>
    %498 = tpu.matmul %476, %9, %cst_133 {dimension_numbers = #tpu.dot_dimension_numbers<[1], [0], [0], [1], [0, 0, 1, 1], [], []>} : vector<8x32xf32>, vector<32x128xf32>, vector<8x128xf32> -> vector<8x128xf32>
    %499 = arith.addf %495, %498 : vector<8x128xf32>
    %500 = vector.extract_strided_slice %497 {offsets = [0, 0], sizes = [8, 32], strides = [1, 1]} : vector<8x128xf32> to vector<8x32xf32>
    %cst_134 = arith.constant 5.000000e-01 : f32
    %501 = vector.broadcast %cst_134 : f32 to vector<8x32xf32>
    %502 = arith.mulf %501, %500 : vector<8x32xf32>
    %503 = math.tanh %502 : vector<8x32xf32>
    %cst_135 = arith.constant 1.000000e+00 : f32
    %504 = vector.broadcast %cst_135 : f32 to vector<8x32xf32>
    %505 = arith.addf %503, %504 : vector<8x32xf32>
    %cst_136 = arith.constant 5.000000e-01 : f32
    %506 = vector.broadcast %cst_136 : f32 to vector<8x32xf32>
    %507 = arith.mulf %506, %505 : vector<8x32xf32>
    %508 = vector.extract_strided_slice %497 {offsets = [0, 32], sizes = [8, 32], strides = [1, 1]} : vector<8x128xf32> to vector<8x32xf32>
    %cst_137 = arith.constant 5.000000e-01 : f32
    %509 = vector.broadcast %cst_137 : f32 to vector<8x32xf32>
    %510 = arith.mulf %509, %508 : vector<8x32xf32>
    %511 = math.tanh %510 : vector<8x32xf32>
    %cst_138 = arith.constant 1.000000e+00 : f32
    %512 = vector.broadcast %cst_138 : f32 to vector<8x32xf32>
    %513 = arith.addf %511, %512 : vector<8x32xf32>
    %cst_139 = arith.constant 5.000000e-01 : f32
    %514 = vector.broadcast %cst_139 : f32 to vector<8x32xf32>
    %515 = arith.mulf %514, %513 : vector<8x32xf32>
    %516 = vector.extract_strided_slice %497 {offsets = [0, 64], sizes = [8, 32], strides = [1, 1]} : vector<8x128xf32> to vector<8x32xf32>
    %517 = math.tanh %516 : vector<8x32xf32>
    %518 = vector.extract_strided_slice %497 {offsets = [0, 96], sizes = [8, 32], strides = [1, 1]} : vector<8x128xf32> to vector<8x32xf32>
    %cst_140 = arith.constant 5.000000e-01 : f32
    %519 = vector.broadcast %cst_140 : f32 to vector<8x32xf32>
    %520 = arith.mulf %519, %518 : vector<8x32xf32>
    %521 = math.tanh %520 : vector<8x32xf32>
    %cst_141 = arith.constant 1.000000e+00 : f32
    %522 = vector.broadcast %cst_141 : f32 to vector<8x32xf32>
    %523 = arith.addf %521, %522 : vector<8x32xf32>
    %cst_142 = arith.constant 5.000000e-01 : f32
    %524 = vector.broadcast %cst_142 : f32 to vector<8x32xf32>
    %525 = arith.mulf %524, %523 : vector<8x32xf32>
    %526 = arith.mulf %515, %466 : vector<8x32xf32>
    %527 = arith.mulf %507, %517 : vector<8x32xf32>
    %528 = arith.addf %526, %527 : vector<8x32xf32>
    %529 = math.tanh %528 : vector<8x32xf32>
    %530 = arith.mulf %525, %529 : vector<8x32xf32>
    %531 = vector.extract_strided_slice %499 {offsets = [0, 0], sizes = [8, 32], strides = [1, 1]} : vector<8x128xf32> to vector<8x32xf32>
    %cst_143 = arith.constant 5.000000e-01 : f32
    %532 = vector.broadcast %cst_143 : f32 to vector<8x32xf32>
    %533 = arith.mulf %532, %531 : vector<8x32xf32>
    %534 = math.tanh %533 : vector<8x32xf32>
    %cst_144 = arith.constant 1.000000e+00 : f32
    %535 = vector.broadcast %cst_144 : f32 to vector<8x32xf32>
    %536 = arith.addf %534, %535 : vector<8x32xf32>
    %cst_145 = arith.constant 5.000000e-01 : f32
    %537 = vector.broadcast %cst_145 : f32 to vector<8x32xf32>
    %538 = arith.mulf %537, %536 : vector<8x32xf32>
    %539 = vector.extract_strided_slice %499 {offsets = [0, 32], sizes = [8, 32], strides = [1, 1]} : vector<8x128xf32> to vector<8x32xf32>
    %cst_146 = arith.constant 5.000000e-01 : f32
    %540 = vector.broadcast %cst_146 : f32 to vector<8x32xf32>
    %541 = arith.mulf %540, %539 : vector<8x32xf32>
    %542 = math.tanh %541 : vector<8x32xf32>
    %cst_147 = arith.constant 1.000000e+00 : f32
    %543 = vector.broadcast %cst_147 : f32 to vector<8x32xf32>
    %544 = arith.addf %542, %543 : vector<8x32xf32>
    %cst_148 = arith.constant 5.000000e-01 : f32
    %545 = vector.broadcast %cst_148 : f32 to vector<8x32xf32>
    %546 = arith.mulf %545, %544 : vector<8x32xf32>
    %547 = vector.extract_strided_slice %499 {offsets = [0, 64], sizes = [8, 32], strides = [1, 1]} : vector<8x128xf32> to vector<8x32xf32>
    %548 = math.tanh %547 : vector<8x32xf32>
    %549 = vector.extract_strided_slice %499 {offsets = [0, 96], sizes = [8, 32], strides = [1, 1]} : vector<8x128xf32> to vector<8x32xf32>
    %cst_149 = arith.constant 5.000000e-01 : f32
    %550 = vector.broadcast %cst_149 : f32 to vector<8x32xf32>
    %551 = arith.mulf %550, %549 : vector<8x32xf32>
    %552 = math.tanh %551 : vector<8x32xf32>
    %cst_150 = arith.constant 1.000000e+00 : f32
    %553 = vector.broadcast %cst_150 : f32 to vector<8x32xf32>
    %554 = arith.addf %552, %553 : vector<8x32xf32>
    %cst_151 = arith.constant 5.000000e-01 : f32
    %555 = vector.broadcast %cst_151 : f32 to vector<8x32xf32>
    %556 = arith.mulf %555, %554 : vector<8x32xf32>
    %557 = arith.mulf %546, %483 : vector<8x32xf32>
    %558 = arith.mulf %538, %548 : vector<8x32xf32>
    %559 = arith.addf %557, %558 : vector<8x32xf32>
    %560 = math.tanh %559 : vector<8x32xf32>
    %561 = arith.mulf %556, %560 : vector<8x32xf32>
    %562 = arith.sitofp %c4_i32 : i32 to f32
    %563 = vector.broadcast %562 : f32 to vector<8x1xf32>
    %564 = arith.cmpf ogt, %0, %563 : vector<8x1xf32>
    %565 = arith.extui %564 : vector<8x1xi1> to vector<8x1xi32>
    %566 = arith.sitofp %565 : vector<8x1xi32> to vector<8x1xf32>
    %567 = arith.sitofp %487 : i32 to f32
    %568 = vector.broadcast %567 : f32 to vector<8x1xf32>
    %569 = arith.cmpf ogt, %0, %568 : vector<8x1xf32>
    %570 = arith.extui %569 : vector<8x1xi1> to vector<8x1xi32>
    %571 = arith.sitofp %570 : vector<8x1xi32> to vector<8x1xf32>
    %572 = vector.broadcast %566 : vector<8x1xf32> to vector<8x32xf32>
    %573 = arith.mulf %572, %530 : vector<8x32xf32>
    %cst_152 = arith.constant 1.000000e+00 : f32
    %574 = vector.broadcast %cst_152 : f32 to vector<8x1xf32>
    %575 = arith.subf %574, %566 : vector<8x1xf32>
    %576 = vector.broadcast %575 : vector<8x1xf32> to vector<8x32xf32>
    %577 = arith.mulf %576, %459 : vector<8x32xf32>
    %578 = arith.addf %573, %577 : vector<8x32xf32>
    %579 = vector.broadcast %566 : vector<8x1xf32> to vector<8x32xf32>
    %580 = arith.mulf %579, %528 : vector<8x32xf32>
    %cst_153 = arith.constant 1.000000e+00 : f32
    %581 = vector.broadcast %cst_153 : f32 to vector<8x1xf32>
    %582 = arith.subf %581, %566 : vector<8x1xf32>
    %583 = vector.broadcast %582 : vector<8x1xf32> to vector<8x32xf32>
    %584 = arith.mulf %583, %466 : vector<8x32xf32>
    %585 = arith.addf %580, %584 : vector<8x32xf32>
    %586 = vector.broadcast %566 : vector<8x1xf32> to vector<8x32xf32>
    %587 = arith.mulf %586, %530 : vector<8x32xf32>
    %588 = arith.addf %469, %587 : vector<8x32xf32>
    %589 = vector.broadcast %571 : vector<8x1xf32> to vector<8x32xf32>
    %590 = arith.mulf %589, %561 : vector<8x32xf32>
    %cst_154 = arith.constant 1.000000e+00 : f32
    %591 = vector.broadcast %cst_154 : f32 to vector<8x1xf32>
    %592 = arith.subf %591, %571 : vector<8x1xf32>
    %593 = vector.broadcast %592 : vector<8x1xf32> to vector<8x32xf32>
    %594 = arith.mulf %593, %476 : vector<8x32xf32>
    %595 = arith.addf %590, %594 : vector<8x32xf32>
    %596 = vector.broadcast %571 : vector<8x1xf32> to vector<8x32xf32>
    %597 = arith.mulf %596, %559 : vector<8x32xf32>
    %cst_155 = arith.constant 1.000000e+00 : f32
    %598 = vector.broadcast %cst_155 : f32 to vector<8x1xf32>
    %599 = arith.subf %598, %571 : vector<8x1xf32>
    %600 = vector.broadcast %599 : vector<8x1xf32> to vector<8x32xf32>
    %601 = arith.mulf %600, %483 : vector<8x32xf32>
    %602 = arith.addf %597, %601 : vector<8x32xf32>
    %603 = vector.broadcast %571 : vector<8x1xf32> to vector<8x32xf32>
    %604 = arith.mulf %603, %561 : vector<8x32xf32>
    %605 = arith.addf %486, %604 : vector<8x32xf32>
    %c5_i32 = arith.constant 5 : i32
    %c9_i32_156 = arith.constant 9 : i32
    %606 = arith.subi %c9_i32_156, %c5_i32 : i32
    %c8_i32_157 = arith.constant 8 : i32
    %607 = arith.muli %c5_i32, %c8_i32_157 : i32
    %608 = tpu.assume_multiple %607, 8 : i32
    %c8_i32_158 = arith.constant 8 : i32
    %609 = arith.muli %606, %c8_i32_158 : i32
    %610 = tpu.assume_multiple %609, 8 : i32
    %611 = arith.index_cast %608 : i32 to index
    %c0_159 = arith.constant 0 : index
    %612 = vector.load %arg13[%611, %c0_159] : memref<80x256xf32, #tpu.memory_space<vmem>>, vector<8x128xf32>
    %613 = arith.index_cast %610 : i32 to index
    %c128_160 = arith.constant 128 : index
    %614 = vector.load %arg13[%613, %c128_160] : memref<80x256xf32, #tpu.memory_space<vmem>>, vector<8x128xf32>
    %cst_161 = arith.constant dense<0.000000e+00> : vector<8x128xf32>
    %615 = tpu.matmul %578, %8, %cst_161 {dimension_numbers = #tpu.dot_dimension_numbers<[1], [0], [0], [1], [0, 0, 1, 1], [], []>} : vector<8x32xf32>, vector<32x128xf32>, vector<8x128xf32> -> vector<8x128xf32>
    %616 = arith.addf %612, %615 : vector<8x128xf32>
    %cst_162 = arith.constant dense<0.000000e+00> : vector<8x128xf32>
    %617 = tpu.matmul %595, %9, %cst_162 {dimension_numbers = #tpu.dot_dimension_numbers<[1], [0], [0], [1], [0, 0, 1, 1], [], []>} : vector<8x32xf32>, vector<32x128xf32>, vector<8x128xf32> -> vector<8x128xf32>
    %618 = arith.addf %614, %617 : vector<8x128xf32>
    %619 = vector.extract_strided_slice %616 {offsets = [0, 0], sizes = [8, 32], strides = [1, 1]} : vector<8x128xf32> to vector<8x32xf32>
    %cst_163 = arith.constant 5.000000e-01 : f32
    %620 = vector.broadcast %cst_163 : f32 to vector<8x32xf32>
    %621 = arith.mulf %620, %619 : vector<8x32xf32>
    %622 = math.tanh %621 : vector<8x32xf32>
    %cst_164 = arith.constant 1.000000e+00 : f32
    %623 = vector.broadcast %cst_164 : f32 to vector<8x32xf32>
    %624 = arith.addf %622, %623 : vector<8x32xf32>
    %cst_165 = arith.constant 5.000000e-01 : f32
    %625 = vector.broadcast %cst_165 : f32 to vector<8x32xf32>
    %626 = arith.mulf %625, %624 : vector<8x32xf32>
    %627 = vector.extract_strided_slice %616 {offsets = [0, 32], sizes = [8, 32], strides = [1, 1]} : vector<8x128xf32> to vector<8x32xf32>
    %cst_166 = arith.constant 5.000000e-01 : f32
    %628 = vector.broadcast %cst_166 : f32 to vector<8x32xf32>
    %629 = arith.mulf %628, %627 : vector<8x32xf32>
    %630 = math.tanh %629 : vector<8x32xf32>
    %cst_167 = arith.constant 1.000000e+00 : f32
    %631 = vector.broadcast %cst_167 : f32 to vector<8x32xf32>
    %632 = arith.addf %630, %631 : vector<8x32xf32>
    %cst_168 = arith.constant 5.000000e-01 : f32
    %633 = vector.broadcast %cst_168 : f32 to vector<8x32xf32>
    %634 = arith.mulf %633, %632 : vector<8x32xf32>
    %635 = vector.extract_strided_slice %616 {offsets = [0, 64], sizes = [8, 32], strides = [1, 1]} : vector<8x128xf32> to vector<8x32xf32>
    %636 = math.tanh %635 : vector<8x32xf32>
    %637 = vector.extract_strided_slice %616 {offsets = [0, 96], sizes = [8, 32], strides = [1, 1]} : vector<8x128xf32> to vector<8x32xf32>
    %cst_169 = arith.constant 5.000000e-01 : f32
    %638 = vector.broadcast %cst_169 : f32 to vector<8x32xf32>
    %639 = arith.mulf %638, %637 : vector<8x32xf32>
    %640 = math.tanh %639 : vector<8x32xf32>
    %cst_170 = arith.constant 1.000000e+00 : f32
    %641 = vector.broadcast %cst_170 : f32 to vector<8x32xf32>
    %642 = arith.addf %640, %641 : vector<8x32xf32>
    %cst_171 = arith.constant 5.000000e-01 : f32
    %643 = vector.broadcast %cst_171 : f32 to vector<8x32xf32>
    %644 = arith.mulf %643, %642 : vector<8x32xf32>
    %645 = arith.mulf %634, %585 : vector<8x32xf32>
    %646 = arith.mulf %626, %636 : vector<8x32xf32>
    %647 = arith.addf %645, %646 : vector<8x32xf32>
    %648 = math.tanh %647 : vector<8x32xf32>
    %649 = arith.mulf %644, %648 : vector<8x32xf32>
    %650 = vector.extract_strided_slice %618 {offsets = [0, 0], sizes = [8, 32], strides = [1, 1]} : vector<8x128xf32> to vector<8x32xf32>
    %cst_172 = arith.constant 5.000000e-01 : f32
    %651 = vector.broadcast %cst_172 : f32 to vector<8x32xf32>
    %652 = arith.mulf %651, %650 : vector<8x32xf32>
    %653 = math.tanh %652 : vector<8x32xf32>
    %cst_173 = arith.constant 1.000000e+00 : f32
    %654 = vector.broadcast %cst_173 : f32 to vector<8x32xf32>
    %655 = arith.addf %653, %654 : vector<8x32xf32>
    %cst_174 = arith.constant 5.000000e-01 : f32
    %656 = vector.broadcast %cst_174 : f32 to vector<8x32xf32>
    %657 = arith.mulf %656, %655 : vector<8x32xf32>
    %658 = vector.extract_strided_slice %618 {offsets = [0, 32], sizes = [8, 32], strides = [1, 1]} : vector<8x128xf32> to vector<8x32xf32>
    %cst_175 = arith.constant 5.000000e-01 : f32
    %659 = vector.broadcast %cst_175 : f32 to vector<8x32xf32>
    %660 = arith.mulf %659, %658 : vector<8x32xf32>
    %661 = math.tanh %660 : vector<8x32xf32>
    %cst_176 = arith.constant 1.000000e+00 : f32
    %662 = vector.broadcast %cst_176 : f32 to vector<8x32xf32>
    %663 = arith.addf %661, %662 : vector<8x32xf32>
    %cst_177 = arith.constant 5.000000e-01 : f32
    %664 = vector.broadcast %cst_177 : f32 to vector<8x32xf32>
    %665 = arith.mulf %664, %663 : vector<8x32xf32>
    %666 = vector.extract_strided_slice %618 {offsets = [0, 64], sizes = [8, 32], strides = [1, 1]} : vector<8x128xf32> to vector<8x32xf32>
    %667 = math.tanh %666 : vector<8x32xf32>
    %668 = vector.extract_strided_slice %618 {offsets = [0, 96], sizes = [8, 32], strides = [1, 1]} : vector<8x128xf32> to vector<8x32xf32>
    %cst_178 = arith.constant 5.000000e-01 : f32
    %669 = vector.broadcast %cst_178 : f32 to vector<8x32xf32>
    %670 = arith.mulf %669, %668 : vector<8x32xf32>
    %671 = math.tanh %670 : vector<8x32xf32>
    %cst_179 = arith.constant 1.000000e+00 : f32
    %672 = vector.broadcast %cst_179 : f32 to vector<8x32xf32>
    %673 = arith.addf %671, %672 : vector<8x32xf32>
    %cst_180 = arith.constant 5.000000e-01 : f32
    %674 = vector.broadcast %cst_180 : f32 to vector<8x32xf32>
    %675 = arith.mulf %674, %673 : vector<8x32xf32>
    %676 = arith.mulf %665, %602 : vector<8x32xf32>
    %677 = arith.mulf %657, %667 : vector<8x32xf32>
    %678 = arith.addf %676, %677 : vector<8x32xf32>
    %679 = math.tanh %678 : vector<8x32xf32>
    %680 = arith.mulf %675, %679 : vector<8x32xf32>
    %681 = arith.sitofp %c5_i32 : i32 to f32
    %682 = vector.broadcast %681 : f32 to vector<8x1xf32>
    %683 = arith.cmpf ogt, %0, %682 : vector<8x1xf32>
    %684 = arith.extui %683 : vector<8x1xi1> to vector<8x1xi32>
    %685 = arith.sitofp %684 : vector<8x1xi32> to vector<8x1xf32>
    %686 = arith.sitofp %606 : i32 to f32
    %687 = vector.broadcast %686 : f32 to vector<8x1xf32>
    %688 = arith.cmpf ogt, %0, %687 : vector<8x1xf32>
    %689 = arith.extui %688 : vector<8x1xi1> to vector<8x1xi32>
    %690 = arith.sitofp %689 : vector<8x1xi32> to vector<8x1xf32>
    %691 = vector.broadcast %685 : vector<8x1xf32> to vector<8x32xf32>
    %692 = arith.mulf %691, %649 : vector<8x32xf32>
    %cst_181 = arith.constant 1.000000e+00 : f32
    %693 = vector.broadcast %cst_181 : f32 to vector<8x1xf32>
    %694 = arith.subf %693, %685 : vector<8x1xf32>
    %695 = vector.broadcast %694 : vector<8x1xf32> to vector<8x32xf32>
    %696 = arith.mulf %695, %578 : vector<8x32xf32>
    %697 = arith.addf %692, %696 : vector<8x32xf32>
    %698 = vector.broadcast %685 : vector<8x1xf32> to vector<8x32xf32>
    %699 = arith.mulf %698, %647 : vector<8x32xf32>
    %cst_182 = arith.constant 1.000000e+00 : f32
    %700 = vector.broadcast %cst_182 : f32 to vector<8x1xf32>
    %701 = arith.subf %700, %685 : vector<8x1xf32>
    %702 = vector.broadcast %701 : vector<8x1xf32> to vector<8x32xf32>
    %703 = arith.mulf %702, %585 : vector<8x32xf32>
    %704 = arith.addf %699, %703 : vector<8x32xf32>
    %705 = vector.broadcast %685 : vector<8x1xf32> to vector<8x32xf32>
    %706 = arith.mulf %705, %649 : vector<8x32xf32>
    %707 = arith.addf %588, %706 : vector<8x32xf32>
    %708 = vector.broadcast %690 : vector<8x1xf32> to vector<8x32xf32>
    %709 = arith.mulf %708, %680 : vector<8x32xf32>
    %cst_183 = arith.constant 1.000000e+00 : f32
    %710 = vector.broadcast %cst_183 : f32 to vector<8x1xf32>
    %711 = arith.subf %710, %690 : vector<8x1xf32>
    %712 = vector.broadcast %711 : vector<8x1xf32> to vector<8x32xf32>
    %713 = arith.mulf %712, %595 : vector<8x32xf32>
    %714 = arith.addf %709, %713 : vector<8x32xf32>
    %715 = vector.broadcast %690 : vector<8x1xf32> to vector<8x32xf32>
    %716 = arith.mulf %715, %678 : vector<8x32xf32>
    %cst_184 = arith.constant 1.000000e+00 : f32
    %717 = vector.broadcast %cst_184 : f32 to vector<8x1xf32>
    %718 = arith.subf %717, %690 : vector<8x1xf32>
    %719 = vector.broadcast %718 : vector<8x1xf32> to vector<8x32xf32>
    %720 = arith.mulf %719, %602 : vector<8x32xf32>
    %721 = arith.addf %716, %720 : vector<8x32xf32>
    %722 = vector.broadcast %690 : vector<8x1xf32> to vector<8x32xf32>
    %723 = arith.mulf %722, %680 : vector<8x32xf32>
    %724 = arith.addf %605, %723 : vector<8x32xf32>
    %c6_i32 = arith.constant 6 : i32
    %c9_i32_185 = arith.constant 9 : i32
    %725 = arith.subi %c9_i32_185, %c6_i32 : i32
    %c8_i32_186 = arith.constant 8 : i32
    %726 = arith.muli %c6_i32, %c8_i32_186 : i32
    %727 = tpu.assume_multiple %726, 8 : i32
    %c8_i32_187 = arith.constant 8 : i32
    %728 = arith.muli %725, %c8_i32_187 : i32
    %729 = tpu.assume_multiple %728, 8 : i32
    %730 = arith.index_cast %727 : i32 to index
    %c0_188 = arith.constant 0 : index
    %731 = vector.load %arg13[%730, %c0_188] : memref<80x256xf32, #tpu.memory_space<vmem>>, vector<8x128xf32>
    %732 = arith.index_cast %729 : i32 to index
    %c128_189 = arith.constant 128 : index
    %733 = vector.load %arg13[%732, %c128_189] : memref<80x256xf32, #tpu.memory_space<vmem>>, vector<8x128xf32>
    %cst_190 = arith.constant dense<0.000000e+00> : vector<8x128xf32>
    %734 = tpu.matmul %697, %8, %cst_190 {dimension_numbers = #tpu.dot_dimension_numbers<[1], [0], [0], [1], [0, 0, 1, 1], [], []>} : vector<8x32xf32>, vector<32x128xf32>, vector<8x128xf32> -> vector<8x128xf32>
    %735 = arith.addf %731, %734 : vector<8x128xf32>
    %cst_191 = arith.constant dense<0.000000e+00> : vector<8x128xf32>
    %736 = tpu.matmul %714, %9, %cst_191 {dimension_numbers = #tpu.dot_dimension_numbers<[1], [0], [0], [1], [0, 0, 1, 1], [], []>} : vector<8x32xf32>, vector<32x128xf32>, vector<8x128xf32> -> vector<8x128xf32>
    %737 = arith.addf %733, %736 : vector<8x128xf32>
    %738 = vector.extract_strided_slice %735 {offsets = [0, 0], sizes = [8, 32], strides = [1, 1]} : vector<8x128xf32> to vector<8x32xf32>
    %cst_192 = arith.constant 5.000000e-01 : f32
    %739 = vector.broadcast %cst_192 : f32 to vector<8x32xf32>
    %740 = arith.mulf %739, %738 : vector<8x32xf32>
    %741 = math.tanh %740 : vector<8x32xf32>
    %cst_193 = arith.constant 1.000000e+00 : f32
    %742 = vector.broadcast %cst_193 : f32 to vector<8x32xf32>
    %743 = arith.addf %741, %742 : vector<8x32xf32>
    %cst_194 = arith.constant 5.000000e-01 : f32
    %744 = vector.broadcast %cst_194 : f32 to vector<8x32xf32>
    %745 = arith.mulf %744, %743 : vector<8x32xf32>
    %746 = vector.extract_strided_slice %735 {offsets = [0, 32], sizes = [8, 32], strides = [1, 1]} : vector<8x128xf32> to vector<8x32xf32>
    %cst_195 = arith.constant 5.000000e-01 : f32
    %747 = vector.broadcast %cst_195 : f32 to vector<8x32xf32>
    %748 = arith.mulf %747, %746 : vector<8x32xf32>
    %749 = math.tanh %748 : vector<8x32xf32>
    %cst_196 = arith.constant 1.000000e+00 : f32
    %750 = vector.broadcast %cst_196 : f32 to vector<8x32xf32>
    %751 = arith.addf %749, %750 : vector<8x32xf32>
    %cst_197 = arith.constant 5.000000e-01 : f32
    %752 = vector.broadcast %cst_197 : f32 to vector<8x32xf32>
    %753 = arith.mulf %752, %751 : vector<8x32xf32>
    %754 = vector.extract_strided_slice %735 {offsets = [0, 64], sizes = [8, 32], strides = [1, 1]} : vector<8x128xf32> to vector<8x32xf32>
    %755 = math.tanh %754 : vector<8x32xf32>
    %756 = vector.extract_strided_slice %735 {offsets = [0, 96], sizes = [8, 32], strides = [1, 1]} : vector<8x128xf32> to vector<8x32xf32>
    %cst_198 = arith.constant 5.000000e-01 : f32
    %757 = vector.broadcast %cst_198 : f32 to vector<8x32xf32>
    %758 = arith.mulf %757, %756 : vector<8x32xf32>
    %759 = math.tanh %758 : vector<8x32xf32>
    %cst_199 = arith.constant 1.000000e+00 : f32
    %760 = vector.broadcast %cst_199 : f32 to vector<8x32xf32>
    %761 = arith.addf %759, %760 : vector<8x32xf32>
    %cst_200 = arith.constant 5.000000e-01 : f32
    %762 = vector.broadcast %cst_200 : f32 to vector<8x32xf32>
    %763 = arith.mulf %762, %761 : vector<8x32xf32>
    %764 = arith.mulf %753, %704 : vector<8x32xf32>
    %765 = arith.mulf %745, %755 : vector<8x32xf32>
    %766 = arith.addf %764, %765 : vector<8x32xf32>
    %767 = math.tanh %766 : vector<8x32xf32>
    %768 = arith.mulf %763, %767 : vector<8x32xf32>
    %769 = vector.extract_strided_slice %737 {offsets = [0, 0], sizes = [8, 32], strides = [1, 1]} : vector<8x128xf32> to vector<8x32xf32>
    %cst_201 = arith.constant 5.000000e-01 : f32
    %770 = vector.broadcast %cst_201 : f32 to vector<8x32xf32>
    %771 = arith.mulf %770, %769 : vector<8x32xf32>
    %772 = math.tanh %771 : vector<8x32xf32>
    %cst_202 = arith.constant 1.000000e+00 : f32
    %773 = vector.broadcast %cst_202 : f32 to vector<8x32xf32>
    %774 = arith.addf %772, %773 : vector<8x32xf32>
    %cst_203 = arith.constant 5.000000e-01 : f32
    %775 = vector.broadcast %cst_203 : f32 to vector<8x32xf32>
    %776 = arith.mulf %775, %774 : vector<8x32xf32>
    %777 = vector.extract_strided_slice %737 {offsets = [0, 32], sizes = [8, 32], strides = [1, 1]} : vector<8x128xf32> to vector<8x32xf32>
    %cst_204 = arith.constant 5.000000e-01 : f32
    %778 = vector.broadcast %cst_204 : f32 to vector<8x32xf32>
    %779 = arith.mulf %778, %777 : vector<8x32xf32>
    %780 = math.tanh %779 : vector<8x32xf32>
    %cst_205 = arith.constant 1.000000e+00 : f32
    %781 = vector.broadcast %cst_205 : f32 to vector<8x32xf32>
    %782 = arith.addf %780, %781 : vector<8x32xf32>
    %cst_206 = arith.constant 5.000000e-01 : f32
    %783 = vector.broadcast %cst_206 : f32 to vector<8x32xf32>
    %784 = arith.mulf %783, %782 : vector<8x32xf32>
    %785 = vector.extract_strided_slice %737 {offsets = [0, 64], sizes = [8, 32], strides = [1, 1]} : vector<8x128xf32> to vector<8x32xf32>
    %786 = math.tanh %785 : vector<8x32xf32>
    %787 = vector.extract_strided_slice %737 {offsets = [0, 96], sizes = [8, 32], strides = [1, 1]} : vector<8x128xf32> to vector<8x32xf32>
    %cst_207 = arith.constant 5.000000e-01 : f32
    %788 = vector.broadcast %cst_207 : f32 to vector<8x32xf32>
    %789 = arith.mulf %788, %787 : vector<8x32xf32>
    %790 = math.tanh %789 : vector<8x32xf32>
    %cst_208 = arith.constant 1.000000e+00 : f32
    %791 = vector.broadcast %cst_208 : f32 to vector<8x32xf32>
    %792 = arith.addf %790, %791 : vector<8x32xf32>
    %cst_209 = arith.constant 5.000000e-01 : f32
    %793 = vector.broadcast %cst_209 : f32 to vector<8x32xf32>
    %794 = arith.mulf %793, %792 : vector<8x32xf32>
    %795 = arith.mulf %784, %721 : vector<8x32xf32>
    %796 = arith.mulf %776, %786 : vector<8x32xf32>
    %797 = arith.addf %795, %796 : vector<8x32xf32>
    %798 = math.tanh %797 : vector<8x32xf32>
    %799 = arith.mulf %794, %798 : vector<8x32xf32>
    %800 = arith.sitofp %c6_i32 : i32 to f32
    %801 = vector.broadcast %800 : f32 to vector<8x1xf32>
    %802 = arith.cmpf ogt, %0, %801 : vector<8x1xf32>
    %803 = arith.extui %802 : vector<8x1xi1> to vector<8x1xi32>
    %804 = arith.sitofp %803 : vector<8x1xi32> to vector<8x1xf32>
    %805 = arith.sitofp %725 : i32 to f32
    %806 = vector.broadcast %805 : f32 to vector<8x1xf32>
    %807 = arith.cmpf ogt, %0, %806 : vector<8x1xf32>
    %808 = arith.extui %807 : vector<8x1xi1> to vector<8x1xi32>
    %809 = arith.sitofp %808 : vector<8x1xi32> to vector<8x1xf32>
    %810 = vector.broadcast %804 : vector<8x1xf32> to vector<8x32xf32>
    %811 = arith.mulf %810, %768 : vector<8x32xf32>
    %cst_210 = arith.constant 1.000000e+00 : f32
    %812 = vector.broadcast %cst_210 : f32 to vector<8x1xf32>
    %813 = arith.subf %812, %804 : vector<8x1xf32>
    %814 = vector.broadcast %813 : vector<8x1xf32> to vector<8x32xf32>
    %815 = arith.mulf %814, %697 : vector<8x32xf32>
    %816 = arith.addf %811, %815 : vector<8x32xf32>
    %817 = vector.broadcast %804 : vector<8x1xf32> to vector<8x32xf32>
    %818 = arith.mulf %817, %766 : vector<8x32xf32>
    %cst_211 = arith.constant 1.000000e+00 : f32
    %819 = vector.broadcast %cst_211 : f32 to vector<8x1xf32>
    %820 = arith.subf %819, %804 : vector<8x1xf32>
    %821 = vector.broadcast %820 : vector<8x1xf32> to vector<8x32xf32>
    %822 = arith.mulf %821, %704 : vector<8x32xf32>
    %823 = arith.addf %818, %822 : vector<8x32xf32>
    %824 = vector.broadcast %804 : vector<8x1xf32> to vector<8x32xf32>
    %825 = arith.mulf %824, %768 : vector<8x32xf32>
    %826 = arith.addf %707, %825 : vector<8x32xf32>
    %827 = vector.broadcast %809 : vector<8x1xf32> to vector<8x32xf32>
    %828 = arith.mulf %827, %799 : vector<8x32xf32>
    %cst_212 = arith.constant 1.000000e+00 : f32
    %829 = vector.broadcast %cst_212 : f32 to vector<8x1xf32>
    %830 = arith.subf %829, %809 : vector<8x1xf32>
    %831 = vector.broadcast %830 : vector<8x1xf32> to vector<8x32xf32>
    %832 = arith.mulf %831, %714 : vector<8x32xf32>
    %833 = arith.addf %828, %832 : vector<8x32xf32>
    %834 = vector.broadcast %809 : vector<8x1xf32> to vector<8x32xf32>
    %835 = arith.mulf %834, %797 : vector<8x32xf32>
    %cst_213 = arith.constant 1.000000e+00 : f32
    %836 = vector.broadcast %cst_213 : f32 to vector<8x1xf32>
    %837 = arith.subf %836, %809 : vector<8x1xf32>
    %838 = vector.broadcast %837 : vector<8x1xf32> to vector<8x32xf32>
    %839 = arith.mulf %838, %721 : vector<8x32xf32>
    %840 = arith.addf %835, %839 : vector<8x32xf32>
    %841 = vector.broadcast %809 : vector<8x1xf32> to vector<8x32xf32>
    %842 = arith.mulf %841, %799 : vector<8x32xf32>
    %843 = arith.addf %724, %842 : vector<8x32xf32>
    %c7_i32 = arith.constant 7 : i32
    %c9_i32_214 = arith.constant 9 : i32
    %844 = arith.subi %c9_i32_214, %c7_i32 : i32
    %c8_i32_215 = arith.constant 8 : i32
    %845 = arith.muli %c7_i32, %c8_i32_215 : i32
    %846 = tpu.assume_multiple %845, 8 : i32
    %c8_i32_216 = arith.constant 8 : i32
    %847 = arith.muli %844, %c8_i32_216 : i32
    %848 = tpu.assume_multiple %847, 8 : i32
    %849 = arith.index_cast %846 : i32 to index
    %c0_217 = arith.constant 0 : index
    %850 = vector.load %arg13[%849, %c0_217] : memref<80x256xf32, #tpu.memory_space<vmem>>, vector<8x128xf32>
    %851 = arith.index_cast %848 : i32 to index
    %c128_218 = arith.constant 128 : index
    %852 = vector.load %arg13[%851, %c128_218] : memref<80x256xf32, #tpu.memory_space<vmem>>, vector<8x128xf32>
    %cst_219 = arith.constant dense<0.000000e+00> : vector<8x128xf32>
    %853 = tpu.matmul %816, %8, %cst_219 {dimension_numbers = #tpu.dot_dimension_numbers<[1], [0], [0], [1], [0, 0, 1, 1], [], []>} : vector<8x32xf32>, vector<32x128xf32>, vector<8x128xf32> -> vector<8x128xf32>
    %854 = arith.addf %850, %853 : vector<8x128xf32>
    %cst_220 = arith.constant dense<0.000000e+00> : vector<8x128xf32>
    %855 = tpu.matmul %833, %9, %cst_220 {dimension_numbers = #tpu.dot_dimension_numbers<[1], [0], [0], [1], [0, 0, 1, 1], [], []>} : vector<8x32xf32>, vector<32x128xf32>, vector<8x128xf32> -> vector<8x128xf32>
    %856 = arith.addf %852, %855 : vector<8x128xf32>
    %857 = vector.extract_strided_slice %854 {offsets = [0, 0], sizes = [8, 32], strides = [1, 1]} : vector<8x128xf32> to vector<8x32xf32>
    %cst_221 = arith.constant 5.000000e-01 : f32
    %858 = vector.broadcast %cst_221 : f32 to vector<8x32xf32>
    %859 = arith.mulf %858, %857 : vector<8x32xf32>
    %860 = math.tanh %859 : vector<8x32xf32>
    %cst_222 = arith.constant 1.000000e+00 : f32
    %861 = vector.broadcast %cst_222 : f32 to vector<8x32xf32>
    %862 = arith.addf %860, %861 : vector<8x32xf32>
    %cst_223 = arith.constant 5.000000e-01 : f32
    %863 = vector.broadcast %cst_223 : f32 to vector<8x32xf32>
    %864 = arith.mulf %863, %862 : vector<8x32xf32>
    %865 = vector.extract_strided_slice %854 {offsets = [0, 32], sizes = [8, 32], strides = [1, 1]} : vector<8x128xf32> to vector<8x32xf32>
    %cst_224 = arith.constant 5.000000e-01 : f32
    %866 = vector.broadcast %cst_224 : f32 to vector<8x32xf32>
    %867 = arith.mulf %866, %865 : vector<8x32xf32>
    %868 = math.tanh %867 : vector<8x32xf32>
    %cst_225 = arith.constant 1.000000e+00 : f32
    %869 = vector.broadcast %cst_225 : f32 to vector<8x32xf32>
    %870 = arith.addf %868, %869 : vector<8x32xf32>
    %cst_226 = arith.constant 5.000000e-01 : f32
    %871 = vector.broadcast %cst_226 : f32 to vector<8x32xf32>
    %872 = arith.mulf %871, %870 : vector<8x32xf32>
    %873 = vector.extract_strided_slice %854 {offsets = [0, 64], sizes = [8, 32], strides = [1, 1]} : vector<8x128xf32> to vector<8x32xf32>
    %874 = math.tanh %873 : vector<8x32xf32>
    %875 = vector.extract_strided_slice %854 {offsets = [0, 96], sizes = [8, 32], strides = [1, 1]} : vector<8x128xf32> to vector<8x32xf32>
    %cst_227 = arith.constant 5.000000e-01 : f32
    %876 = vector.broadcast %cst_227 : f32 to vector<8x32xf32>
    %877 = arith.mulf %876, %875 : vector<8x32xf32>
    %878 = math.tanh %877 : vector<8x32xf32>
    %cst_228 = arith.constant 1.000000e+00 : f32
    %879 = vector.broadcast %cst_228 : f32 to vector<8x32xf32>
    %880 = arith.addf %878, %879 : vector<8x32xf32>
    %cst_229 = arith.constant 5.000000e-01 : f32
    %881 = vector.broadcast %cst_229 : f32 to vector<8x32xf32>
    %882 = arith.mulf %881, %880 : vector<8x32xf32>
    %883 = arith.mulf %872, %823 : vector<8x32xf32>
    %884 = arith.mulf %864, %874 : vector<8x32xf32>
    %885 = arith.addf %883, %884 : vector<8x32xf32>
    %886 = math.tanh %885 : vector<8x32xf32>
    %887 = arith.mulf %882, %886 : vector<8x32xf32>
    %888 = vector.extract_strided_slice %856 {offsets = [0, 0], sizes = [8, 32], strides = [1, 1]} : vector<8x128xf32> to vector<8x32xf32>
    %cst_230 = arith.constant 5.000000e-01 : f32
    %889 = vector.broadcast %cst_230 : f32 to vector<8x32xf32>
    %890 = arith.mulf %889, %888 : vector<8x32xf32>
    %891 = math.tanh %890 : vector<8x32xf32>
    %cst_231 = arith.constant 1.000000e+00 : f32
    %892 = vector.broadcast %cst_231 : f32 to vector<8x32xf32>
    %893 = arith.addf %891, %892 : vector<8x32xf32>
    %cst_232 = arith.constant 5.000000e-01 : f32
    %894 = vector.broadcast %cst_232 : f32 to vector<8x32xf32>
    %895 = arith.mulf %894, %893 : vector<8x32xf32>
    %896 = vector.extract_strided_slice %856 {offsets = [0, 32], sizes = [8, 32], strides = [1, 1]} : vector<8x128xf32> to vector<8x32xf32>
    %cst_233 = arith.constant 5.000000e-01 : f32
    %897 = vector.broadcast %cst_233 : f32 to vector<8x32xf32>
    %898 = arith.mulf %897, %896 : vector<8x32xf32>
    %899 = math.tanh %898 : vector<8x32xf32>
    %cst_234 = arith.constant 1.000000e+00 : f32
    %900 = vector.broadcast %cst_234 : f32 to vector<8x32xf32>
    %901 = arith.addf %899, %900 : vector<8x32xf32>
    %cst_235 = arith.constant 5.000000e-01 : f32
    %902 = vector.broadcast %cst_235 : f32 to vector<8x32xf32>
    %903 = arith.mulf %902, %901 : vector<8x32xf32>
    %904 = vector.extract_strided_slice %856 {offsets = [0, 64], sizes = [8, 32], strides = [1, 1]} : vector<8x128xf32> to vector<8x32xf32>
    %905 = math.tanh %904 : vector<8x32xf32>
    %906 = vector.extract_strided_slice %856 {offsets = [0, 96], sizes = [8, 32], strides = [1, 1]} : vector<8x128xf32> to vector<8x32xf32>
    %cst_236 = arith.constant 5.000000e-01 : f32
    %907 = vector.broadcast %cst_236 : f32 to vector<8x32xf32>
    %908 = arith.mulf %907, %906 : vector<8x32xf32>
    %909 = math.tanh %908 : vector<8x32xf32>
    %cst_237 = arith.constant 1.000000e+00 : f32
    %910 = vector.broadcast %cst_237 : f32 to vector<8x32xf32>
    %911 = arith.addf %909, %910 : vector<8x32xf32>
    %cst_238 = arith.constant 5.000000e-01 : f32
    %912 = vector.broadcast %cst_238 : f32 to vector<8x32xf32>
    %913 = arith.mulf %912, %911 : vector<8x32xf32>
    %914 = arith.mulf %903, %840 : vector<8x32xf32>
    %915 = arith.mulf %895, %905 : vector<8x32xf32>
    %916 = arith.addf %914, %915 : vector<8x32xf32>
    %917 = math.tanh %916 : vector<8x32xf32>
    %918 = arith.mulf %913, %917 : vector<8x32xf32>
    %919 = arith.sitofp %c7_i32 : i32 to f32
    %920 = vector.broadcast %919 : f32 to vector<8x1xf32>
    %921 = arith.cmpf ogt, %0, %920 : vector<8x1xf32>
    %922 = arith.extui %921 : vector<8x1xi1> to vector<8x1xi32>
    %923 = arith.sitofp %922 : vector<8x1xi32> to vector<8x1xf32>
    %924 = arith.sitofp %844 : i32 to f32
    %925 = vector.broadcast %924 : f32 to vector<8x1xf32>
    %926 = arith.cmpf ogt, %0, %925 : vector<8x1xf32>
    %927 = arith.extui %926 : vector<8x1xi1> to vector<8x1xi32>
    %928 = arith.sitofp %927 : vector<8x1xi32> to vector<8x1xf32>
    %929 = vector.broadcast %923 : vector<8x1xf32> to vector<8x32xf32>
    %930 = arith.mulf %929, %887 : vector<8x32xf32>
    %cst_239 = arith.constant 1.000000e+00 : f32
    %931 = vector.broadcast %cst_239 : f32 to vector<8x1xf32>
    %932 = arith.subf %931, %923 : vector<8x1xf32>
    %933 = vector.broadcast %932 : vector<8x1xf32> to vector<8x32xf32>
    %934 = arith.mulf %933, %816 : vector<8x32xf32>
    %935 = arith.addf %930, %934 : vector<8x32xf32>
    %936 = vector.broadcast %923 : vector<8x1xf32> to vector<8x32xf32>
    %937 = arith.mulf %936, %885 : vector<8x32xf32>
    %cst_240 = arith.constant 1.000000e+00 : f32
    %938 = vector.broadcast %cst_240 : f32 to vector<8x1xf32>
    %939 = arith.subf %938, %923 : vector<8x1xf32>
    %940 = vector.broadcast %939 : vector<8x1xf32> to vector<8x32xf32>
    %941 = arith.mulf %940, %823 : vector<8x32xf32>
    %942 = arith.addf %937, %941 : vector<8x32xf32>
    %943 = vector.broadcast %923 : vector<8x1xf32> to vector<8x32xf32>
    %944 = arith.mulf %943, %887 : vector<8x32xf32>
    %945 = arith.addf %826, %944 : vector<8x32xf32>
    %946 = vector.broadcast %928 : vector<8x1xf32> to vector<8x32xf32>
    %947 = arith.mulf %946, %918 : vector<8x32xf32>
    %cst_241 = arith.constant 1.000000e+00 : f32
    %948 = vector.broadcast %cst_241 : f32 to vector<8x1xf32>
    %949 = arith.subf %948, %928 : vector<8x1xf32>
    %950 = vector.broadcast %949 : vector<8x1xf32> to vector<8x32xf32>
    %951 = arith.mulf %950, %833 : vector<8x32xf32>
    %952 = arith.addf %947, %951 : vector<8x32xf32>
    %953 = vector.broadcast %928 : vector<8x1xf32> to vector<8x32xf32>
    %954 = arith.mulf %953, %916 : vector<8x32xf32>
    %cst_242 = arith.constant 1.000000e+00 : f32
    %955 = vector.broadcast %cst_242 : f32 to vector<8x1xf32>
    %956 = arith.subf %955, %928 : vector<8x1xf32>
    %957 = vector.broadcast %956 : vector<8x1xf32> to vector<8x32xf32>
    %958 = arith.mulf %957, %840 : vector<8x32xf32>
    %959 = arith.addf %954, %958 : vector<8x32xf32>
    %960 = vector.broadcast %928 : vector<8x1xf32> to vector<8x32xf32>
    %961 = arith.mulf %960, %918 : vector<8x32xf32>
    %962 = arith.addf %843, %961 : vector<8x32xf32>
    %c8_i32_243 = arith.constant 8 : i32
    %c9_i32_244 = arith.constant 9 : i32
    %963 = arith.subi %c9_i32_244, %c8_i32_243 : i32
    %c8_i32_245 = arith.constant 8 : i32
    %964 = arith.muli %c8_i32_243, %c8_i32_245 : i32
    %965 = tpu.assume_multiple %964, 8 : i32
    %c8_i32_246 = arith.constant 8 : i32
    %966 = arith.muli %963, %c8_i32_246 : i32
    %967 = tpu.assume_multiple %966, 8 : i32
    %968 = arith.index_cast %965 : i32 to index
    %c0_247 = arith.constant 0 : index
    %969 = vector.load %arg13[%968, %c0_247] : memref<80x256xf32, #tpu.memory_space<vmem>>, vector<8x128xf32>
    %970 = arith.index_cast %967 : i32 to index
    %c128_248 = arith.constant 128 : index
    %971 = vector.load %arg13[%970, %c128_248] : memref<80x256xf32, #tpu.memory_space<vmem>>, vector<8x128xf32>
    %cst_249 = arith.constant dense<0.000000e+00> : vector<8x128xf32>
    %972 = tpu.matmul %935, %8, %cst_249 {dimension_numbers = #tpu.dot_dimension_numbers<[1], [0], [0], [1], [0, 0, 1, 1], [], []>} : vector<8x32xf32>, vector<32x128xf32>, vector<8x128xf32> -> vector<8x128xf32>
    %973 = arith.addf %969, %972 : vector<8x128xf32>
    %cst_250 = arith.constant dense<0.000000e+00> : vector<8x128xf32>
    %974 = tpu.matmul %952, %9, %cst_250 {dimension_numbers = #tpu.dot_dimension_numbers<[1], [0], [0], [1], [0, 0, 1, 1], [], []>} : vector<8x32xf32>, vector<32x128xf32>, vector<8x128xf32> -> vector<8x128xf32>
    %975 = arith.addf %971, %974 : vector<8x128xf32>
    %976 = vector.extract_strided_slice %973 {offsets = [0, 0], sizes = [8, 32], strides = [1, 1]} : vector<8x128xf32> to vector<8x32xf32>
    %cst_251 = arith.constant 5.000000e-01 : f32
    %977 = vector.broadcast %cst_251 : f32 to vector<8x32xf32>
    %978 = arith.mulf %977, %976 : vector<8x32xf32>
    %979 = math.tanh %978 : vector<8x32xf32>
    %cst_252 = arith.constant 1.000000e+00 : f32
    %980 = vector.broadcast %cst_252 : f32 to vector<8x32xf32>
    %981 = arith.addf %979, %980 : vector<8x32xf32>
    %cst_253 = arith.constant 5.000000e-01 : f32
    %982 = vector.broadcast %cst_253 : f32 to vector<8x32xf32>
    %983 = arith.mulf %982, %981 : vector<8x32xf32>
    %984 = vector.extract_strided_slice %973 {offsets = [0, 32], sizes = [8, 32], strides = [1, 1]} : vector<8x128xf32> to vector<8x32xf32>
    %cst_254 = arith.constant 5.000000e-01 : f32
    %985 = vector.broadcast %cst_254 : f32 to vector<8x32xf32>
    %986 = arith.mulf %985, %984 : vector<8x32xf32>
    %987 = math.tanh %986 : vector<8x32xf32>
    %cst_255 = arith.constant 1.000000e+00 : f32
    %988 = vector.broadcast %cst_255 : f32 to vector<8x32xf32>
    %989 = arith.addf %987, %988 : vector<8x32xf32>
    %cst_256 = arith.constant 5.000000e-01 : f32
    %990 = vector.broadcast %cst_256 : f32 to vector<8x32xf32>
    %991 = arith.mulf %990, %989 : vector<8x32xf32>
    %992 = vector.extract_strided_slice %973 {offsets = [0, 64], sizes = [8, 32], strides = [1, 1]} : vector<8x128xf32> to vector<8x32xf32>
    %993 = math.tanh %992 : vector<8x32xf32>
    %994 = vector.extract_strided_slice %973 {offsets = [0, 96], sizes = [8, 32], strides = [1, 1]} : vector<8x128xf32> to vector<8x32xf32>
    %cst_257 = arith.constant 5.000000e-01 : f32
    %995 = vector.broadcast %cst_257 : f32 to vector<8x32xf32>
    %996 = arith.mulf %995, %994 : vector<8x32xf32>
    %997 = math.tanh %996 : vector<8x32xf32>
    %cst_258 = arith.constant 1.000000e+00 : f32
    %998 = vector.broadcast %cst_258 : f32 to vector<8x32xf32>
    %999 = arith.addf %997, %998 : vector<8x32xf32>
    %cst_259 = arith.constant 5.000000e-01 : f32
    %1000 = vector.broadcast %cst_259 : f32 to vector<8x32xf32>
    %1001 = arith.mulf %1000, %999 : vector<8x32xf32>
    %1002 = arith.mulf %991, %942 : vector<8x32xf32>
    %1003 = arith.mulf %983, %993 : vector<8x32xf32>
    %1004 = arith.addf %1002, %1003 : vector<8x32xf32>
    %1005 = math.tanh %1004 : vector<8x32xf32>
    %1006 = arith.mulf %1001, %1005 : vector<8x32xf32>
    %1007 = vector.extract_strided_slice %975 {offsets = [0, 0], sizes = [8, 32], strides = [1, 1]} : vector<8x128xf32> to vector<8x32xf32>
    %cst_260 = arith.constant 5.000000e-01 : f32
    %1008 = vector.broadcast %cst_260 : f32 to vector<8x32xf32>
    %1009 = arith.mulf %1008, %1007 : vector<8x32xf32>
    %1010 = math.tanh %1009 : vector<8x32xf32>
    %cst_261 = arith.constant 1.000000e+00 : f32
    %1011 = vector.broadcast %cst_261 : f32 to vector<8x32xf32>
    %1012 = arith.addf %1010, %1011 : vector<8x32xf32>
    %cst_262 = arith.constant 5.000000e-01 : f32
    %1013 = vector.broadcast %cst_262 : f32 to vector<8x32xf32>
    %1014 = arith.mulf %1013, %1012 : vector<8x32xf32>
    %1015 = vector.extract_strided_slice %975 {offsets = [0, 32], sizes = [8, 32], strides = [1, 1]} : vector<8x128xf32> to vector<8x32xf32>
    %cst_263 = arith.constant 5.000000e-01 : f32
    %1016 = vector.broadcast %cst_263 : f32 to vector<8x32xf32>
    %1017 = arith.mulf %1016, %1015 : vector<8x32xf32>
    %1018 = math.tanh %1017 : vector<8x32xf32>
    %cst_264 = arith.constant 1.000000e+00 : f32
    %1019 = vector.broadcast %cst_264 : f32 to vector<8x32xf32>
    %1020 = arith.addf %1018, %1019 : vector<8x32xf32>
    %cst_265 = arith.constant 5.000000e-01 : f32
    %1021 = vector.broadcast %cst_265 : f32 to vector<8x32xf32>
    %1022 = arith.mulf %1021, %1020 : vector<8x32xf32>
    %1023 = vector.extract_strided_slice %975 {offsets = [0, 64], sizes = [8, 32], strides = [1, 1]} : vector<8x128xf32> to vector<8x32xf32>
    %1024 = math.tanh %1023 : vector<8x32xf32>
    %1025 = vector.extract_strided_slice %975 {offsets = [0, 96], sizes = [8, 32], strides = [1, 1]} : vector<8x128xf32> to vector<8x32xf32>
    %cst_266 = arith.constant 5.000000e-01 : f32
    %1026 = vector.broadcast %cst_266 : f32 to vector<8x32xf32>
    %1027 = arith.mulf %1026, %1025 : vector<8x32xf32>
    %1028 = math.tanh %1027 : vector<8x32xf32>
    %cst_267 = arith.constant 1.000000e+00 : f32
    %1029 = vector.broadcast %cst_267 : f32 to vector<8x32xf32>
    %1030 = arith.addf %1028, %1029 : vector<8x32xf32>
    %cst_268 = arith.constant 5.000000e-01 : f32
    %1031 = vector.broadcast %cst_268 : f32 to vector<8x32xf32>
    %1032 = arith.mulf %1031, %1030 : vector<8x32xf32>
    %1033 = arith.mulf %1022, %959 : vector<8x32xf32>
    %1034 = arith.mulf %1014, %1024 : vector<8x32xf32>
    %1035 = arith.addf %1033, %1034 : vector<8x32xf32>
    %1036 = math.tanh %1035 : vector<8x32xf32>
    %1037 = arith.mulf %1032, %1036 : vector<8x32xf32>
    %1038 = arith.sitofp %c8_i32_243 : i32 to f32
    %1039 = vector.broadcast %1038 : f32 to vector<8x1xf32>
    %1040 = arith.cmpf ogt, %0, %1039 : vector<8x1xf32>
    %1041 = arith.extui %1040 : vector<8x1xi1> to vector<8x1xi32>
    %1042 = arith.sitofp %1041 : vector<8x1xi32> to vector<8x1xf32>
    %1043 = arith.sitofp %963 : i32 to f32
    %1044 = vector.broadcast %1043 : f32 to vector<8x1xf32>
    %1045 = arith.cmpf ogt, %0, %1044 : vector<8x1xf32>
    %1046 = arith.extui %1045 : vector<8x1xi1> to vector<8x1xi32>
    %1047 = arith.sitofp %1046 : vector<8x1xi32> to vector<8x1xf32>
    %1048 = vector.broadcast %1042 : vector<8x1xf32> to vector<8x32xf32>
    %1049 = arith.mulf %1048, %1006 : vector<8x32xf32>
    %cst_269 = arith.constant 1.000000e+00 : f32
    %1050 = vector.broadcast %cst_269 : f32 to vector<8x1xf32>
    %1051 = arith.subf %1050, %1042 : vector<8x1xf32>
    %1052 = vector.broadcast %1051 : vector<8x1xf32> to vector<8x32xf32>
    %1053 = arith.mulf %1052, %935 : vector<8x32xf32>
    %1054 = arith.addf %1049, %1053 : vector<8x32xf32>
    %1055 = vector.broadcast %1042 : vector<8x1xf32> to vector<8x32xf32>
    %1056 = arith.mulf %1055, %1004 : vector<8x32xf32>
    %cst_270 = arith.constant 1.000000e+00 : f32
    %1057 = vector.broadcast %cst_270 : f32 to vector<8x1xf32>
    %1058 = arith.subf %1057, %1042 : vector<8x1xf32>
    %1059 = vector.broadcast %1058 : vector<8x1xf32> to vector<8x32xf32>
    %1060 = arith.mulf %1059, %942 : vector<8x32xf32>
    %1061 = arith.addf %1056, %1060 : vector<8x32xf32>
    %1062 = vector.broadcast %1042 : vector<8x1xf32> to vector<8x32xf32>
    %1063 = arith.mulf %1062, %1006 : vector<8x32xf32>
    %1064 = arith.addf %945, %1063 : vector<8x32xf32>
    %1065 = vector.broadcast %1047 : vector<8x1xf32> to vector<8x32xf32>
    %1066 = arith.mulf %1065, %1037 : vector<8x32xf32>
    %cst_271 = arith.constant 1.000000e+00 : f32
    %1067 = vector.broadcast %cst_271 : f32 to vector<8x1xf32>
    %1068 = arith.subf %1067, %1047 : vector<8x1xf32>
    %1069 = vector.broadcast %1068 : vector<8x1xf32> to vector<8x32xf32>
    %1070 = arith.mulf %1069, %952 : vector<8x32xf32>
    %1071 = arith.addf %1066, %1070 : vector<8x32xf32>
    %1072 = vector.broadcast %1047 : vector<8x1xf32> to vector<8x32xf32>
    %1073 = arith.mulf %1072, %1035 : vector<8x32xf32>
    %cst_272 = arith.constant 1.000000e+00 : f32
    %1074 = vector.broadcast %cst_272 : f32 to vector<8x1xf32>
    %1075 = arith.subf %1074, %1047 : vector<8x1xf32>
    %1076 = vector.broadcast %1075 : vector<8x1xf32> to vector<8x32xf32>
    %1077 = arith.mulf %1076, %959 : vector<8x32xf32>
    %1078 = arith.addf %1073, %1077 : vector<8x32xf32>
    %1079 = vector.broadcast %1047 : vector<8x1xf32> to vector<8x32xf32>
    %1080 = arith.mulf %1079, %1037 : vector<8x32xf32>
    %1081 = arith.addf %962, %1080 : vector<8x32xf32>
    %c9_i32_273 = arith.constant 9 : i32
    %c9_i32_274 = arith.constant 9 : i32
    %1082 = arith.subi %c9_i32_274, %c9_i32_273 : i32
    %c8_i32_275 = arith.constant 8 : i32
    %1083 = arith.muli %c9_i32_273, %c8_i32_275 : i32
    %1084 = tpu.assume_multiple %1083, 8 : i32
    %c8_i32_276 = arith.constant 8 : i32
    %1085 = arith.muli %1082, %c8_i32_276 : i32
    %1086 = tpu.assume_multiple %1085, 8 : i32
    %1087 = arith.index_cast %1084 : i32 to index
    %c0_277 = arith.constant 0 : index
    %1088 = vector.load %arg13[%1087, %c0_277] : memref<80x256xf32, #tpu.memory_space<vmem>>, vector<8x128xf32>
    %1089 = arith.index_cast %1086 : i32 to index
    %c128_278 = arith.constant 128 : index
    %1090 = vector.load %arg13[%1089, %c128_278] : memref<80x256xf32, #tpu.memory_space<vmem>>, vector<8x128xf32>
    %cst_279 = arith.constant dense<0.000000e+00> : vector<8x128xf32>
    %1091 = tpu.matmul %1054, %8, %cst_279 {dimension_numbers = #tpu.dot_dimension_numbers<[1], [0], [0], [1], [0, 0, 1, 1], [], []>} : vector<8x32xf32>, vector<32x128xf32>, vector<8x128xf32> -> vector<8x128xf32>
    %1092 = arith.addf %1088, %1091 : vector<8x128xf32>
    %cst_280 = arith.constant dense<0.000000e+00> : vector<8x128xf32>
    %1093 = tpu.matmul %1071, %9, %cst_280 {dimension_numbers = #tpu.dot_dimension_numbers<[1], [0], [0], [1], [0, 0, 1, 1], [], []>} : vector<8x32xf32>, vector<32x128xf32>, vector<8x128xf32> -> vector<8x128xf32>
    %1094 = arith.addf %1090, %1093 : vector<8x128xf32>
    %1095 = vector.extract_strided_slice %1092 {offsets = [0, 0], sizes = [8, 32], strides = [1, 1]} : vector<8x128xf32> to vector<8x32xf32>
    %cst_281 = arith.constant 5.000000e-01 : f32
    %1096 = vector.broadcast %cst_281 : f32 to vector<8x32xf32>
    %1097 = arith.mulf %1096, %1095 : vector<8x32xf32>
    %1098 = math.tanh %1097 : vector<8x32xf32>
    %cst_282 = arith.constant 1.000000e+00 : f32
    %1099 = vector.broadcast %cst_282 : f32 to vector<8x32xf32>
    %1100 = arith.addf %1098, %1099 : vector<8x32xf32>
    %cst_283 = arith.constant 5.000000e-01 : f32
    %1101 = vector.broadcast %cst_283 : f32 to vector<8x32xf32>
    %1102 = arith.mulf %1101, %1100 : vector<8x32xf32>
    %1103 = vector.extract_strided_slice %1092 {offsets = [0, 32], sizes = [8, 32], strides = [1, 1]} : vector<8x128xf32> to vector<8x32xf32>
    %cst_284 = arith.constant 5.000000e-01 : f32
    %1104 = vector.broadcast %cst_284 : f32 to vector<8x32xf32>
    %1105 = arith.mulf %1104, %1103 : vector<8x32xf32>
    %1106 = math.tanh %1105 : vector<8x32xf32>
    %cst_285 = arith.constant 1.000000e+00 : f32
    %1107 = vector.broadcast %cst_285 : f32 to vector<8x32xf32>
    %1108 = arith.addf %1106, %1107 : vector<8x32xf32>
    %cst_286 = arith.constant 5.000000e-01 : f32
    %1109 = vector.broadcast %cst_286 : f32 to vector<8x32xf32>
    %1110 = arith.mulf %1109, %1108 : vector<8x32xf32>
    %1111 = vector.extract_strided_slice %1092 {offsets = [0, 64], sizes = [8, 32], strides = [1, 1]} : vector<8x128xf32> to vector<8x32xf32>
    %1112 = math.tanh %1111 : vector<8x32xf32>
    %1113 = vector.extract_strided_slice %1092 {offsets = [0, 96], sizes = [8, 32], strides = [1, 1]} : vector<8x128xf32> to vector<8x32xf32>
    %cst_287 = arith.constant 5.000000e-01 : f32
    %1114 = vector.broadcast %cst_287 : f32 to vector<8x32xf32>
    %1115 = arith.mulf %1114, %1113 : vector<8x32xf32>
    %1116 = math.tanh %1115 : vector<8x32xf32>
    %cst_288 = arith.constant 1.000000e+00 : f32
    %1117 = vector.broadcast %cst_288 : f32 to vector<8x32xf32>
    %1118 = arith.addf %1116, %1117 : vector<8x32xf32>
    %cst_289 = arith.constant 5.000000e-01 : f32
    %1119 = vector.broadcast %cst_289 : f32 to vector<8x32xf32>
    %1120 = arith.mulf %1119, %1118 : vector<8x32xf32>
    %1121 = arith.mulf %1110, %1061 : vector<8x32xf32>
    %1122 = arith.mulf %1102, %1112 : vector<8x32xf32>
    %1123 = arith.addf %1121, %1122 : vector<8x32xf32>
    %1124 = math.tanh %1123 : vector<8x32xf32>
    %1125 = arith.mulf %1120, %1124 : vector<8x32xf32>
    %1126 = vector.extract_strided_slice %1094 {offsets = [0, 0], sizes = [8, 32], strides = [1, 1]} : vector<8x128xf32> to vector<8x32xf32>
    %cst_290 = arith.constant 5.000000e-01 : f32
    %1127 = vector.broadcast %cst_290 : f32 to vector<8x32xf32>
    %1128 = arith.mulf %1127, %1126 : vector<8x32xf32>
    %1129 = math.tanh %1128 : vector<8x32xf32>
    %cst_291 = arith.constant 1.000000e+00 : f32
    %1130 = vector.broadcast %cst_291 : f32 to vector<8x32xf32>
    %1131 = arith.addf %1129, %1130 : vector<8x32xf32>
    %cst_292 = arith.constant 5.000000e-01 : f32
    %1132 = vector.broadcast %cst_292 : f32 to vector<8x32xf32>
    %1133 = arith.mulf %1132, %1131 : vector<8x32xf32>
    %1134 = vector.extract_strided_slice %1094 {offsets = [0, 32], sizes = [8, 32], strides = [1, 1]} : vector<8x128xf32> to vector<8x32xf32>
    %cst_293 = arith.constant 5.000000e-01 : f32
    %1135 = vector.broadcast %cst_293 : f32 to vector<8x32xf32>
    %1136 = arith.mulf %1135, %1134 : vector<8x32xf32>
    %1137 = math.tanh %1136 : vector<8x32xf32>
    %cst_294 = arith.constant 1.000000e+00 : f32
    %1138 = vector.broadcast %cst_294 : f32 to vector<8x32xf32>
    %1139 = arith.addf %1137, %1138 : vector<8x32xf32>
    %cst_295 = arith.constant 5.000000e-01 : f32
    %1140 = vector.broadcast %cst_295 : f32 to vector<8x32xf32>
    %1141 = arith.mulf %1140, %1139 : vector<8x32xf32>
    %1142 = vector.extract_strided_slice %1094 {offsets = [0, 64], sizes = [8, 32], strides = [1, 1]} : vector<8x128xf32> to vector<8x32xf32>
    %1143 = math.tanh %1142 : vector<8x32xf32>
    %1144 = vector.extract_strided_slice %1094 {offsets = [0, 96], sizes = [8, 32], strides = [1, 1]} : vector<8x128xf32> to vector<8x32xf32>
    %cst_296 = arith.constant 5.000000e-01 : f32
    %1145 = vector.broadcast %cst_296 : f32 to vector<8x32xf32>
    %1146 = arith.mulf %1145, %1144 : vector<8x32xf32>
    %1147 = math.tanh %1146 : vector<8x32xf32>
    %cst_297 = arith.constant 1.000000e+00 : f32
    %1148 = vector.broadcast %cst_297 : f32 to vector<8x32xf32>
    %1149 = arith.addf %1147, %1148 : vector<8x32xf32>
    %cst_298 = arith.constant 5.000000e-01 : f32
    %1150 = vector.broadcast %cst_298 : f32 to vector<8x32xf32>
    %1151 = arith.mulf %1150, %1149 : vector<8x32xf32>
    %1152 = arith.mulf %1141, %1078 : vector<8x32xf32>
    %1153 = arith.mulf %1133, %1143 : vector<8x32xf32>
    %1154 = arith.addf %1152, %1153 : vector<8x32xf32>
    %1155 = math.tanh %1154 : vector<8x32xf32>
    %1156 = arith.mulf %1151, %1155 : vector<8x32xf32>
    %1157 = arith.sitofp %c9_i32_273 : i32 to f32
    %1158 = vector.broadcast %1157 : f32 to vector<8x1xf32>
    %1159 = arith.cmpf ogt, %0, %1158 : vector<8x1xf32>
    %1160 = arith.extui %1159 : vector<8x1xi1> to vector<8x1xi32>
    %1161 = arith.sitofp %1160 : vector<8x1xi32> to vector<8x1xf32>
    %1162 = arith.sitofp %1082 : i32 to f32
    %1163 = vector.broadcast %1162 : f32 to vector<8x1xf32>
    %1164 = arith.cmpf ogt, %0, %1163 : vector<8x1xf32>
    %1165 = arith.extui %1164 : vector<8x1xi1> to vector<8x1xi32>
    %1166 = arith.sitofp %1165 : vector<8x1xi32> to vector<8x1xf32>
    %1167 = vector.broadcast %1161 : vector<8x1xf32> to vector<8x32xf32>
    %1168 = arith.mulf %1167, %1125 : vector<8x32xf32>
    %cst_299 = arith.constant 1.000000e+00 : f32
    %1169 = vector.broadcast %cst_299 : f32 to vector<8x1xf32>
    %1170 = arith.subf %1169, %1161 : vector<8x1xf32>
    %1171 = vector.broadcast %1170 : vector<8x1xf32> to vector<8x32xf32>
    %1172 = arith.mulf %1171, %1054 : vector<8x32xf32>
    %1173 = arith.addf %1168, %1172 : vector<8x32xf32>
    %1174 = vector.broadcast %1161 : vector<8x1xf32> to vector<8x32xf32>
    %1175 = arith.mulf %1174, %1123 : vector<8x32xf32>
    %cst_300 = arith.constant 1.000000e+00 : f32
    %1176 = vector.broadcast %cst_300 : f32 to vector<8x1xf32>
    %1177 = arith.subf %1176, %1161 : vector<8x1xf32>
    %1178 = vector.broadcast %1177 : vector<8x1xf32> to vector<8x32xf32>
    %1179 = arith.mulf %1178, %1061 : vector<8x32xf32>
    %1180 = arith.addf %1175, %1179 : vector<8x32xf32>
    %1181 = vector.broadcast %1161 : vector<8x1xf32> to vector<8x32xf32>
    %1182 = arith.mulf %1181, %1125 : vector<8x32xf32>
    %1183 = arith.addf %1064, %1182 : vector<8x32xf32>
    %1184 = vector.broadcast %1166 : vector<8x1xf32> to vector<8x32xf32>
    %1185 = arith.mulf %1184, %1156 : vector<8x32xf32>
    %cst_301 = arith.constant 1.000000e+00 : f32
    %1186 = vector.broadcast %cst_301 : f32 to vector<8x1xf32>
    %1187 = arith.subf %1186, %1166 : vector<8x1xf32>
    %1188 = vector.broadcast %1187 : vector<8x1xf32> to vector<8x32xf32>
    %1189 = arith.mulf %1188, %1071 : vector<8x32xf32>
    %1190 = arith.addf %1185, %1189 : vector<8x32xf32>
    %1191 = vector.broadcast %1166 : vector<8x1xf32> to vector<8x32xf32>
    %1192 = arith.mulf %1191, %1154 : vector<8x32xf32>
    %cst_302 = arith.constant 1.000000e+00 : f32
    %1193 = vector.broadcast %cst_302 : f32 to vector<8x1xf32>
    %1194 = arith.subf %1193, %1166 : vector<8x1xf32>
    %1195 = vector.broadcast %1194 : vector<8x1xf32> to vector<8x32xf32>
    %1196 = arith.mulf %1195, %1078 : vector<8x32xf32>
    %1197 = arith.addf %1192, %1196 : vector<8x32xf32>
    %1198 = vector.broadcast %1166 : vector<8x1xf32> to vector<8x32xf32>
    %1199 = arith.mulf %1198, %1156 : vector<8x32xf32>
    %1200 = arith.addf %1081, %1199 : vector<8x32xf32>
    %c10_i32 = arith.constant 10 : i32
    %cst_303 = arith.constant 1.000000e+00 : f32
    %1201 = vector.broadcast %cst_303 : f32 to vector<8x1xf32>
    %1202 = arith.maximumf %0, %1201 : vector<8x1xf32>
    %cst_304 = arith.constant 1.000000e+00 : f32
    %1203 = vector.broadcast %cst_304 : f32 to vector<8x1xf32>
    %1204 = arith.divf %1203, %1202 : vector<8x1xf32>
    %1205 = vector.broadcast %1204 : vector<8x1xf32> to vector<8x32xf32>
    %1206 = arith.mulf %1183, %1205 : vector<8x32xf32>
    %1207 = vector.broadcast %1204 : vector<8x1xf32> to vector<8x32xf32>
    %1208 = arith.mulf %1200, %1207 : vector<8x32xf32>
    %1209 = tpu.concatenate %1206, %1208 in 1 : vector<8x32xf32>, vector<8x32xf32> -> vector<8x64xf32>
    %1210 = vector.extract_strided_slice %1209 {offsets = [0, 0], sizes = [2, 64], strides = [1, 1]} : vector<8x64xf32> to vector<2x64xf32>
    %1211 = vector.extract_strided_slice %1209 {offsets = [2, 0], sizes = [2, 64], strides = [1, 1]} : vector<8x64xf32> to vector<2x64xf32>
    %1212 = arith.subf %1210, %1211 : vector<2x64xf32>
    %1213 = math.absf %1212 : vector<2x64xf32>
    %1214 = arith.mulf %1210, %1211 : vector<2x64xf32>
    %1215 = tpu.concatenate %1210, %1211, %1213, %1214 in 1 : vector<2x64xf32>, vector<2x64xf32>, vector<2x64xf32>, vector<2x64xf32> -> vector<2x256xf32>
    %c0_305 = arith.constant 0 : index
    %c0_306 = arith.constant 0 : index
    %1216 = vector.load %arg6[%c0_305, %c0_306] : memref<256x32xf32, #tpu.memory_space<vmem>>, vector<256x32xf32>
    %cst_307 = arith.constant dense<0.000000e+00> : vector<2x32xf32>
    %1217 = tpu.matmul %1215, %1216, %cst_307 {dimension_numbers = #tpu.dot_dimension_numbers<[1], [0], [0], [1], [0, 0, 1, 1], [], []>} : vector<2x256xf32>, vector<256x32xf32>, vector<2x32xf32> -> vector<2x32xf32>
    %c0_308 = arith.constant 0 : index
    %c0_309 = arith.constant 0 : index
    %1218 = vector.load %arg7[%c0_308, %c0_309] : memref<1x32xf32, #tpu.memory_space<vmem>>, vector<1x32xf32>
    %1219 = vector.broadcast %1218 : vector<1x32xf32> to vector<2x32xf32>
    %1220 = arith.addf %1217, %1219 : vector<2x32xf32>
    %cst_310 = arith.constant 0.000000e+00 : f32
    %1221 = vector.broadcast %cst_310 : f32 to vector<2x32xf32>
    %1222 = arith.maximumf %1220, %1221 : vector<2x32xf32>
    %c0_311 = arith.constant 0 : index
    %c0_312 = arith.constant 0 : index
    %1223 = vector.load %arg8[%c0_311, %c0_312] : memref<32x32xf32, #tpu.memory_space<vmem>>, vector<32x32xf32>
    %cst_313 = arith.constant dense<0.000000e+00> : vector<2x32xf32>
    %1224 = tpu.matmul %1222, %1223, %cst_313 {dimension_numbers = #tpu.dot_dimension_numbers<[1], [0], [0], [1], [0, 0, 1, 1], [], []>} : vector<2x32xf32>, vector<32x32xf32>, vector<2x32xf32> -> vector<2x32xf32>
    %c0_314 = arith.constant 0 : index
    %c0_315 = arith.constant 0 : index
    %1225 = vector.load %arg9[%c0_314, %c0_315] : memref<1x32xf32, #tpu.memory_space<vmem>>, vector<1x32xf32>
    %1226 = vector.broadcast %1225 : vector<1x32xf32> to vector<2x32xf32>
    %1227 = arith.addf %1224, %1226 : vector<2x32xf32>
    %cst_316 = arith.constant 0.000000e+00 : f32
    %1228 = vector.broadcast %cst_316 : f32 to vector<2x32xf32>
    %1229 = arith.maximumf %1227, %1228 : vector<2x32xf32>
    %c0_317 = arith.constant 0 : index
    %c0_318 = arith.constant 0 : index
    %1230 = vector.load %arg10[%c0_317, %c0_318] : memref<32x3xf32, #tpu.memory_space<vmem>>, vector<32x3xf32>
    %cst_319 = arith.constant dense<0.000000e+00> : vector<2x3xf32>
    %1231 = tpu.matmul %1229, %1230, %cst_319 {dimension_numbers = #tpu.dot_dimension_numbers<[1], [0], [0], [1], [0, 0, 1, 1], [], []>} : vector<2x32xf32>, vector<32x3xf32>, vector<2x3xf32> -> vector<2x3xf32>
    %c0_320 = arith.constant 0 : index
    %c0_321 = arith.constant 0 : index
    %1232 = vector.load %arg11[%c0_320, %c0_321] : memref<1x3xf32, #tpu.memory_space<vmem>>, vector<1x3xf32>
    %1233 = vector.broadcast %1232 : vector<1x3xf32> to vector<2x3xf32>
    %1234 = arith.addf %1231, %1233 : vector<2x3xf32>
    %c0_322 = arith.constant 0 : index
    %c0_323 = arith.constant 0 : index
    %1235 = vector.load %arg12[%c0_322, %c0_323] : memref<2x3xf32, #tpu.memory_space<vmem>>, vector<2x3xf32>
    tpu.vector_store %arg12[%c0_322, %c0_323], %1234 {strides = array<i32>} : memref<2x3xf32, #tpu.memory_space<vmem>>, vector<2x3xf32>,
    return
  }
}

</mosaic_0001>

<bundles_post_ra>
// kernel: twostream_bilstm_forward.1
= control target key start
LH: loop header
LB: loop body
LE: loop exit
PB: predicated region body
PF: predicated region fallthrough
CT: control target
= control target key end

     0   :  { %v3483_v3 = vmov 0.0   ;;  %vm73_vm0 = vcmask 261120   ;;  %s4601_s0 = inlined_call_operand.vmem [shape: f32[80,32], index: 0, kind: input, shape index: {}]   ;;  %s4602_s1 = inlined_call_operand.vmem [shape: f32[8,1], index: 1, kind: input, shape index: {}]   ;;  %s4603_s2 = inlined_call_operand.vmem [shape: f32[32,256], index: 2, kind: input, shape index: {}]   ;;  %s4604_s3 = inlined_call_operand.vmem [shape: f32[1,256], index: 3, kind: input, shape index: {}]   ;;  %s4605_s4 = inlined_call_operand.vmem [shape: f32[32,128], index: 4, kind: input, shape index: {}]   ;;  %s4606_s5 = inlined_call_operand.vmem [shape: f32[32,128], index: 5, kind: input, shape index: {}]   ;;  %s4607_s6 = inlined_call_operand.vmem [shape: f32[256,32], index: 6, kind: input, shape index: {}]   ;;  %s4608_s7 = inlined_call_operand.vmem [shape: f32[1,32], index: 7, kind: input, shape index: {}]   ;;  %s4609_s8 = inlined_call_operand.vmem [shape: f32[32,32], index: 8, kind: input, shape index: {}]   ;;  %s4610_s9 = inlined_call_operand.vmem [shape: f32[1,32], index: 9, kind: input, shape index: {}]   ;;  %s4611_s10 = inlined_call_operand.vmem [shape: f32[32,3], index: 10, kind: input, shape index: {}]   ;;  %s4612_s11 = inlined_call_operand.vmem [shape: f32[1,3], index: 11, kind: input, shape index: {}]   ;;  %s4613_s12 = inlined_call_operand.hbm [shape: f32[2,3], index: 12, kind: output, shape index: {}]  }
   0x1   :  { %v60_v0 = vld [vmem:[%s4603_s2 + $0x38] sm:$0xff]  ;;  %v59_v1 = vld [vmem:[%s4603_s2 + $0x30] sm:$0xff]  ;;  %v58_v2 = vld [vmem:[%s4603_s2 + $0x28] sm:$0xff]  ;;  %3055 = vmatprep.subr.mxu1 %v3483_v3  ;;  %168 = vmatprep.mubr.f32.mxu0 %v3483_v3 }
   0x2   :  { %128 = vmatprep.subr.mxu0 %v60_v0  ;;  %v57_v4 = vld [vmem:[%s4603_s2 + $0x20] sm:$0xff]  ;;  %v3570_v5 = vld [vmem:[%s4605_s4 + $0x18] sm:$0xff]  ;;  %v3579_v7 = vld [vmem:[%s4605_s4 + $0x10] sm:$0xff] }
   0x3   :  { %129 = vmatpush1.msra.mxu0 %v59_v1  ;;  %3056 = vmatpush3.msra.mxu1 %v3570_v5  ;;  %v56_v6 = vld [vmem:[%s4603_s2 + $0x18] sm:$0xff]  ;;  %v55_v8 = vld [vmem:[%s4603_s2 + $0x10] sm:$0xff]  ;;  %v54_v9 = vld [vmem:[%s4603_s2 + $0x8] sm:$0xff] }
   0x4   :  { %130 = vmatprep.subr.mxu0 %v58_v2  ;;  %3057 = vmatprep.subr.mxu1 %v3483_v3  ;;  %v3592_v10 = vld [vmem:[%s4605_s4 + $0x8] sm:$0xff]  ;;  %v53_v11 = vld [vmem:[%s4603_s2] sm:$0xff]  ;;  %v3614_v14 = vld [vmem:[%s4606_s5 + $0x18] sm:$0xff] }
   0x5   :  { %131 = vmatpush1.msra.mxu0 %v57_v4  ;;  %3058 = vmatpush3.msra.mxu1 %v3579_v7  ;;  %v43_v12 = vld [vmem:[%s4601_s0] sm:$0xff] }
   0x6   :  { %132 = vmatprep.subr.mxu0 %v56_v6  ;;  %3059 = vmatprep.subr.mxu1 %v3483_v3  ;;  %v3605_v13 = vld [vmem:[%s4605_s4] sm:$0xff] }
   0x7   :  { %133 = vmatpush1.msra.mxu0 %v55_v8  ;;  %3060 = vmatpush3.msra.mxu1 %v3592_v10 }
   0x8   :  { %134 = vmatprep.subr.mxu0 %v54_v9  ;;  %3061 = vmatprep.subr.mxu1 %v3483_v3 }
   0x9   :  { %135 = vmatpush1.msra.mxu0 %v53_v11  ;;  %3062 = vmatpush3.msra.mxu1 %v3605_v13 }
   0xa   :  { %2867 = vmatmul.mubr.msk.f32.vlgmr.msra.gmra.mxu0 %vm73_vm0, %v43_v12 }
   0xb   :  { %17 = vsyncpa [#allocation4], 0  ;;  %vm3484_vm1 = vmmov 0   ;;  %174 = vmatprep.mubr.f32.mxu0 %v3483_v3  ;;  %v44_v15 = vld [vmem:[%s4601_s0 + $0x8] sm:$0xff]  ;;  %3066 = vmatprep.subr.mxu1 %v3483_v3  ;;  %v3627_v16 = vld [vmem:[%s4606_s5 + $0x10] sm:$0xff]  ;;  %v3485_v27 = vmov 0   ;;  %v63_v28 = vlaneseq }
   0xc   :  { %3063 = vmatprep.mubr.msk.f32.mxu1 %vm3484_vm1, %v3483_v3  ;;  %v3637_v17 = vld [vmem:[%s4606_s5 + $0x8] sm:$0xff]  ;;  %v45_v18 = vld [vmem:[%s4601_s0 + $0x10] sm:$0xff]  ;;  %v3648_v19 = vld [vmem:[%s4606_s5] sm:$0xff]  ;;  %3110 = vmatprep.subr.mxu0 %v3483_v3  ;;  %s3487_s20 = smov 32   ;;  %vm2560_vm12 = vcmask 523264   ;;  %s3488_s2 = smov [#allocation3]  }
   0xd   :  { %3064 = vmatmul.mubr.f32.vlgmr.msra.gmra.mxu1 %v3483_v3  ;;  %3111 = vmatpush3.msra.mxu0 %v3614_v14  ;;  %v46_v20 = vld [vmem:[%s4601_s0 + $0x18] sm:$0xff]  ;;  %v47_v21 = vld [vmem:[%s4601_s0 + $0x20] sm:$0xff]  ;;  %v48_v22 = vld [vmem:[%s4601_s0 + $0x28] sm:$0xff]  ;;  %v64_v29 = vshrl.u32 %v63_v28, 7  ;;  %s2850_s29 = sshll.u32 %s3488_s2, 4  ;;  %vm2842_vm13 = vcmask 17408   ;;  %s2851_s29 = int_to_ptr.vmem [resolvable:$true] %s2850_s29 }
   0xe   :  { %3067 = vmatpush3.msra.mxu1 %v3614_v14  ;;  %3074 = vmatprep.mubr.msk.f32.mxu1 %vm3484_vm1, %v3483_v3  ;;  %v49_v23 = vld [vmem:[%s4601_s0 + $0x30] sm:$0xff]  ;;  %v50_v24 = vld [vmem:[%s4601_s0 + $0x38] sm:$0xff]  ;;  %v51_v25 = vld [vmem:[%s4601_s0 + $0x40] sm:$0xff]  ;;  %p3466_p1 = scmp.lt.s32.totalorder %s2851_s29, %s2851_s29 }
   0xf   :  { %2868 = vmatmul.mubr.msk.f32.gmra.mxu0 %vm73_vm0, %v44_v15  ;;  %3068 = vmatprep.subr.mxu1 %v3483_v3  ;;  %v52_v26 = vld [vmem:[%s4601_s0 + $0x48] sm:$0xff]  ;;  %v65_v30 = vsub.s32 0, %v64_v29  ;;  %v61_v31 = vld [vmem:[%s4604_s3] sm:$0x3]  ;;  %v69_v32 = vsub.s32 1, %v64_v29  ;;  %s3486_s0 = smov 64  }
  0x10   :  { %180 = vmatprep.mubr.f32.mxu0 %v3483_v3  ;;  %3069 = vmatpush3.msra.mxu1 %v3627_v16 }
  0x11   :  { %3070 = vmatprep.subr.mxu1 %v3483_v3  ;;  %3112 = vmatprep.subr.mxu0 %v3483_v3  ;;  %v66_v33 = vrot.slane %v61_v31, %v65_v30  ;;  %v70_v34 = vrot.slane %v61_v31, %v69_v32 }
  0x12   :  { %3071 = vmatpush3.msra.mxu1 %v3637_v17  ;;  %3113 = vmatpush3.msra.mxu0 %v3627_v16 }
  0x13   :  { %2869 = vmatmul.mubr.msk.f32.gmra.mxu0 %vm73_vm0, %v45_v18  ;;  %3072 = vmatprep.subr.mxu1 %v3483_v3 }
  0x14   :  { %186 = vmatprep.mubr.f32.mxu0 %v3483_v3  ;;  %3073 = vmatpush3.msra.mxu1 %v3648_v19 }
  0x15   :  { %3075 = vmatmul.mubr.f32.vlgmr.msra.gmra.mxu1 %v3483_v3  ;;  %3077 = vmatprep.subr.mxu1 %v3483_v3 }
  0x16   :  { %3078 = vmatpush3.msra.mxu1 %v3570_v5  ;;  %3085 = vmatprep.mubr.msk.f32.mxu1 %vm3484_vm1, %v3483_v3 }
  0x17   :  { %2870 = vmatmul.mubr.msk.f32.gmra.mxu0 %vm73_vm0, %v46_v20  ;;  %3079 = vmatprep.subr.mxu1 %v3483_v3 }
  0x18   :  { %192 = vmatprep.mubr.f32.mxu0 %v3483_v3  ;;  %3080 = vmatpush3.msra.mxu1 %v3579_v7 }
  0x19   :  { %3081 = vmatprep.subr.mxu1 %v3483_v3  ;;  %3114 = vmatprep.subr.mxu0 %v3483_v3 }
  0x1a   :  { %3082 = vmatpush3.msra.mxu1 %v3592_v10  ;;  %3115 = vmatpush3.msra.mxu0 %v3637_v17 }
  0x1b   :  { %2871 = vmatmul.mubr.msk.f32.gmra.mxu0 %vm73_vm0, %v47_v21  ;;  %3083 = vmatprep.subr.mxu1 %v3483_v3 }
  0x1c   :  { %198 = vmatprep.mubr.f32.mxu0 %v3483_v3  ;;  %3084 = vmatpush3.msra.mxu1 %v3605_v13 }
  0x1d   :  { %3088 = vmatprep.subr.mxu1 %v3483_v3  ;;  %3116 = vmatprep.subr.mxu0 %v3483_v3 }
  0x1e   :  { %3117 = vmatpush3.msra.mxu0 %v3648_v19  ;;  %3303 = vset.pattern.permute.xlu0 %v3485_v27 }
  0x1f   :  { %2872 = vmatmul.mubr.msk.f32.gmra.mxu0 %vm73_vm0, %v48_v22  ;;  %3132 = vmatprep.subr.mxu0 %v3483_v3 }
  0x20   :  { %204 = vmatprep.mubr.f32.mxu0 %v3483_v3  ;;  %3304 = vset.pattern.permute.xlu1 %v3485_v27  ;;  %v3755_v27 = vld [vmem:[%s4602_s1] sm:$0xff] }
  0x21   :  { %vm454_vm2 = vcmp.gt.f32.partialorder %v3755_v27, 0.0  ;;  %vm457_vm3 = vcmp.gt.f32.partialorder %v3755_v27, 9.0  ;;  %vm698_vm4 = vcmp.gt.f32.partialorder %v3755_v27, 1.0  ;;  %vm701_vm5 = vcmp.gt.f32.partialorder %v3755_v27, 8.0 }
  0x22   :  { %v2877_v29 = vsel %vm454_vm2, 1.0, %v3483_v3  ;;  %v2878_v30 = vsel %vm457_vm3, 1.0, %v3483_v3  ;;  %vm944_vm6 = vcmp.gt.f32.partialorder %v3755_v27, 2.0  ;;  %vm947_vm7 = vcmp.gt.f32.partialorder %v3755_v27, 7.0 }
  0x23   :  { %2873 = vmatmul.mubr.msk.f32.gmra.mxu0 %vm73_vm0, %v49_v23  ;;  %vm1190_vm8 = vcmp.gt.f32.partialorder %v3755_v27, 3.0  ;;  %vm1193_vm9 = vcmp.gt.f32.partialorder %v3755_v27, 6.0  ;;  %vm1436_vm10 = vcmp.gt.f32.partialorder %v3755_v27, 4.0  ;;  %vm1439_vm11 = vcmp.gt.f32.partialorder %v3755_v27, 5.0 }
  0x24   :  { %210 = vmatprep.mubr.f32.mxu0 %v3483_v3 }
  0x27   :  { %2874 = vmatmul.mubr.msk.f32.gmra.mxu0 %vm73_vm0, %v50_v24 }
  0x28   :  { %216 = vmatprep.mubr.f32.mxu0 %v3483_v3 }
  0x2b   :  { %2875 = vmatmul.mubr.msk.f32.gmra.mxu0 %vm73_vm0, %v51_v25 }
  0x2c   :  { %222 = vmatprep.mubr.f32.mxu0 %v3483_v3 }
  0x2f   :  { %2876 = vmatmul.mubr.msk.f32.gmra.mxu0 %vm73_vm0, %v52_v26 }
  0x30   :  { %3118 = vmatprep.mubr.msk.f32.mxu0 %vm3484_vm1, %v3483_v3 }
  0xca   :  { %v170_v35 = vpop.f32.mrf.mxu0 }
  0xcb   :  { %v171_v36 = vadd.f32 %v170_v35, %v66_v33 }
  0xcc   :  { %v172_v37 = vpop.f32.mrf.mxu0 }
  0xcd   :  { %v334_v38 = vpop.f32.mrf.mxu1  ;;  %v3715_v39 = vadd.f32 %v172_v37, %v70_v34 }
  0xce   :  { %v338_v40 = vadd.f32 %v334_v38, %v171_v36 }
  0xcf   :  { %v176_v41 = vpop.f32.mrf.mxu0  ;;  %v3065_v42 = vpop.f32.mrf.mxu1 }
  0xd0   :  { %3330 = vtanh.f32 %v338_v40  ;;  %v3717_v43 = vadd.f32 %v176_v41, %v66_v33  ;;  %v410_v31 = vmul.f32 0.5, %v338_v40 }
  0xd1   :  { %v178_v44 = vpop.f32.mrf.mxu0 }
  0xd2   :  { %v3719_v45 = vadd.f32 %v178_v44, %v70_v34 }
  0xd3   :  { %v182_v46 = vpop.f32.mrf.mxu0 }
  0xd4   :  { %v3721_v47 = vadd.f32 %v182_v46, %v66_v33 }
  0xd5   :  { %v184_v48 = vpop.f32.mrf.mxu0  ;;  %v405_v49 = vpop.f32.mrf.mxu1 }
  0xd6   :  { %v3723_v50 = vadd.f32 %v184_v48, %v70_v34  ;;  %v466_v48 = vsub.f32 1.0, %v2877_v29 }
  0xd7   :  { %v188_v51 = vpop.f32.mrf.mxu0  ;;  %v3076_v52 = vpop.f32.mrf.mxu1 }
  0xd8   :  { %v3725_v53 = vadd.f32 %v188_v51, %v66_v33 }
  0xd9   :  { %v190_v54 = vpop.f32.mrf.mxu0 }
  0xda   :  { %v3727_v55 = vadd.f32 %v190_v54, %v70_v34  ;;  %v483_v54 = vsub.f32 1.0, %v2878_v30 }
  0xdb   :  { %v194_v56 = vpop.f32.mrf.mxu0 }
  0xdc   :  { %v3729_v57 = vadd.f32 %v194_v56, %v66_v33 }
  0xdd   :  { %v3331_v58 = vpop.eup %3330  ;;  %v196_v59 = vpop.f32.mrf.mxu0 }
  0xde   :  { %v3731_v60 = vadd.f32 %v196_v59, %v70_v34  ;;  %417 = vrot.lane.b32.xlu0 %v3331_v58, %s3486_s0 }
  0xdf   :  { %v200_v61 = vpop.f32.mrf.mxu0 }
  0xe0   :  { %v3734_v62 = vadd.f32 %v200_v61, %v66_v33 }
  0xe1   :  { %v202_v63 = vpop.f32.mrf.mxu0 }
  0xe2   :  { %v3736_v0 = vadd.f32 %v202_v63, %v70_v34 }
  0xe3   :  { %v206_v1 = vpop.f32.mrf.mxu0 }
  0xe4   :  { %v3738_v2 = vadd.f32 %v206_v1, %v66_v33 }
  0xe5   :  { %v208_v4 = vpop.f32.mrf.mxu0 }
  0xe6   :  { %v3740_v6 = vadd.f32 %v208_v4, %v70_v34 }
  0xe7   :  { %v212_v8 = vpop.f32.mrf.mxu0 }
  0xe8   :  { %v3742_v9 = vadd.f32 %v212_v8, %v66_v33 }
  0xe9   :  { %v214_v11 = vpop.f32.mrf.mxu0 }
  0xea   :  { %v3744_v12 = vadd.f32 %v214_v11, %v70_v34 }
  0xeb   :  { %v218_v15 = vpop.f32.mrf.mxu0 }
  0xec   :  { %v3746_v18 = vadd.f32 %v218_v15, %v66_v33 }
  0xed   :  { %v220_v20 = vpop.f32.mrf.mxu0 }
  0xee   :  { %v3748_v21 = vadd.f32 %v220_v20, %v70_v34 }
  0xef   :  { %v224_v22 = vpop.f32.mrf.mxu0 }
  0xf0   :  { %v3750_v23 = vadd.f32 %v224_v22, %v66_v33 }
  0xf1   :  { %v226_v24 = vpop.f32.mrf.mxu0 }
  0xf2   :  { %v227_v25 = vadd.f32 %v226_v24, %v70_v34 }
  0xf4   :  { %v409_v26 = vadd.f32 %v405_v49, %v227_v25 }
  0xf6   :  { %3332 = vtanh.f32 %v409_v26  ;;  %v432_v37 = vmul.f32 0.5, %v409_v26 }
  0xf7   :  { %3334 = vtanh.f32 %v410_v31 }
  0xf8   :  { %3336 = vtanh.f32 %v432_v37 }
 0x103   :  { %v3333_v28 = vpop.eup %3332 }
 0x104   :  { %439 = vrot.lane.b32.xlu0 %v3333_v28, %s3486_s0  ;;  %v3335_v32 = vpop.eup %3334 }
 0x105   :  { %v412_v33 = vadd.f32 1.0, %v3335_v32  ;;  %v3337_v38 = vpop.eup %3336 }
 0x106   :  { %v434_v41 = vadd.f32 1.0, %v3337_v38 }
 0x107   :  { %v413_v34 = vmul.f32 0.5, %v412_v33 }
 0x108   :  { %462 = vperm.xlu0 %3303, %v2877_v29   ;;  %v435_v42 = vmul.f32 0.5, %v434_v41 }
 0x109   :  { %v415_v40 = vmul.f32 0.0, %v413_v34 }
 0x10a   :  { %v437_v56 = vmul.f32 0.0, %v435_v42 }
 0x10c   :  { %479 = vperm.xlu0 %3303, %v2878_v30  }
 0x150   :  { %v418_v35 = vpop.permute.xlu0 %417 }
 0x151   :  { %v420_v36 = vmul.f32 %v418_v35, %v413_v34 }
 0x153   :  { %422 = vrot.lane.b32.xlu1 %v420_v36, %s3487_s20 }
 0x176   :  { %v440_v44 = vpop.permute.xlu0 %439 }
 0x177   :  { %v442_v46 = vmul.f32 %v440_v44, %v435_v42 }
 0x179   :  { %444 = vrot.lane.b32.xlu1 %v442_v46, %s3487_s20 }
 0x17d   :  { %469 = vperm.xlu1 %3304, %v466_v48  }
 0x183   :  { %v3769_v8 = vpop.permute.xlu0 %462 }
 0x187   :  { %v3782_v22 = vpop.permute.xlu0 %479 }
 0x1c5   :  { %v423_v49 = vpop.permute.xlu1 %422 }
 0x1c6   :  { %v3764_v51 = vadd.f32 %v423_v49, %v415_v40 }
 0x1c8   :  { %3338 = vtanh.f32 %v3764_v51 }
 0x1d5   :  { %v3339_v52 = vpop.eup %3338 }
 0x1d6   :  { %428 = vrot.lane.b32.xlu1 %v3339_v52, %s3486_s0 }
 0x1da   :  { %486 = vperm.xlu1 %3304, %v483_v54   ;;  %v2881_v54 = vsel %vm698_vm4, 1.0, %v3483_v3 }
 0x1eb   :  { %v445_v58 = vpop.permute.xlu1 %444 }
 0x1ec   :  { %v447_v59 = vadd.f32 %v445_v58, %v437_v56  ;;  %v2882_v56 = vsel %vm701_vm5, 1.0, %v3483_v3 }
 0x1ed   :  { %v3305_v58 = vpack.i.bf16 %v2882_v56, %v2881_v54 }
 0x1ee   :  { %3340 = vtanh.f32 %v447_v59  ;;  %v491_v25 = vmul.f32 %v3782_v22, %v447_v59  ;;  %v728_v59 = vsub.f32 1.0, %v2882_v56 }
 0x1f8   :  { %v470_v63 = vpop.permute.xlu1 %469 }
 0x1f9   :  { %v3771_v11 = vmul.f32 0.0, %v470_v63 }
 0x1fb   :  { %v3341_v61 = vpop.eup %3340 }
 0x1fc   :  { %450 = vrot.lane.b32.xlu0 %v3341_v61, %s3486_s0 }
 0x248   :  { %v429_v1 = vpop.permute.xlu1 %428 }
 0x249   :  { %v431_v4 = vmul.f32 %v429_v1, %v413_v34 }
 0x24b   :  { %v3774_v15 = vmul.f32 %v3769_v8, %v431_v4 }
 0x24d   :  { %v3778_v20 = vadd.f32 %v3771_v11, %v3774_v15 }
 0x24f   :  { %503 = vrot.lane.b32.xlu1 %v3778_v20, %s3487_s20 }
 0x255   :  { %v487_v24 = vpop.permute.xlu1 %486 }
 0x256   :  { %v489_v26 = vmul.f32 0.0, %v487_v24 }
 0x258   :  { %v3785_v28 = vadd.f32 %v491_v25, %v489_v26 }
 0x26e   :  { %v451_v29 = vpop.permute.xlu0 %450 }
 0x26f   :  { %v453_v30 = vmul.f32 %v451_v29, %v435_v42  ;;  %v474_v29 = vmul.f32 %v3769_v8, %v3764_v51 }
 0x271   :  { %v3788_v31 = vmul.f32 %v3782_v22, %v453_v30  ;;  %v3830_v30 = vadd.f32 %v474_v29, %v3771_v11 }
 0x273   :  { %v3791_v32 = vadd.f32 %v489_v26, %v3788_v31  ;;  %v710_v26 = vsub.f32 1.0, %v2881_v54 }
 0x275   :  { %579 = vrot.lane.b32.xlu0 %v3791_v32, %s3487_s20 }
 0x2c1   :  { %v504_v33 = vpop.permute.xlu1 %503 }
 0x2c2   :  { %3086 = vmatmul.mubr.msk.f32.vlgmr.msra.gmra.mxu1 %vm73_vm0, %v504_v33 }
 0x2c3   :  { %3089 = vmatpush3.msra.mxu1 %v3614_v14  ;;  %3096 = vmatprep.mubr.msk.f32.mxu1 %vm3484_vm1, %v3483_v3 }
 0x2c4   :  { %3090 = vmatprep.subr.mxu1 %v3483_v3 }
 0x2c5   :  { %3091 = vmatpush3.msra.mxu1 %v3627_v16 }
 0x2c6   :  { %3092 = vmatprep.subr.mxu1 %v3483_v3 }
 0x2c7   :  { %3093 = vmatpush3.msra.mxu1 %v3637_v17 }
 0x2c8   :  { %3094 = vmatprep.subr.mxu1 %v3483_v3 }
 0x2c9   :  { %3095 = vmatpush3.msra.mxu1 %v3648_v19 }
 0x2ca   :  { %3099 = vmatprep.subr.mxu1 %v3483_v3 }
 0x2e7   :  { %v580_v34 = vpop.permute.xlu0 %579 }
 0x2e8   :  { %3097 = vmatmul.mubr.msk.f32.vlgmr.msra.gmra.mxu1 %vm73_vm0, %v580_v34 }
 0x2e9   :  { %3100 = vmatpush3.msra.mxu1 %v3570_v5  ;;  %3107 = vmatprep.mubr.msk.f32.mxu1 %vm3484_vm1, %v3483_v3 }
 0x2ea   :  { %3101 = vmatprep.subr.mxu1 %v3483_v3 }
 0x2eb   :  { %3102 = vmatpush3.msra.mxu1 %v3579_v7 }
 0x2ec   :  { %3103 = vmatprep.subr.mxu1 %v3483_v3 }
 0x2ed   :  { %3104 = vmatpush3.msra.mxu1 %v3592_v10 }
 0x2ee   :  { %3105 = vmatprep.subr.mxu1 %v3483_v3 }
 0x2ef   :  { %3106 = vmatpush3.msra.mxu1 %v3605_v13 }
 0x2f0   :  { %3121 = vmatprep.subr.mxu1 %v3483_v3 }
 0x382   :  { %v573_v35 = vpop.f32.mrf.mxu1 }
 0x383   :  { %v577_v36 = vadd.f32 %v573_v35, %v3717_v43 }
 0x384   :  { %v3087_v37 = vpop.f32.mrf.mxu1 }
 0x385   :  { %3342 = vtanh.f32 %v577_v36  ;;  %v654_v48 = vmul.f32 0.5, %v577_v36 }
 0x392   :  { %v3343_v38 = vpop.eup %3342 }
 0x393   :  { %661 = vrot.lane.b32.xlu1 %v3343_v38, %s3486_s0 }
 0x3a8   :  { %v649_v41 = vpop.f32.mrf.mxu1 }
 0x3a9   :  { %v653_v42 = vadd.f32 %v649_v41, %v3748_v21 }
 0x3aa   :  { %v3098_v44 = vpop.f32.mrf.mxu1 }
 0x3ab   :  { %3344 = vtanh.f32 %v653_v42  ;;  %v676_v61 = vmul.f32 0.5, %v653_v42 }
 0x3ac   :  { %3346 = vtanh.f32 %v654_v48 }
 0x3ad   :  { %3348 = vtanh.f32 %v676_v61 }
 0x3b8   :  { %v3345_v46 = vpop.eup %3344 }
 0x3b9   :  { %683 = vrot.lane.b32.xlu0 %v3345_v46, %s3486_s0  ;;  %v3347_v40 = vpop.eup %3346 }
 0x3ba   :  { %v656_v49 = vadd.f32 1.0, %v3347_v40  ;;  %v3349_v63 = vpop.eup %3348 }
 0x3bb   :  { %v678_v1 = vadd.f32 1.0, %v3349_v63 }
 0x3bc   :  { %v657_v43 = vmul.f32 0.5, %v656_v49 }
 0x3bd   :  { %v679_v4 = vmul.f32 0.5, %v678_v1 }
 0x3be   :  { %v659_v33 = vmul.f32 %v657_v43, %v3830_v30 }
 0x3bf   :  { %v681_v37 = vmul.f32 %v679_v4, %v3785_v28 }
 0x405   :  { %v662_v52 = vpop.permute.xlu1 %661 }
 0x406   :  { %v664_v21 = vmul.f32 %v662_v52, %v657_v43 }
 0x408   :  { %666 = vrot.lane.b32.xlu1 %v664_v21, %s3487_s20 }
 0x40c   :  { %3306 = vperm.xlu1 %3304, %v3305_v58  }
 0x410   :  { %731 = vperm.xlu1 %3304, %v728_v59  }
 0x42b   :  { %v684_v24 = vpop.permute.xlu0 %683 }
 0x42c   :  { %v686_v25 = vmul.f32 %v684_v24, %v679_v4 }
 0x42e   :  { %688 = vrot.lane.b32.xlu0 %v686_v25, %s3487_s20 }
 0x432   :  { %713 = vperm.xlu0 %3303, %v710_v26  }
 0x47a   :  { %v667_v34 = vpop.permute.xlu1 %666 }
 0x47b   :  { %v3833_v35 = vadd.f32 %v667_v34, %v659_v33 }
 0x47d   :  { %3350 = vtanh.f32 %v3833_v35 }
 0x487   :  { %v3307_v42 = vpop.permute.xlu1 %3306 }
 0x488   :  { %v3844_v46 = vunpack.i.l.bf16 %v3307_v42  ;;  %v3858_v21 = vunpack.i.h.bf16 %v3307_v42  ;;  %v2886_v42 = vsel %vm947_vm7, 1.0, %v3483_v3 }
 0x48a   :  { %v3351_v36 = vpop.eup %3350 }
 0x48b   :  { %672 = vrot.lane.b32.xlu0 %v3351_v36, %s3486_s0  ;;  %v3856_v54 = vpop.permute.xlu1 %731 }
 0x4a0   :  { %v689_v38 = vpop.permute.xlu0 %688 }
 0x4a1   :  { %v3838_v41 = vadd.f32 %v689_v38, %v681_v37 }
 0x4a3   :  { %3352 = vtanh.f32 %v3838_v41 }
 0x4ad   :  { %v3842_v11 = vpop.permute.xlu0 %713 }
 0x4ae   :  { %v716_v40 = vmul.f32 %v3842_v11, %v3778_v20 }
 0x4b0   :  { %v3353_v51 = vpop.eup %3352 }
 0x4b1   :  { %694 = vrot.lane.b32.xlu1 %v3353_v51, %s3486_s0  ;;  %v2885_v51 = vsel %vm944_vm6, 1.0, %v3483_v3 }
 0x4fd   :  { %v673_v44 = vpop.permute.xlu0 %672 }
 0x4fe   :  { %v675_v48 = vmul.f32 %v673_v44, %v657_v43  ;;  %v734_v43 = vmul.f32 %v3856_v54, %v3791_v32  ;;  %v3310_v44 = vpack.i.bf16 %v2886_v42, %v2885_v51 }
 0x500   :  { %v3849_v49 = vmul.f32 %v3844_v46, %v675_v48  ;;  %v974_v48 = vsub.f32 1.0, %v2886_v42 }
 0x502   :  { %v3852_v52 = vadd.f32 %v716_v40, %v3849_v49 }
 0x504   :  { %749 = vrot.lane.b32.xlu0 %v3852_v52, %s3487_s20 }
 0x523   :  { %v695_v56 = vpop.permute.xlu1 %694 }
 0x524   :  { %v697_v58 = vmul.f32 %v695_v56, %v679_v4 }
 0x526   :  { %v3863_v20 = vmul.f32 %v3858_v21, %v697_v58 }
 0x528   :  { %v3866_v59 = vadd.f32 %v734_v43, %v3863_v20 }
 0x52a   :  { %825 = vrot.lane.b32.xlu1 %v3866_v59, %s3487_s20 }
 0x576   :  { %v750_v61 = vpop.permute.xlu0 %749 }
 0x577   :  { %3108 = vmatmul.mubr.msk.f32.vlgmr.msra.gmra.mxu1 %vm73_vm0, %v750_v61 }
 0x578   :  { %3122 = vmatpush3.msra.mxu1 %v3570_v5  ;;  %3129 = vmatprep.mubr.msk.f32.mxu1 %vm3484_vm1, %v3483_v3 }
 0x579   :  { %3123 = vmatprep.subr.mxu1 %v3483_v3 }
 0x57a   :  { %3124 = vmatpush3.msra.mxu1 %v3579_v7 }
 0x57b   :  { %3125 = vmatprep.subr.mxu1 %v3483_v3 }
 0x57c   :  { %3126 = vmatpush3.msra.mxu1 %v3592_v10 }
 0x57d   :  { %3127 = vmatprep.subr.mxu1 %v3483_v3 }
 0x57e   :  { %3128 = vmatpush3.msra.mxu1 %v3605_v13 }
 0x57f   :  { %3143 = vmatprep.subr.mxu1 %v3483_v3 }
 0x59c   :  { %v826_v32 = vpop.permute.xlu1 %825 }
 0x59d   :  { %3119 = vmatmul.mubr.msk.f32.vlgmr.msra.gmra.mxu0 %vm73_vm0, %v826_v32 }
 0x59e   :  { %3133 = vmatpush3.msra.mxu0 %v3614_v14  ;;  %3140 = vmatprep.mubr.msk.f32.mxu0 %vm3484_vm1, %v3483_v3 }
 0x59f   :  { %3134 = vmatprep.subr.mxu0 %v3483_v3 }
 0x5a0   :  { %3135 = vmatpush3.msra.mxu0 %v3627_v16 }
 0x5a1   :  { %3136 = vmatprep.subr.mxu0 %v3483_v3 }
 0x5a2   :  { %3137 = vmatpush3.msra.mxu0 %v3637_v17 }
 0x5a3   :  { %3138 = vmatprep.subr.mxu0 %v3483_v3 }
 0x5a4   :  { %3139 = vmatpush3.msra.mxu0 %v3648_v19 }
 0x5a5   :  { %3154 = vmatprep.subr.mxu0 %v3483_v3 }
 0x637   :  { %v819_v63 = vpop.f32.mrf.mxu1 }
 0x638   :  { %v823_v1 = vadd.f32 %v819_v63, %v3721_v47  ;;  %v956_v63 = vsub.f32 1.0, %v2885_v51 }
 0x639   :  { %v3109_v4 = vpop.f32.mrf.mxu1 }
 0x63a   :  { %3354 = vtanh.f32 %v823_v1  ;;  %v900_v34 = vmul.f32 0.5, %v823_v1  ;;  %v719_v1 = vmul.f32 %v3842_v11, %v3830_v30  ;;  %v718_v4 = vmul.f32 %v3844_v46, %v3833_v35 }
 0x63b   :  { %v737_v30 = vmul.f32 %v3856_v54, %v3785_v28  ;;  %v721_v28 = vadd.f32 %v3849_v49, %v3774_v15  ;;  %v739_v15 = vadd.f32 %v3863_v20, %v3788_v31 }
 0x647   :  { %v3355_v24 = vpop.eup %3354 }
 0x648   :  { %907 = vrot.lane.b32.xlu0 %v3355_v24, %s3486_s0  ;;  %v3906_v24 = vadd.f32 %v719_v1, %v718_v4 }
 0x65d   :  { %v895_v25 = vpop.f32.mrf.mxu0 }
 0x65e   :  { %v899_v26 = vadd.f32 %v895_v25, %v3744_v12 }
 0x65f   :  { %v3120_v29 = vpop.f32.mrf.mxu0 }
 0x660   :  { %3356 = vtanh.f32 %v899_v26  ;;  %v922_v40 = vmul.f32 0.5, %v899_v26 }
 0x661   :  { %3358 = vtanh.f32 %v900_v34  ;;  %v736_v34 = vmul.f32 %v3858_v21, %v3838_v41 }
 0x662   :  { %3360 = vtanh.f32 %v922_v40 }
 0x66d   :  { %v3357_v33 = vpop.eup %3356 }
 0x66e   :  { %929 = vrot.lane.b32.xlu1 %v3357_v33, %s3486_s0  ;;  %v3359_v36 = vpop.eup %3358 }
 0x66f   :  { %v902_v37 = vadd.f32 1.0, %v3359_v36  ;;  %v3361_v56 = vpop.eup %3360  ;;  %v3917_v36 = vadd.f32 %v737_v30, %v736_v34 }
 0x670   :  { %v924_v58 = vadd.f32 1.0, %v3361_v56 }
 0x671   :  { %v903_v47 = vmul.f32 0.5, %v902_v37 }
 0x672   :  { %v925_v43 = vmul.f32 0.5, %v924_v58 }
 0x673   :  { %v905_v25 = vmul.f32 %v903_v47, %v3906_v24 }
 0x674   :  { %v927_v35 = vmul.f32 %v925_v43, %v3917_v36 }
 0x6ba   :  { %v908_v38 = vpop.permute.xlu0 %907 }
 0x6bb   :  { %v910_v12 = vmul.f32 %v908_v38, %v903_v47 }
 0x6bd   :  { %912 = vrot.lane.b32.xlu0 %v910_v12, %s3487_s20 }
 0x6c1   :  { %3311 = vperm.xlu0 %3303, %v3310_v44  }
 0x6c5   :  { %977 = vperm.xlu0 %3303, %v974_v48  }
 0x6e0   :  { %v930_v61 = vpop.permute.xlu1 %929 }
 0x6e1   :  { %v932_v32 = vmul.f32 %v930_v61, %v925_v43 }
 0x6e3   :  { %934 = vrot.lane.b32.xlu1 %v932_v32, %s3487_s20 }
 0x6e7   :  { %959 = vperm.xlu1 %3304, %v956_v63  }
 0x72f   :  { %v913_v26 = vpop.permute.xlu0 %912 }
 0x730   :  { %v3909_v29 = vadd.f32 %v913_v26, %v905_v25 }
 0x732   :  { %3362 = vtanh.f32 %v3909_v29 }
 0x73c   :  { %v3312_v12 = vpop.permute.xlu0 %3311 }
 0x73d   :  { %v3926_v41 = vunpack.i.l.bf16 %v3312_v12  ;;  %v3941_v1 = vunpack.i.h.bf16 %v3312_v12 }
 0x73f   :  { %v3363_v33 = vpop.eup %3362 }
 0x740   :  { %918 = vrot.lane.b32.xlu1 %v3363_v33, %s3486_s0  ;;  %v3939_v32 = vpop.permute.xlu0 %977 }
 0x741   :  { %v980_v49 = vmul.f32 %v3939_v32, %v3866_v59 }
 0x755   :  { %v935_v37 = vpop.permute.xlu1 %934 }
 0x756   :  { %v3920_v38 = vadd.f32 %v935_v37, %v927_v35 }
 0x758   :  { %3364 = vtanh.f32 %v3920_v38 }
 0x762   :  { %v3924_v42 = vpop.permute.xlu1 %959 }
 0x763   :  { %v962_v40 = vmul.f32 %v3924_v42, %v3852_v52 }
 0x765   :  { %v3365_v51 = vpop.eup %3364 }
 0x766   :  { %940 = vrot.lane.b32.xlu0 %v3365_v51, %s3486_s0 }
 0x7b2   :  { %v919_v44 = vpop.permute.xlu1 %918 }
 0x7b3   :  { %v921_v48 = vmul.f32 %v919_v44, %v903_v47 }
 0x7b5   :  { %v955_v56 = vmul.f32 %v3926_v41, %v921_v48 }
 0x7b7   :  { %v3933_v58 = vadd.f32 %v955_v56, %v721_v28  ;;  %v3935_v61 = vadd.f32 %v962_v40, %v955_v56  ;;  %v2889_v28 = vsel %vm1190_vm8, 1.0, %v3483_v3  ;;  %v2890_v40 = vsel %vm1193_vm9, 1.0, %v3483_v3 }
 0x7b8   :  { %v3315_v56 = vpack.i.bf16 %v2890_v40, %v2889_v28 }
 0x7b9   :  { %995 = vrot.lane.b32.xlu1 %v3935_v61, %s3487_s20 }
 0x7d8   :  { %v941_v63 = vpop.permute.xlu0 %940 }
 0x7d9   :  { %v943_v47 = vmul.f32 %v941_v63, %v925_v43  ;;  %v1220_v63 = vsub.f32 1.0, %v2890_v40 }
 0x7db   :  { %v973_v52 = vmul.f32 %v3941_v1, %v943_v47 }
 0x7dd   :  { %v3948_v4 = vadd.f32 %v973_v52, %v739_v15  ;;  %v3950_v25 = vadd.f32 %v980_v49, %v973_v52 }
 0x7df   :  { %1071 = vrot.lane.b32.xlu0 %v3950_v25, %s3487_s20 }
 0x82b   :  { %v996_v26 = vpop.permute.xlu1 %995 }
 0x82c   :  { %3130 = vmatmul.mubr.msk.f32.vlgmr.msra.gmra.mxu1 %vm73_vm0, %v996_v26 }
 0x82d   :  { %3144 = vmatpush3.msra.mxu1 %v3570_v5  ;;  %3151 = vmatprep.mubr.msk.f32.mxu1 %vm3484_vm1, %v3483_v3 }
 0x82e   :  { %3145 = vmatprep.subr.mxu1 %v3483_v3 }
 0x82f   :  { %3146 = vmatpush3.msra.mxu1 %v3579_v7 }
 0x830   :  { %3147 = vmatprep.subr.mxu1 %v3483_v3 }
 0x831   :  { %3148 = vmatpush3.msra.mxu1 %v3592_v10 }
 0x832   :  { %3149 = vmatprep.subr.mxu1 %v3483_v3 }
 0x833   :  { %3150 = vmatpush3.msra.mxu1 %v3605_v13 }
 0x834   :  { %3165 = vmatprep.subr.mxu1 %v3483_v3 }
 0x851   :  { %v1072_v31 = vpop.permute.xlu0 %1071 }
 0x852   :  { %3141 = vmatmul.mubr.msk.f32.vlgmr.msra.gmra.mxu0 %vm73_vm0, %v1072_v31 }
 0x853   :  { %3155 = vmatpush3.msra.mxu0 %v3614_v14  ;;  %3162 = vmatprep.mubr.msk.f32.mxu0 %vm3484_vm1, %v3483_v3 }
 0x854   :  { %3156 = vmatprep.subr.mxu0 %v3483_v3 }
 0x855   :  { %3157 = vmatpush3.msra.mxu0 %v3627_v16 }
 0x856   :  { %3158 = vmatprep.subr.mxu0 %v3483_v3 }
 0x857   :  { %3159 = vmatpush3.msra.mxu0 %v3637_v17 }
 0x858   :  { %3160 = vmatprep.subr.mxu0 %v3483_v3 }
 0x859   :  { %3161 = vmatpush3.msra.mxu0 %v3648_v19 }
 0x85a   :  { %3176 = vmatprep.subr.mxu0 %v3483_v3 }
 0x8ec   :  { %v1065_v20 = vpop.f32.mrf.mxu1 }
 0x8ed   :  { %v1069_v59 = vadd.f32 %v1065_v20, %v3725_v53  ;;  %v1202_v20 = vsub.f32 1.0, %v2889_v28 }
 0x8ee   :  { %v3131_v43 = vpop.f32.mrf.mxu1 }
 0x8ef   :  { %3366 = vtanh.f32 %v1069_v59  ;;  %v1146_v51 = vmul.f32 0.5, %v1069_v59  ;;  %v965_v59 = vmul.f32 %v3924_v42, %v3906_v24  ;;  %v964_v43 = vmul.f32 %v3926_v41, %v3909_v29 }
 0x8f0   :  { %v983_v24 = vmul.f32 %v3939_v32, %v3917_v36 }
 0x8fc   :  { %v3367_v33 = vpop.eup %3366 }
 0x8fd   :  { %1153 = vrot.lane.b32.xlu1 %v3367_v33, %s3486_s0  ;;  %v3990_v33 = vadd.f32 %v965_v59, %v964_v43 }
 0x912   :  { %v1141_v34 = vpop.f32.mrf.mxu0 }
 0x913   :  { %v1145_v30 = vadd.f32 %v1141_v34, %v3740_v6 }
 0x914   :  { %v3142_v35 = vpop.f32.mrf.mxu0 }
 0x915   :  { %3368 = vtanh.f32 %v1145_v30  ;;  %v1168_v47 = vmul.f32 0.5, %v1145_v30 }
 0x916   :  { %3370 = vtanh.f32 %v1146_v51  ;;  %v982_v51 = vmul.f32 %v3941_v1, %v3920_v38 }
 0x917   :  { %3372 = vtanh.f32 %v1168_v47 }
 0x922   :  { %v3369_v37 = vpop.eup %3368 }
 0x923   :  { %1175 = vrot.lane.b32.xlu0 %v3369_v37, %s3486_s0  ;;  %v3371_v12 = vpop.eup %3370 }
 0x924   :  { %v1148_v44 = vadd.f32 1.0, %v3371_v12  ;;  %v3373_v15 = vpop.eup %3372  ;;  %v4001_v12 = vadd.f32 %v983_v24, %v982_v51  ;;  %v2893_v51 = vsel %vm1436_vm10, 1.0, %v3483_v3  ;;  %v2894_v24 = vsel %vm1439_vm11, 1.0, %v3483_v3 }
 0x925   :  { %v1170_v49 = vadd.f32 1.0, %v3373_v15 }
 0x926   :  { %v1149_v53 = vmul.f32 0.5, %v1148_v44 }
 0x927   :  { %v1171_v52 = vmul.f32 0.5, %v1170_v49 }
 0x928   :  { %v1151_v34 = vmul.f32 %v1149_v53, %v3990_v33 }
 0x929   :  { %v1173_v29 = vmul.f32 %v1171_v52, %v4001_v12 }
 0x96f   :  { %v1154_v48 = vpop.permute.xlu1 %1153 }
 0x970   :  { %v1156_v6 = vmul.f32 %v1154_v48, %v1149_v53 }
 0x972   :  { %1158 = vrot.lane.b32.xlu1 %v1156_v6, %s3487_s20 }
 0x976   :  { %3316 = vperm.xlu1 %3304, %v3315_v56  }
 0x97a   :  { %1223 = vperm.xlu1 %3304, %v1220_v63  }
 0x995   :  { %v1176_v26 = vpop.permute.xlu0 %1175 }
 0x996   :  { %v1178_v31 = vmul.f32 %v1176_v26, %v1171_v52 }
 0x998   :  { %1180 = vrot.lane.b32.xlu0 %v1178_v31, %s3487_s20 }
 0x99c   :  { %1205 = vperm.xlu0 %3303, %v1202_v20  }
 0x9e4   :  { %v1159_v30 = vpop.permute.xlu1 %1158 }
 0x9e5   :  { %v3993_v35 = vadd.f32 %v1159_v30, %v1151_v34 }
 0x9e7   :  { %3374 = vtanh.f32 %v3993_v35 }
 0x9f1   :  { %v3317_v6 = vpop.permute.xlu1 %3316 }
 0x9f2   :  { %v4010_v38 = vunpack.i.l.bf16 %v3317_v6  ;;  %v4024_v20 = vunpack.i.h.bf16 %v3317_v6 }
 0x9f4   :  { %v3375_v37 = vpop.eup %3374 }
 0x9f5   :  { %1164 = vrot.lane.b32.xlu0 %v3375_v37, %s3486_s0  ;;  %v4022_v26 = vpop.permute.xlu1 %1223 }
 0xa0a   :  { %v1181_v44 = vpop.permute.xlu0 %1180 }
 0xa0b   :  { %v4004_v48 = vadd.f32 %v1181_v44, %v1173_v29  ;;  %v3320_v29 = vpack.i.bf16 %v2894_v24, %v2893_v51  ;;  %v1466_v44 = vsub.f32 1.0, %v2894_v24 }
 0xa0d   :  { %3376 = vtanh.f32 %v4004_v48 }
 0xa17   :  { %v4008_v40 = vpop.permute.xlu0 %1205 }
 0xa18   :  { %v1208_v36 = vmul.f32 %v4008_v40, %v3935_v61 }
 0xa1a   :  { %v3377_v28 = vpop.eup %3376 }
 0xa1b   :  { %1186 = vrot.lane.b32.xlu1 %v3377_v28, %s3486_s0 }
 0xa67   :  { %v1165_v56 = vpop.permute.xlu0 %1164 }
 0xa68   :  { %v1167_v63 = vmul.f32 %v1165_v56, %v1149_v53  ;;  %v1226_v53 = vmul.f32 %v4022_v26, %v3950_v25 }
 0xa6a   :  { %v1201_v47 = vmul.f32 %v4010_v38, %v1167_v63 }
 0xa6c   :  { %v4016_v15 = vadd.f32 %v1201_v47, %v3933_v58  ;;  %v4018_v49 = vadd.f32 %v1208_v36, %v1201_v47  ;;  %v1448_v47 = vsub.f32 1.0, %v2893_v51 }
 0xa6e   :  { %1241 = vrot.lane.b32.xlu0 %v4018_v49, %s3487_s20 }
 0xa8d   :  { %v1187_v31 = vpop.permute.xlu1 %1186 }
 0xa8e   :  { %v1189_v59 = vmul.f32 %v1187_v31, %v1171_v52  ;;  %v1211_v31 = vmul.f32 %v4008_v40, %v3990_v33  ;;  %v1229_v33 = vmul.f32 %v4022_v26, %v4001_v12 }
 0xa90   :  { %v1219_v61 = vmul.f32 %v4024_v20, %v1189_v59  ;;  %v1210_v59 = vmul.f32 %v4010_v38, %v3993_v35 }
 0xa92   :  { %v4030_v43 = vadd.f32 %v1219_v61, %v3948_v4  ;;  %v4032_v58 = vadd.f32 %v1226_v53, %v1219_v61  ;;  %v4072_v53 = vadd.f32 %v1211_v31, %v1210_v59  ;;  %v4169_v31 = vld [vmem:[%s4606_s5 + $0x8] sm:$0xff]  ;;  %v4176_v59 = vld [vmem:[%s4606_s5] sm:$0xff] }
 0xa94   :  { %1317 = vrot.lane.b32.xlu1 %v4032_v58, %s3487_s20 }
 0xae0   :  { %v1242_v34 = vpop.permute.xlu0 %1241 }
 0xae1   :  { %3152 = vmatmul.mubr.msk.f32.vlgmr.msra.gmra.mxu1 %vm73_vm0, %v1242_v34 }
 0xae2   :  { %3166 = vmatpush3.msra.mxu1 %v3570_v5  ;;  %3173 = vmatprep.mubr.msk.f32.mxu1 %vm3484_vm1, %v3483_v3 }
 0xae3   :  { %3167 = vmatprep.subr.mxu1 %v3483_v3 }
 0xae4   :  { %3168 = vmatpush3.msra.mxu1 %v3579_v7 }
 0xae5   :  { %3169 = vmatprep.subr.mxu1 %v3483_v3 }
 0xae6   :  { %3170 = vmatpush3.msra.mxu1 %v3592_v10 }
 0xae7   :  { %3171 = vmatprep.subr.mxu1 %v3483_v3 }
 0xae8   :  { %3172 = vmatpush3.msra.mxu1 %v3605_v13 }
 0xae9   :  { %3187 = vmatprep.subr.mxu1 %v3483_v3 }
 0xb06   :  { %v1318_v4 = vpop.permute.xlu1 %1317 }
 0xb07   :  { %3163 = vmatmul.mubr.msk.f32.vlgmr.msra.gmra.mxu0 %vm73_vm0, %v1318_v4 }
 0xb08   :  { %3177 = vmatpush3.msra.mxu0 %v3614_v14  ;;  %3184 = vmatprep.mubr.msk.f32.mxu0 %vm3484_vm1, %v3483_v3 }
 0xb09   :  { %3178 = vmatprep.subr.mxu0 %v3483_v3 }
 0xb0a   :  { %3179 = vmatpush3.msra.mxu0 %v3627_v16 }
 0xb0b   :  { %3180 = vmatprep.subr.mxu0 %v3483_v3 }
 0xb0c   :  { %3181 = vmatpush3.msra.mxu0 %v3637_v17 }
 0xb0d   :  { %3182 = vmatprep.subr.mxu0 %v3483_v3 }
 0xb0e   :  { %3183 = vmatpush3.msra.mxu0 %v3648_v19 }
 0xb0f   :  { %3198 = vmatprep.subr.mxu0 %v3483_v3 }
 0xba1   :  { %v1311_v5 = vpop.f32.mrf.mxu1 }
 0xba2   :  { %v1315_v7 = vadd.f32 %v1311_v5, %v3729_v57 }
 0xba3   :  { %v3153_v10 = vpop.f32.mrf.mxu1 }
 0xba4   :  { %3378 = vtanh.f32 %v1315_v7  ;;  %v1392_v52 = vmul.f32 0.5, %v1315_v7  ;;  %v1228_v7 = vmul.f32 %v4024_v20, %v4004_v48 }
 0xba6   :  { %v4083_v10 = vadd.f32 %v1229_v33, %v1228_v7 }
 0xbb1   :  { %v3379_v13 = vpop.eup %3378 }
 0xbb2   :  { %1399 = vrot.lane.b32.xlu0 %v3379_v13, %s3486_s0 }
 0xbc7   :  { %v1387_v14 = vpop.f32.mrf.mxu0 }
 0xbc8   :  { %v1391_v16 = vadd.f32 %v1387_v14, %v3736_v0 }
 0xbc9   :  { %v3164_v25 = vpop.f32.mrf.mxu0 }
 0xbca   :  { %3380 = vtanh.f32 %v1391_v16  ;;  %v1414_v28 = vmul.f32 0.5, %v1391_v16 }
 0xbcb   :  { %3382 = vtanh.f32 %v1392_v52 }
 0xbcc   :  { %3384 = vtanh.f32 %v1414_v28 }
 0xbd7   :  { %v3381_v17 = vpop.eup %3380 }
 0xbd8   :  { %1421 = vrot.lane.b32.xlu1 %v3381_v17, %s3486_s0  ;;  %v3383_v19 = vpop.eup %3382 }
 0xbd9   :  { %v1394_v30 = vadd.f32 1.0, %v3383_v19  ;;  %v3385_v6 = vpop.eup %3384 }
 0xbda   :  { %v1416_v56 = vadd.f32 1.0, %v3385_v6 }
 0xbdb   :  { %v1395_v57 = vmul.f32 0.5, %v1394_v30 }
 0xbdc   :  { %v1417_v63 = vmul.f32 0.5, %v1416_v56  ;;  %v4122_v56 = vld [vmem:[%s4605_s4 + $0x18] sm:$0xff] }
 0xbdd   :  { %v1397_v61 = vmul.f32 %v1395_v57, %v4072_v53 }
 0xbde   :  { %v1419_v35 = vmul.f32 %v1417_v63, %v4083_v10 }
 0xc24   :  { %v1400_v37 = vpop.permute.xlu0 %1399 }
 0xc25   :  { %v1402_v0 = vmul.f32 %v1400_v37, %v1395_v57 }
 0xc27   :  { %1404 = vrot.lane.b32.xlu0 %v1402_v0, %s3487_s20 }
 0xc2b   :  { %3321 = vperm.xlu0 %3303, %v3320_v29  }
 0xc2f   :  { %1469 = vperm.xlu0 %3303, %v1466_v44  }
 0xc4a   :  { %v1422_v36 = vpop.permute.xlu1 %1421 }
 0xc4b   :  { %v1424_v27 = vmul.f32 %v1422_v36, %v1417_v63 }
 0xc4d   :  { %1426 = vrot.lane.b32.xlu1 %v1424_v27, %s3487_s20  ;;  %v4153_v27 = vld [vmem:[%s4606_s5 + $0x18] sm:$0xff] }
 0xc51   :  { %1451 = vperm.xlu1 %3304, %v1448_v47   ;;  %v4162_v47 = vld [vmem:[%s4606_s5 + $0x10] sm:$0xff] }
 0xc99   :  { %v1405_v34 = vpop.permute.xlu0 %1404 }
 0xc9a   :  { %v4075_v4 = vadd.f32 %v1405_v34, %v1397_v61 }
 0xc9c   :  { %3386 = vtanh.f32 %v4075_v4 }
 0xca6   :  { %v3322_v17 = vpop.permute.xlu0 %3321 }
 0xca7   :  { %v4092_v48 = vunpack.i.l.bf16 %v3322_v17  ;;  %v4106_v29 = vunpack.i.h.bf16 %v3322_v17 }
 0xca9   :  { %v3387_v5 = vpop.eup %3386 }
 0xcaa   :  { %1410 = vrot.lane.b32.xlu1 %v3387_v5, %s3486_s0  ;;  %v4104_v24 = vpop.permute.xlu0 %1469 }
 0xcbf   :  { %v1427_v13 = vpop.permute.xlu1 %1426 }
 0xcc0   :  { %v4086_v14 = vadd.f32 %v1427_v13, %v1419_v35 }
 0xcc2   :  { %3388 = vtanh.f32 %v4086_v14 }
 0xccc   :  { %v4090_v25 = vpop.permute.xlu1 %1451 }
 0xccd   :  { %v1454_v12 = vmul.f32 %v4090_v25, %v4018_v49 }
 0xccf   :  { %v3389_v16 = vpop.eup %3388 }
 0xcd0   :  { %1432 = vrot.lane.b32.xlu0 %v3389_v16, %s3486_s0 }
 0xd1c   :  { %v1411_v52 = vpop.permute.xlu1 %1410 }
 0xd1d   :  { %v1413_v19 = vmul.f32 %v1411_v52, %v1395_v57  ;;  %v1472_v57 = vmul.f32 %v4104_v24, %v4032_v58  ;;  %v4138_v58 = vld [vmem:[%s4605_s4 + $0x8] sm:$0xff] }
 0xd1f   :  { %v1447_v30 = vmul.f32 %v4092_v48, %v1413_v19 }
 0xd21   :  { %v4098_v37 = vadd.f32 %v1447_v30, %v4016_v15  ;;  %v4100_v51 = vadd.f32 %v1454_v12, %v1447_v30 }
 0xd23   :  { %1481 = vrot.lane.b32.xlu1 %v4100_v51, %s3487_s20 }
 0xd42   :  { %v1433_v0 = vpop.permute.xlu0 %1432 }
 0xd43   :  { %v1435_v44 = vmul.f32 %v1433_v0, %v1417_v63  ;;  %v4145_v63 = vld [vmem:[%s4605_s4] sm:$0xff] }
 0xd45   :  { %v1465_v49 = vmul.f32 %v4106_v29, %v1435_v44 }
 0xd47   :  { %v4112_v28 = vadd.f32 %v1465_v49, %v4030_v43  ;;  %v4114_v15 = vadd.f32 %v1472_v57, %v1465_v49  ;;  %v4131_v43 = vld [vmem:[%s4605_s4 + $0x10] sm:$0xff] }
 0xd49   :  { %1557 = vrot.lane.b32.xlu0 %v4114_v15, %s3487_s20 }
 0xd95   :  { %v1482_v6 = vpop.permute.xlu1 %1481 }
 0xd96   :  { %3174 = vmatmul.mubr.msk.f32.vlgmr.msra.gmra.mxu1 %vm73_vm0, %v1482_v6 }
 0xd97   :  { %3188 = vmatpush3.msra.mxu1 %v4122_v56  ;;  %3195 = vmatprep.mubr.msk.f32.mxu1 %vm3484_vm1, %v3483_v3 }
 0xd98   :  { %3189 = vmatprep.subr.mxu1 %v3483_v3 }
 0xd99   :  { %3190 = vmatpush3.msra.mxu1 %v4131_v43 }
 0xd9a   :  { %3191 = vmatprep.subr.mxu1 %v3483_v3 }
 0xd9b   :  { %3192 = vmatpush3.msra.mxu1 %v4138_v58 }
 0xd9c   :  { %3193 = vmatprep.subr.mxu1 %v3483_v3 }
 0xd9d   :  { %3194 = vmatpush3.msra.mxu1 %v4145_v63 }
 0xd9e   :  { %3209 = vmatprep.subr.mxu1 %v3483_v3 }
 0xdbb   :  { %v1558_v36 = vpop.permute.xlu0 %1557 }
 0xdbc   :  { %3185 = vmatmul.mubr.msk.f32.vlgmr.msra.gmra.mxu0 %vm73_vm0, %v1558_v36  ;;  %v1457_v36 = vmul.f32 %v4090_v25, %v4072_v53  ;;  %v1475_v53 = vmul.f32 %v4104_v24, %v4083_v10 }
 0xdbd   :  { %3199 = vmatpush3.msra.mxu0 %v4153_v27  ;;  %3206 = vmatprep.mubr.msk.f32.mxu0 %vm3484_vm1, %v3483_v3 }
 0xdbe   :  { %3200 = vmatprep.subr.mxu0 %v3483_v3 }
 0xdbf   :  { %3201 = vmatpush3.msra.mxu0 %v4162_v47 }
 0xdc0   :  { %3202 = vmatprep.subr.mxu0 %v3483_v3 }
 0xdc1   :  { %3203 = vmatpush3.msra.mxu0 %v4169_v31 }
 0xdc2   :  { %3204 = vmatprep.subr.mxu0 %v3483_v3 }
 0xdc3   :  { %3205 = vmatpush3.msra.mxu0 %v4176_v59 }
 0xdc4   :  { %3220 = vmatprep.subr.mxu0 %v3483_v3 }
 0xe56   :  { %v1551_v61 = vpop.f32.mrf.mxu1 }
 0xe57   :  { %v1555_v34 = vadd.f32 %v1551_v61, %v3734_v62  ;;  %v1456_v61 = vmul.f32 %v4092_v48, %v4075_v4 }
 0xe58   :  { %v3175_v5 = vpop.f32.mrf.mxu1 }
 0xe59   :  { %3390 = vtanh.f32 %v1555_v34  ;;  %v1632_v17 = vmul.f32 0.5, %v1555_v34  ;;  %v4190_v34 = vadd.f32 %v1457_v36, %v1456_v61 }
 0xe66   :  { %v3391_v7 = vpop.eup %3390 }
 0xe67   :  { %1639 = vrot.lane.b32.xlu1 %v3391_v7, %s3486_s0 }
 0xe7c   :  { %v1627_v33 = vpop.f32.mrf.mxu0 }
 0xe7d   :  { %v1631_v35 = vadd.f32 %v1627_v33, %v3731_v60 }
 0xe7e   :  { %v3186_v13 = vpop.f32.mrf.mxu0 }
 0xe7f   :  { %3392 = vtanh.f32 %v1631_v35  ;;  %v1654_v0 = vmul.f32 0.5, %v1631_v35  ;;  %v1474_v13 = vmul.f32 %v4106_v29, %v4086_v14  ;;  %v1677_v14 = vmul.f32 %v4104_v24, %v4100_v51 }
 0xe80   :  { %3394 = vtanh.f32 %v1632_v17 }
 0xe81   :  { %3396 = vtanh.f32 %v1654_v0 }
 0xe8c   :  { %v3393_v16 = vpop.eup %3392 }
 0xe8d   :  { %1661 = vrot.lane.b32.xlu0 %v3393_v16, %s3486_s0  ;;  %v3395_v52 = vpop.eup %3394  ;;  %v4201_v16 = vadd.f32 %v1475_v53, %v1474_v13 }
 0xe8e   :  { %v1634_v19 = vadd.f32 1.0, %v3395_v52  ;;  %v3397_v44 = vpop.eup %3396 }
 0xe8f   :  { %v1656_v57 = vadd.f32 1.0, %v3397_v44 }
 0xe90   :  { %v1635_v12 = vmul.f32 0.5, %v1634_v19 }
 0xe91   :  { %v1657_v49 = vmul.f32 0.5, %v1656_v57 }
 0xe92   :  { %v1637_v5 = vmul.f32 %v1635_v12, %v4190_v34 }
 0xe93   :  { %v1659_v4 = vmul.f32 %v1657_v49, %v4201_v16 }
 0xed9   :  { %v1640_v30 = vpop.permute.xlu1 %1639 }
 0xeda   :  { %v1642_v62 = vmul.f32 %v1640_v30, %v1635_v12 }
 0xedc   :  { %1644 = vrot.lane.b32.xlu1 %v1642_v62, %s3487_s20 }
 0xeff   :  { %v1662_v60 = vpop.permute.xlu0 %1661 }
 0xf00   :  { %v1664_v6 = vmul.f32 %v1662_v60, %v1657_v49 }
 0xf02   :  { %1666 = vrot.lane.b32.xlu0 %v1664_v6, %s3487_s20 }
 0xf4e   :  { %v1645_v7 = vpop.permute.xlu1 %1644 }
 0xf4f   :  { %v4193_v33 = vadd.f32 %v1645_v7, %v1637_v5 }
 0xf51   :  { %3398 = vtanh.f32 %v4193_v33 }
 0xf5e   :  { %v3399_v35 = vpop.eup %3398 }
 0xf5f   :  { %1650 = vrot.lane.b32.xlu1 %v3399_v35, %s3486_s0 }
 0xf74   :  { %v1667_v17 = vpop.permute.xlu0 %1666 }
 0xf75   :  { %v4204_v52 = vadd.f32 %v1667_v17, %v1659_v4 }
 0xf77   :  { %3400 = vtanh.f32 %v4204_v52 }
 0xf84   :  { %v3401_v19 = vpop.eup %3400 }
 0xf85   :  { %1672 = vrot.lane.b32.xlu0 %v3401_v19, %s3486_s0 }
 0xfd1   :  { %v1651_v30 = vpop.permute.xlu1 %1650 }
 0xfd2   :  { %v1653_v62 = vmul.f32 %v1651_v30, %v1635_v12  ;;  %v1684_v12 = vmul.f32 %v4114_v15, %v4090_v25 }
 0xfd4   :  { %v1676_v0 = vmul.f32 %v4106_v29, %v1653_v62 }
 0xfd6   :  { %v4212_v10 = vadd.f32 %v1676_v0, %v4098_v37  ;;  %v4214_v44 = vadd.f32 %v1677_v14, %v1676_v0 }
 0xfd8   :  { %1693 = vrot.lane.b32.xlu1 %v4214_v44, %s3487_s20 }
 0xff7   :  { %v1673_v57 = vpop.permute.xlu0 %1672 }
 0xff8   :  { %v1675_v60 = vmul.f32 %v1673_v57, %v1657_v49 }
 0xffa   :  { %v1683_v6 = vmul.f32 %v4092_v48, %v1675_v60 }
 0xffc   :  { %v4222_v36 = vadd.f32 %v1683_v6, %v4112_v28  ;;  %v4224_v61 = vadd.f32 %v1684_v12, %v1683_v6  ;;  %v1679_v12 = vmul.f32 %v4106_v29, %v4193_v33  ;;  %v1687_v29 = vmul.f32 %v4201_v16, %v4090_v25 }
 0xffe   :  { %1769 = vrot.lane.b32.xlu0 %v4224_v61, %s3487_s20 }
0x104a   :  { %v1694_v37 = vpop.permute.xlu1 %1693 }
0x104b   :  { %3196 = vmatmul.mubr.msk.f32.vlgmr.msra.gmra.mxu1 %vm73_vm0, %v1694_v37  ;;  %v1680_v37 = vmul.f32 %v4104_v24, %v4190_v34 }
0x104c   :  { %3210 = vmatpush3.msra.mxu1 %v4122_v56  ;;  %3217 = vmatprep.mubr.msk.f32.mxu1 %vm3484_vm1, %v3483_v3 }
0x104d   :  { %3211 = vmatprep.subr.mxu1 %v3483_v3 }
0x104e   :  { %3212 = vmatpush3.msra.mxu1 %v4131_v43 }
0x104f   :  { %3213 = vmatprep.subr.mxu1 %v3483_v3 }
0x1050   :  { %3214 = vmatpush3.msra.mxu1 %v4138_v58 }
0x1051   :  { %3215 = vmatprep.subr.mxu1 %v3483_v3 }
0x1052   :  { %3216 = vmatpush3.msra.mxu1 %v4145_v63 }
0x1053   :  { %3231 = vmatprep.subr.mxu1 %v3483_v3 }
0x1070   :  { %v1770_v51 = vpop.permute.xlu0 %1769 }
0x1071   :  { %3207 = vmatmul.mubr.msk.f32.vlgmr.msra.gmra.mxu0 %vm73_vm0, %v1770_v51  ;;  %v4260_v51 = vadd.f32 %v1680_v37, %v1679_v12 }
0x1072   :  { %3221 = vmatpush3.msra.mxu0 %v4153_v27  ;;  %3228 = vmatprep.mubr.msk.f32.mxu0 %vm3484_vm1, %v3483_v3 }
0x1073   :  { %3222 = vmatprep.subr.mxu0 %v3483_v3 }
0x1074   :  { %3223 = vmatpush3.msra.mxu0 %v4162_v47 }
0x1075   :  { %3224 = vmatprep.subr.mxu0 %v3483_v3 }
0x1076   :  { %3225 = vmatpush3.msra.mxu0 %v4169_v31 }
0x1077   :  { %3226 = vmatprep.subr.mxu0 %v3483_v3 }
0x1078   :  { %3227 = vmatpush3.msra.mxu0 %v4176_v59 }
0x1079   :  { %3242 = vmatprep.subr.mxu0 %v3483_v3 }
0x110b   :  { %v1763_v28 = vpop.f32.mrf.mxu1 }
0x110c   :  { %v1767_v15 = vadd.f32 %v1763_v28, %v3738_v2 }
0x110d   :  { %v3197_v49 = vpop.f32.mrf.mxu1 }
0x110e   :  { %3402 = vtanh.f32 %v1767_v15  ;;  %v1844_v4 = vmul.f32 0.5, %v1767_v15 }
0x111b   :  { %v3403_v5 = vpop.eup %3402 }
0x111c   :  { %1851 = vrot.lane.b32.xlu1 %v3403_v5, %s3486_s0 }
0x1131   :  { %v1839_v7 = vpop.f32.mrf.mxu0 }
0x1132   :  { %v1843_v35 = vadd.f32 %v1839_v7, %v3727_v55  ;;  %v1686_v7 = vmul.f32 %v4092_v48, %v4204_v52  ;;  %v1889_v48 = vmul.f32 %v4214_v44, %v4022_v26 }
0x1133   :  { %v3208_v13 = vpop.f32.mrf.mxu0 }
0x1134   :  { %3404 = vtanh.f32 %v1843_v35  ;;  %v1866_v0 = vmul.f32 0.5, %v1843_v35  ;;  %v4271_v33 = vadd.f32 %v1687_v29, %v1686_v7 }
0x1135   :  { %3406 = vtanh.f32 %v1844_v4 }
0x1136   :  { %3408 = vtanh.f32 %v1866_v0 }
0x1141   :  { %v3405_v53 = vpop.eup %3404 }
0x1142   :  { %1873 = vrot.lane.b32.xlu0 %v3405_v53, %s3486_s0  ;;  %v3407_v17 = vpop.eup %3406 }
0x1143   :  { %v1846_v19 = vadd.f32 1.0, %v3407_v17  ;;  %v3409_v14 = vpop.eup %3408 }
0x1144   :  { %v1868_v57 = vadd.f32 1.0, %v3409_v14 }
0x1145   :  { %v1847_v30 = vmul.f32 0.5, %v1846_v19 }
0x1146   :  { %v1869_v60 = vmul.f32 0.5, %v1868_v57 }
0x1147   :  { %v1849_v28 = vmul.f32 %v1847_v30, %v4260_v51 }
0x1148   :  { %v1871_v24 = vmul.f32 %v1869_v60, %v4271_v33 }
0x118e   :  { %v1852_v62 = vpop.permute.xlu1 %1851 }
0x118f   :  { %v1854_v2 = vmul.f32 %v1852_v62, %v1847_v30 }
0x1191   :  { %1856 = vrot.lane.b32.xlu1 %v1854_v2, %s3487_s20 }
0x11b4   :  { %v1874_v55 = vpop.permute.xlu0 %1873 }
0x11b5   :  { %v1876_v6 = vmul.f32 %v1874_v55, %v1869_v60 }
0x11b7   :  { %1878 = vrot.lane.b32.xlu0 %v1876_v6, %s3487_s20 }
0x1203   :  { %v1857_v15 = vpop.permute.xlu1 %1856 }
0x1204   :  { %v4263_v49 = vadd.f32 %v1857_v15, %v1849_v28 }
0x1206   :  { %3410 = vtanh.f32 %v4263_v49 }
0x1213   :  { %v3411_v5 = vpop.eup %3410 }
0x1214   :  { %1862 = vrot.lane.b32.xlu1 %v3411_v5, %s3486_s0 }
0x1229   :  { %v1879_v34 = vpop.permute.xlu0 %1878 }
0x122a   :  { %v4274_v35 = vadd.f32 %v1879_v34, %v1871_v24 }
0x122c   :  { %3412 = vtanh.f32 %v4274_v35 }
0x1239   :  { %v3413_v13 = vpop.eup %3412 }
0x123a   :  { %1884 = vrot.lane.b32.xlu0 %v3413_v13, %s3486_s0 }
0x1286   :  { %v1863_v53 = vpop.permute.xlu1 %1862 }
0x1287   :  { %v1865_v4 = vmul.f32 %v1863_v53, %v1847_v30  ;;  %v1896_v30 = vmul.f32 %v4224_v61, %v4008_v40 }
0x1289   :  { %v1888_v17 = vmul.f32 %v4024_v20, %v1865_v4  ;;  %v1891_v4 = vmul.f32 %v4024_v20, %v4263_v49  ;;  %v1899_v20 = vmul.f32 %v4271_v33, %v4008_v40 }
0x128b   :  { %v4282_v25 = vadd.f32 %v1888_v17, %v4212_v10  ;;  %v4284_v16 = vadd.f32 %v1889_v48, %v1888_v17  ;;  %v1892_v17 = vmul.f32 %v4260_v51, %v4022_v26 }
0x128d   :  { %1905 = vrot.lane.b32.xlu1 %v4284_v16, %s3487_s20  ;;  %v4330_v48 = vadd.f32 %v1892_v17, %v1891_v4 }
0x12ac   :  { %v1885_v52 = vpop.permute.xlu0 %1884 }
0x12ad   :  { %v1887_v19 = vmul.f32 %v1885_v52, %v1869_v60 }
0x12af   :  { %v1895_v62 = vmul.f32 %v4010_v38, %v1887_v19 }
0x12b1   :  { %v4292_v2 = vadd.f32 %v1895_v62, %v4222_v36  ;;  %v4294_v0 = vadd.f32 %v1896_v30, %v1895_v62 }
0x12b3   :  { %1981 = vrot.lane.b32.xlu0 %v4294_v0, %s3487_s20 }
0x12ff   :  { %v1906_v10 = vpop.permute.xlu1 %1905 }
0x1300   :  { %3218 = vmatmul.mubr.msk.f32.vlgmr.msra.gmra.mxu1 %vm73_vm0, %v1906_v10  ;;  %v1898_v10 = vmul.f32 %v4010_v38, %v4274_v35  ;;  %v2101_v38 = vmul.f32 %v4284_v16, %v3939_v32 }
0x1301   :  { %3232 = vmatpush3.msra.mxu1 %v4122_v56  ;;  %3239 = vmatprep.mubr.msk.f32.mxu1 %vm3484_vm1, %v3483_v3 }
0x1302   :  { %3233 = vmatprep.subr.mxu1 %v3483_v3  ;;  %v4341_v49 = vadd.f32 %v1899_v20, %v1898_v10 }
0x1303   :  { %3234 = vmatpush3.msra.mxu1 %v4131_v43 }
0x1304   :  { %3235 = vmatprep.subr.mxu1 %v3483_v3  ;;  %v2111_v10 = vmul.f32 %v4341_v49, %v3924_v42 }
0x1305   :  { %3236 = vmatpush3.msra.mxu1 %v4138_v58 }
0x1306   :  { %3237 = vmatprep.subr.mxu1 %v3483_v3 }
0x1307   :  { %3238 = vmatpush3.msra.mxu1 %v4145_v63 }
0x1308   :  { %3253 = vmatprep.subr.mxu1 %v3483_v3 }
0x1325   :  { %v1982_v44 = vpop.permute.xlu0 %1981 }
0x1326   :  { %3229 = vmatmul.mubr.msk.f32.vlgmr.msra.gmra.mxu0 %vm73_vm0, %v1982_v44 }
0x1327   :  { %3243 = vmatpush3.msra.mxu0 %v4153_v27  ;;  %3250 = vmatprep.mubr.msk.f32.mxu0 %vm3484_vm1, %v3483_v3 }
0x1328   :  { %3244 = vmatprep.subr.mxu0 %v3483_v3 }
0x1329   :  { %3245 = vmatpush3.msra.mxu0 %v4162_v47 }
0x132a   :  { %3246 = vmatprep.subr.mxu0 %v3483_v3 }
0x132b   :  { %3247 = vmatpush3.msra.mxu0 %v4169_v31 }
0x132c   :  { %3248 = vmatprep.subr.mxu0 %v3483_v3 }
0x132d   :  { %3249 = vmatpush3.msra.mxu0 %v4176_v59 }
0x132e   :  { %3264 = vmatprep.subr.mxu0 %v3483_v3 }
0x13c0   :  { %v1975_v36 = vpop.f32.mrf.mxu1 }
0x13c1   :  { %v1979_v61 = vadd.f32 %v1975_v36, %v3742_v9 }
0x13c2   :  { %v3219_v14 = vpop.f32.mrf.mxu1 }
0x13c3   :  { %3414 = vtanh.f32 %v1979_v61  ;;  %v2056_v37 = vmul.f32 0.5, %v1979_v61 }
0x13d0   :  { %v3415_v57 = vpop.eup %3414 }
0x13d1   :  { %2063 = vrot.lane.b32.xlu1 %v3415_v57, %s3486_s0 }
0x13e6   :  { %v2051_v60 = vpop.f32.mrf.mxu0 }
0x13e7   :  { %v2055_v55 = vadd.f32 %v2051_v60, %v3723_v50 }
0x13e8   :  { %v3230_v6 = vpop.f32.mrf.mxu0 }
0x13e9   :  { %3416 = vtanh.f32 %v2055_v55  ;;  %v2078_v29 = vmul.f32 0.5, %v2055_v55  ;;  %v2108_v6 = vmul.f32 %v4294_v0, %v3924_v42 }
0x13ea   :  { %3418 = vtanh.f32 %v2056_v37 }
0x13eb   :  { %3420 = vtanh.f32 %v2078_v29 }
0x13f6   :  { %v3417_v12 = vpop.eup %3416 }
0x13f7   :  { %2085 = vrot.lane.b32.xlu0 %v3417_v12, %s3486_s0  ;;  %v3419_v28 = vpop.eup %3418 }
0x13f8   :  { %v2058_v15 = vadd.f32 1.0, %v3419_v28  ;;  %v3421_v24 = vpop.eup %3420 }
0x13f9   :  { %v2080_v34 = vadd.f32 1.0, %v3421_v24 }
0x13fa   :  { %v2059_v5 = vmul.f32 0.5, %v2058_v15 }
0x13fb   :  { %v2081_v13 = vmul.f32 0.5, %v2080_v34 }
0x13fc   :  { %v2061_v52 = vmul.f32 %v2059_v5, %v4330_v48 }
0x13fd   :  { %v2083_v26 = vmul.f32 %v2081_v13, %v4341_v49 }
0x1443   :  { %v2064_v7 = vpop.permute.xlu1 %2063 }
0x1444   :  { %v2066_v9 = vmul.f32 %v2064_v7, %v2059_v5 }
0x1446   :  { %2068 = vrot.lane.b32.xlu1 %v2066_v9, %s3487_s20 }
0x1469   :  { %v2086_v50 = vpop.permute.xlu0 %2085 }
0x146a   :  { %v2088_v53 = vmul.f32 %v2086_v50, %v2081_v13  ;;  %v2104_v50 = vmul.f32 %v4330_v48, %v3939_v32 }
0x146c   :  { %2090 = vrot.lane.b32.xlu0 %v2088_v53, %s3487_s20 }
0x14b8   :  { %v2069_v19 = vpop.permute.xlu1 %2068 }
0x14b9   :  { %v4333_v62 = vadd.f32 %v2069_v19, %v2061_v52 }
0x14bb   :  { %3422 = vtanh.f32 %v4333_v62 }
0x14c8   :  { %v3423_v30 = vpop.eup %3422 }
0x14c9   :  { %2074 = vrot.lane.b32.xlu1 %v3423_v30, %s3486_s0 }
0x14de   :  { %v2091_v51 = vpop.permute.xlu0 %2090 }
0x14df   :  { %v4344_v44 = vadd.f32 %v2091_v51, %v2083_v26 }
0x14e1   :  { %3424 = vtanh.f32 %v4344_v44  ;;  %v2110_v30 = vmul.f32 %v3926_v41, %v4344_v44 }
0x14ee   :  { %v3425_v36 = vpop.eup %3424 }
0x14ef   :  { %2096 = vrot.lane.b32.xlu0 %v3425_v36, %s3486_s0 }
0x153b   :  { %v2075_v61 = vpop.permute.xlu1 %2074 }
0x153c   :  { %v2077_v14 = vmul.f32 %v2075_v61, %v2059_v5 }
0x153e   :  { %v2100_v57 = vmul.f32 %v3941_v1, %v2077_v14 }
0x1540   :  { %v4352_v40 = vadd.f32 %v2100_v57, %v4282_v25  ;;  %v4354_v33 = vadd.f32 %v2101_v38, %v2100_v57 }
0x1542   :  { %2117 = vrot.lane.b32.xlu1 %v4354_v33, %s3487_s20 }
0x1561   :  { %v2097_v35 = vpop.permute.xlu0 %2096 }
0x1562   :  { %v2099_v60 = vmul.f32 %v2097_v35, %v2081_v13  ;;  %v2103_v13 = vmul.f32 %v3941_v1, %v4333_v62  ;;  %v4407_v1 = vadd.f32 %v2111_v10, %v2110_v30 }
0x1564   :  { %v2107_v55 = vmul.f32 %v3926_v41, %v2099_v60  ;;  %v4399_v53 = vadd.f32 %v2104_v50, %v2103_v13  ;;  %v2313_v41 = vmul.f32 %v4354_v33, %v3856_v54 }
0x1566   :  { %v4362_v12 = vadd.f32 %v2107_v55, %v4292_v2  ;;  %v4364_v37 = vadd.f32 %v2108_v6, %v2107_v55 }
0x1568   :  { %2193 = vrot.lane.b32.xlu0 %v4364_v37, %s3487_s20  ;;  %v2320_v57 = vmul.f32 %v4364_v37, %v3842_v11 }
0x15b4   :  { %v2118_v25 = vpop.permute.xlu1 %2117 }
0x15b5   :  { %3240 = vmatmul.mubr.msk.f32.vlgmr.msra.gmra.mxu1 %vm73_vm0, %v2118_v25 }
0x15b6   :  { %3254 = vmatpush3.msra.mxu1 %v4122_v56  ;;  %3261 = vmatprep.mubr.msk.f32.mxu1 %vm3484_vm1, %v3483_v3 }
0x15b7   :  { %3255 = vmatprep.subr.mxu1 %v3483_v3 }
0x15b8   :  { %3256 = vmatpush3.msra.mxu1 %v4131_v43 }
0x15b9   :  { %3257 = vmatprep.subr.mxu1 %v3483_v3 }
0x15ba   :  { %3258 = vmatpush3.msra.mxu1 %v4138_v58 }
0x15bb   :  { %3259 = vmatprep.subr.mxu1 %v3483_v3 }
0x15bc   :  { %3260 = vmatpush3.msra.mxu1 %v4145_v63 }
0x15da   :  { %v2194_v16 = vpop.permute.xlu0 %2193 }
0x15db   :  { %3251 = vmatmul.mubr.msk.f32.vlgmr.msra.gmra.mxu0 %vm73_vm0, %v2194_v16 }
0x15dc   :  { %3265 = vmatpush3.msra.mxu0 %v4153_v27  ;;  %3272 = vmatprep.mubr.msk.f32.mxu0 %vm3484_vm1, %v3483_v3 }
0x15dd   :  { %3266 = vmatprep.subr.mxu0 %v3483_v3 }
0x15de   :  { %3267 = vmatpush3.msra.mxu0 %v4162_v47 }
0x15df   :  { %3268 = vmatprep.subr.mxu0 %v3483_v3 }
0x15e0   :  { %3269 = vmatpush3.msra.mxu0 %v4169_v31 }
0x15e1   :  { %3270 = vmatprep.subr.mxu0 %v3483_v3 }
0x15e2   :  { %3271 = vmatpush3.msra.mxu0 %v4176_v59 }
0x15e3   :  { %3275 = vmatprep.subr.mxu0 %v3483_v3 }
0x1675   :  { %v2187_v56 = vpop.f32.mrf.mxu1 }
0x1676   :  { %v2191_v43 = vadd.f32 %v2187_v56, %v3746_v18 }
0x1677   :  { %v3241_v58 = vpop.f32.mrf.mxu1 }
0x1678   :  { %3426 = vtanh.f32 %v2191_v43  ;;  %v2268_v0 = vmul.f32 0.5, %v2191_v43 }
0x1685   :  { %v3427_v63 = vpop.eup %3426 }
0x1686   :  { %2275 = vrot.lane.b32.xlu1 %v3427_v63, %s3486_s0 }
0x169b   :  { %v2263_v27 = vpop.f32.mrf.mxu0 }
0x169c   :  { %v2267_v47 = vadd.f32 %v2263_v27, %v3719_v45 }
0x169d   :  { %v3252_v2 = vpop.f32.mrf.mxu0 }
0x169e   :  { %3428 = vtanh.f32 %v2267_v47  ;;  %v2290_v7 = vmul.f32 0.5, %v2267_v47 }
0x169f   :  { %3430 = vtanh.f32 %v2268_v0 }
0x16a0   :  { %3432 = vtanh.f32 %v2290_v7 }
0x16ab   :  { %v3429_v31 = vpop.eup %3428 }
0x16ac   :  { %2297 = vrot.lane.b32.xlu0 %v3429_v31, %s3486_s0  ;;  %v3431_v59 = vpop.eup %3430 }
0x16ad   :  { %v2270_v28 = vadd.f32 1.0, %v3431_v59  ;;  %v3433_v9 = vpop.eup %3432 }
0x16ae   :  { %v2292_v29 = vadd.f32 1.0, %v3433_v9 }
0x16af   :  { %v2271_v15 = vmul.f32 0.5, %v2270_v28 }
0x16b0   :  { %v2293_v24 = vmul.f32 0.5, %v2292_v29 }
0x16b1   :  { %v2273_v4 = vmul.f32 %v2271_v15, %v4399_v53 }
0x16b2   :  { %v2295_v32 = vmul.f32 %v2293_v24, %v4407_v1 }
0x16f8   :  { %v2276_v5 = vpop.permute.xlu1 %2275 }
0x16f9   :  { %v2278_v18 = vmul.f32 %v2276_v5, %v2271_v15  ;;  %v2316_v5 = vmul.f32 %v4399_v53, %v3856_v54  ;;  %v2323_v54 = vmul.f32 %v4407_v1, %v3842_v11 }
0x16fb   :  { %2280 = vrot.lane.b32.xlu1 %v2278_v18, %s3487_s20 }
0x171e   :  { %v2298_v45 = vpop.permute.xlu0 %2297 }
0x171f   :  { %v2300_v34 = vmul.f32 %v2298_v45, %v2293_v24 }
0x1721   :  { %2302 = vrot.lane.b32.xlu0 %v2300_v34, %s3487_s20 }
0x176d   :  { %v2281_v17 = vpop.permute.xlu1 %2280 }
0x176e   :  { %v2283_v52 = vadd.f32 %v2281_v17, %v2273_v4 }
0x1770   :  { %3434 = vtanh.f32 %v2283_v52 }
0x177d   :  { %v3435_v19 = vpop.eup %3434 }
0x177e   :  { %2286 = vrot.lane.b32.xlu1 %v3435_v19, %s3486_s0 }
0x1793   :  { %v2303_v48 = vpop.permute.xlu0 %2302 }
0x1794   :  { %v4410_v62 = vadd.f32 %v2303_v48, %v2295_v32 }
0x1796   :  { %3436 = vtanh.f32 %v4410_v62 }
0x17a3   :  { %v3437_v20 = vpop.eup %3436 }
0x17a4   :  { %2308 = vrot.lane.b32.xlu0 %v3437_v20, %s3486_s0 }
0x17f0   :  { %v2287_v26 = vpop.permute.xlu1 %2286 }
0x17f1   :  { %v2289_v51 = vmul.f32 %v2287_v26, %v2271_v15  ;;  %v2315_v15 = vmul.f32 %v3858_v21, %v2283_v52  ;;  %v2578_v26 = vld [vmem:[%s4607_s6 + $0x78] sm:$0xff] }
0x17f3   :  { %v2312_v36 = vmul.f32 %v3858_v21, %v2289_v51  ;;  %v2317_v18 = vadd.f32 %v2316_v5, %v2315_v15  ;;  %v2322_v21 = vmul.f32 %v3844_v46, %v4410_v62  ;;  %v2594_v62 = vld [vmem:[%s4607_s6 + $0xf8] sm:$0xff]  ;;  %v2577_v51 = vld [vmem:[%s4607_s6 + $0x70] sm:$0xff] }
0x17f4   :  { %3010 = vmatprep.subr.mxu1 %v2594_v62 }
0x17f5   :  { %v4418_v42 = vadd.f32 %v2312_v36, %v4352_v40  ;;  %v2314_v49 = vadd.f32 %v2313_v41, %v2312_v36  ;;  %v2324_v50 = vadd.f32 %v2323_v54, %v2322_v21  ;;  %v2576_v41 = vld [vmem:[%s4607_s6 + $0x68] sm:$0xff]  ;;  %v2676_v21 = vld [vmem:[%s4609_s8 + $0x18] sm:$0xff]  ;;  %v2675_v54 = vld [vmem:[%s4609_s8 + $0x10] sm:$0xff] }
0x17f7   :  { %2329 = vrot.lane.b32.xlu1 %v2314_v49, %s3487_s20  ;;  %v2591_v49 = vld [vmem:[%s4607_s6 + $0xe0] sm:$0xff] }
0x1816   :  { %v2309_v44 = vpop.permute.xlu0 %2308 }
0x1817   :  { %v2311_v61 = vmul.f32 %v2309_v44, %v2293_v24  ;;  %v3460_v24 = vld [vmem:[%s4602_s1] sm:$0xff] }
0x1818   :  { %v2528_v45 = vmax.f32 %v3460_v24, 1.0  ;;  %v2575_v44 = vld [vmem:[%s4607_s6 + $0x60] sm:$0xff] }
0x1819   :  { %v2319_v14 = vmul.f32 %v3844_v46, %v2311_v61  ;;  %v2590_v61 = vld [vmem:[%s4607_s6 + $0xd8] sm:$0xff] }
0x181b   :  { %v4425_v38 = vadd.f32 %v2319_v14, %v4362_v12  ;;  %v2321_v35 = vadd.f32 %v2320_v57, %v2319_v14  ;;  %v2574_v14 = vld [vmem:[%s4607_s6 + $0x58] sm:$0xff]  ;;  %v2589_v57 = vld [vmem:[%s4607_s6 + $0xd0] sm:$0xff] }
0x181d   :  { %2405 = vrot.lane.b32.xlu0 %v2321_v35, %s3487_s20  ;;  %v2588_v35 = vld [vmem:[%s4607_s6 + $0xc8] sm:$0xff] }
0x1869   :  { %v2330_v33 = vpop.permute.xlu1 %2329 }
0x186a   :  { %3262 = vmatmul.mubr.msk.f32.vlgmr.msra.gmra.mxu1 %vm73_vm0, %v2330_v33  ;;  %v2572_v33 = vld [vmem:[%s4607_s6 + $0x48] sm:$0xff] }
0x186b   :  { %3011 = vmatpush3.msra.mxu1 %v2578_v26 }
0x188f   :  { %v2406_v40 = vpop.permute.xlu0 %2405 }
0x1890   :  { %3273 = vmatmul.mubr.msk.f32.vlgmr.msra.gmra.mxu0 %vm73_vm0, %v2406_v40  ;;  %v2587_v40 = vld [vmem:[%s4607_s6 + $0xc0] sm:$0xff] }
0x1891   :  { %3283 = vmatprep.mubr.msk.f32.mxu0 %vm3484_vm1, %v3483_v3  ;;  %3276 = vmatpush3.msra.mxu0 %v2676_v21 }
0x1892   :  { %3277 = vmatprep.subr.mxu0 %v3483_v3 }
0x1893   :  { %3278 = vmatpush3.msra.mxu0 %v2675_v54 }
0x1894   :  { %3279 = vmatprep.subr.mxu0 %v3483_v3 }
0x192a   :  { %v2399_v60 = vpop.f32.mrf.mxu1 }
0x192b   :  { %v2403_v55 = vadd.f32 %v2399_v60, %v3750_v23  ;;  %v2571_v60 = vld [vmem:[%s4607_s6 + $0x40] sm:$0xff] }
0x192c   :  { %v3263_v6 = vpop.f32.mrf.mxu1 }
0x192d   :  { %3438 = vtanh.f32 %v2403_v55  ;;  %v2480_v43 = vmul.f32 0.5, %v2403_v55  ;;  %v2586_v55 = vld [vmem:[%s4607_s6 + $0xb8] sm:$0xff] }
0x192e   :  { %v2570_v6 = vld [vmem:[%s4607_s6 + $0x38] sm:$0xff] }
0x193a   :  { %v3439_v37 = vpop.eup %3438 }
0x193b   :  { %2487 = vrot.lane.b32.xlu1 %v3439_v37, %s3486_s0  ;;  %v2585_v37 = vld [vmem:[%s4607_s6 + $0xb0] sm:$0xff] }
0x1950   :  { %v2475_v12 = vpop.f32.mrf.mxu0 }
0x1951   :  { %v2479_v25 = vadd.f32 %v2475_v12, %v3715_v39  ;;  %v2569_v12 = vld [vmem:[%s4607_s6 + $0x30] sm:$0xff] }
0x1952   :  { %v3274_v16 = vpop.f32.mrf.mxu0 }
0x1953   :  { %3440 = vtanh.f32 %v2479_v25  ;;  %v2502_v2 = vmul.f32 0.5, %v2479_v25  ;;  %v2584_v25 = vld [vmem:[%s4607_s6 + $0xa8] sm:$0xff] }
0x1954   :  { %3442 = vtanh.f32 %v2480_v43  ;;  %v2568_v16 = vld [vmem:[%s4607_s6 + $0x28] sm:$0xff]  ;;  %v2567_v43 = vld [vmem:[%s4607_s6 + $0x20] sm:$0xff] }
0x1955   :  { %3444 = vtanh.f32 %v2502_v2  ;;  %v2564_v2 = vld [vmem:[%s4607_s6 + $0x8] sm:$0xff] }
0x1960   :  { %v3441_v56 = vpop.eup %3440 }
0x1961   :  { %2509 = vrot.lane.b32.xlu0 %v3441_v56, %s3486_s0  ;;  %v3443_v58 = vpop.eup %3442  ;;  %v2583_v56 = vld [vmem:[%s4607_s6 + $0xa0] sm:$0xff] }
0x1962   :  { %v2482_v63 = vadd.f32 1.0, %v3443_v58  ;;  %v3445_v31 = vpop.eup %3444  ;;  %v2582_v58 = vld [vmem:[%s4607_s6 + $0x98] sm:$0xff] }
0x1963   :  { %v2504_v0 = vadd.f32 1.0, %v3445_v31  ;;  %v2579_v31 = vld [vmem:[%s4607_s6 + $0x80] sm:$0xff] }
0x1964   :  { %v2483_v27 = vmul.f32 0.5, %v2482_v63  ;;  %v2566_v63 = vld [vmem:[%s4607_s6 + $0x18] sm:$0xff] }
0x1965   :  { %v2505_v59 = vmul.f32 0.5, %v2504_v0  ;;  %v2563_v0 = vld [vmem:[%s4607_s6] sm:$0xff] }
0x1966   :  { %v2485_v7 = vmul.f32 %v2483_v27, %v2317_v18 }
0x1967   :  { %v2507_v53 = vmul.f32 %v2505_v59, %v2324_v50  ;;  %v2674_v50 = vld [vmem:[%s4609_s8 + $0x8] sm:$0xff] }
0x1968   :  { %3280 = vmatpush3.msra.mxu0 %v2674_v50 }
0x1969   :  { %3281 = vmatprep.subr.mxu0 %v3483_v3 }
0x19ad   :  { %v2488_v47 = vpop.permute.xlu1 %2487 }
0x19ae   :  { %v2490_v23 = vmul.f32 %v2488_v47, %v2483_v27  ;;  %v2565_v47 = vld [vmem:[%s4607_s6 + $0x10] sm:$0xff] }
0x19b0   :  { %2492 = vrot.lane.b32.xlu1 %v2490_v23, %s3487_s20  ;;  %v2580_v23 = vld [vmem:[%s4607_s6 + $0x88] sm:$0xff] }
0x19d3   :  { %v2510_v39 = vpop.permute.xlu0 %2509 }
0x19d4   :  { %v2512_v28 = vmul.f32 %v2510_v39, %v2505_v59 }
0x19d6   :  { %2514 = vrot.lane.b32.xlu0 %v2512_v28, %s3487_s20 }
0x1a22   :  { %v2493_v9 = vpop.permute.xlu1 %2492 }
0x1a23   :  { %v2495_v29 = vadd.f32 %v2493_v9, %v2485_v7 }
0x1a25   :  { %3446 = vtanh.f32 %v2495_v29 }
0x1a26   :  { %3448 = vrcp.f32 %v2528_v45 }
0x1a32   :  { %v3447_v34 = vpop.eup %3446 }
0x1a33   :  { %2498 = vrot.lane.b32.xlu1 %v3447_v34, %s3486_s0  ;;  %v3449_v13 = vpop.eup %3448 }
0x1a37   :  { %2533 = vperm.xlu1 %3304, %v3449_v13  }
0x1a48   :  { %v2515_v4 = vpop.permute.xlu0 %2514 }
0x1a49   :  { %v2517_v17 = vadd.f32 %v2515_v4, %v2507_v53  ;;  %v2673_v53 = vld [vmem:[%s4609_s8] sm:$0xff] }
0x1a4a   :  { %3282 = vmatpush3.msra.mxu0 %v2673_v53 }
0x1a4b   :  { %3450 = vtanh.f32 %v2517_v17  ;;  %3286 = vmatprep.subr.mxu0 %v3483_v3  ;;  %v2905_v17 = vld [vmem:[%s4608_s7] ss:$0 sm:$0xff] }
0x1a58   :  { %v3451_v52 = vpop.eup %3450 }
0x1a59   :  { %2520 = vrot.lane.b32.xlu0 %v3451_v52, %s3486_s0 }
0x1aa5   :  { %v2499_v19 = vpop.permute.xlu1 %2498 }
0x1aa6   :  { %v2501_v30 = vmul.f32 %v2499_v19, %v2483_v27  ;;  %v2581_v27 = vld [vmem:[%s4607_s6 + $0x90] sm:$0xff] }
0x1aa8   :  { %v2524_v10 = vmul.f32 %v2501_v30, %v3782_v22  ;;  %v2593_v22 = vld [vmem:[%s4607_s6 + $0xf0] sm:$0xff] }
0x1aa9   :  { %3012 = vmatprep.subr.mxu1 %v2593_v22 }
0x1aaa   :  { %v2525_v32 = vadd.f32 %v2524_v10, %v4418_v42  ;;  %3013 = vmatpush3.msra.mxu1 %v2577_v51  ;;  %v2908_v51 = vld [vmem:[%s4612_s11] ss:$0 sm:$0xff] }
0x1ab2   :  { %v2534_v48 = vpop.permute.xlu1 %2533 }
0x1ab3   :  { %v2536_v20 = vmul.f32 %v2534_v48, %v2525_v32  ;;  %v2761_v32 = vld [vmem:[%s4611_s10 + $0x18] sm:$0xff] }
0x1ab5   :  { %2539 = vrot.lane.b32.xlu0 %v2536_v20, %s3487_s20  ;;  %v2759_v20 = vld [vmem:[%s4611_s10 + $0x8] sm:$0xff] }
0x1acb   :  { %v2521_v46 = vpop.permute.xlu0 %2520 }
0x1acc   :  { %v2523_v11 = vmul.f32 %v2521_v46, %v2505_v59  ;;  %v2758_v46 = vld [vmem:[%s4611_s10] sm:$0xff] }
0x1ace   :  { %v2526_v1 = vmul.f32 %v2523_v11, %v3769_v8  ;;  %v2592_v8 = vld [vmem:[%s4607_s6 + $0xe8] sm:$0xff]  ;;  %v2906_v11 = vld [vmem:[%s4610_s9] ss:$0 sm:$0xff] }
0x1acf   :  { %3014 = vmatprep.subr.mxu1 %v2592_v8 }
0x1ad0   :  { %v2527_v36 = vadd.f32 %v2526_v1, %v4425_v38  ;;  %3015 = vmatpush3.msra.mxu1 %v2576_v41  ;;  %v2573_v38 = vld [vmem:[%s4607_s6 + $0x50] sm:$0xff] }
0x1ad1   :  { %3016 = vmatprep.subr.mxu1 %v2591_v49 }
0x1ad2   :  { %v2537_v42 = vmul.f32 %v2534_v48, %v2527_v36  ;;  %3017 = vmatpush3.msra.mxu1 %v2575_v44  ;;  %v2760_v48 = vld [vmem:[%s4611_s10 + $0x10] sm:$0xff]  ;;  %s3461_s10 = scalar_lea.vmem %s2851_s29, 32 }
0x1ad3   :  { %3018 = vmatprep.subr.mxu1 %v2590_v61  ;;  %p3462_p0 = scmp.ne.s32.totalorder %s2851_s29, %s3461_s10  ;;  %p3467_p2 = scmp.lt.s32.totalorder %s3461_s10, %s3461_s10 }
0x1ad4   :  { %2543 = vrot.lane.b32.xlu1 %v2537_v42, %s3486_s0  ;;  %3019 = vmatpush3.msra.mxu1 %v2574_v14 }
0x1ad5   :  { %3020 = vmatprep.subr.mxu1 %v2589_v57  ;;  %p3468_p3 = por %p3467_p2, %p3466_p1 }
0x1ad6   :  { %3021 = vmatpush3.msra.mxu1 %v2573_v38 }
0x1ad7   :  { %3022 = vmatprep.subr.mxu1 %v2588_v35  ;;  %p3469_p4 = pnand %p3468_p3, %p3462_p0 }
0x1ad8   :  { %3023 = vmatpush3.msra.mxu1 %v2572_v33 }
0x1ad9   :  { %3024 = vmatprep.subr.mxu1 %v2587_v40 }
0x1ada   :  { %3025 = vmatpush3.msra.mxu1 %v2571_v60 }
0x1adb   :  { %3026 = vmatprep.subr.mxu1 %v2586_v55 }
0x1adc   :  { %3027 = vmatpush3.msra.mxu1 %v2570_v6 }
0x1add   :  { %3028 = vmatprep.subr.mxu1 %v2585_v37 }
0x1ade   :  { %3029 = vmatpush3.msra.mxu1 %v2569_v12 }
0x1adf   :  { %3030 = vmatprep.subr.mxu1 %v2584_v25 }
0x1ae0   :  { %3031 = vmatpush3.msra.mxu1 %v2568_v16 }
0x1ae1   :  { %3032 = vmatprep.subr.mxu1 %v2583_v56 }
0x1ae2   :  { %3033 = vmatpush3.msra.mxu1 %v2567_v43 }
0x1ae3   :  { %3034 = vmatprep.subr.mxu1 %v2582_v58 }
0x1ae4   :  { %3035 = vmatpush3.msra.mxu1 %v2566_v63 }
0x1ae5   :  { %3036 = vmatprep.subr.mxu1 %v2581_v27 }
0x1ae6   :  { %3037 = vmatpush3.msra.mxu1 %v2565_v47 }
0x1ae7   :  { %3038 = vmatprep.subr.mxu1 %v2580_v23 }
0x1ae8   :  { %3039 = vmatpush3.msra.mxu1 %v2564_v2 }
0x1ae9   :  { %3040 = vmatprep.subr.mxu1 %v2579_v31 }
0x1aea   :  { %3041 = vmatpush3.msra.mxu1 %v2563_v0 }
0x1b27   :  { %v2540_v59 = vpop.permute.xlu0 %2539 }
0x1b46   :  { %v2544_v39 = vpop.permute.xlu1 %2543 }
0x1b47   :  { %v2546_v28 = vsel %vm73_vm0, %v2540_v59, %v2544_v39 }
0x1b48   :  { %v2548_v15 = vrot.slane %v2546_v28, 2 }
0x1b4a   :  { %v2552_v5 = vmul.f32 %v2548_v15, %v2546_v28  ;;  %v2550_v7 = vsub.f32 %v2546_v28, %v2548_v15 }
0x1b4c   :  { %v3325_v18 = vpack.i.bf16 %v2548_v15, %v2552_v5  ;;  %v2551_v45 = vand.u32 2147483647, %v2550_v7 }
0x1b4e   :  { %3326 = vrot.lane.b32.xlu0 %v3325_v18, %s3486_s0 }
0x1bc0   :  { %v3327_v9 = vpop.permute.xlu0 %3326 }
0x1bc1   :  { %v3329_v29 = vunpack.i.h.bf16 %v3327_v9  ;;  %v3328_v24 = vunpack.i.l.bf16 %v3327_v9 }
0x1bc3   :  { %v2562_v34 = vsel %vm2560_vm12, %v2551_v45, %v3328_v24  ;;  %v2561_v13 = vsel %vm2560_vm12, %v2546_v28, %v3329_v29 }
0x1bc4   :  { %2666 = vmatprep.mubr.f32.mxu1 %v2562_v34 }
0x1bc5   :  { %2667 = vmatmul.mubr.f32.vlgmr.msra.gmra.mxu1 %v2561_v13 }
0x1c85   :  { %v3042_v4 = vpop.f32.mrf.mxu1 }
0x1c87   :  { %v3043_v52 = vpop.f32.mrf.mxu1 }
0x1c88   :  { %v3044_v19 = vadd.f32 %v3043_v52, %v3042_v4 }
0x1c8a   :  { %v2669_v30 = vadd.f32 %v3044_v19, %v2905_v17 }
0x1c8c   :  { %v2672_v10 = vmax.f32 %v2669_v30, 0.0 }
0x1c8e   :  { %3284 = vmatmul.mubr.msk.f32.vlgmr.msra.gmra.mxu0 %vm73_vm0, %v2672_v10 }
0x1c8f   :  { %3287 = vmatpush3.msra.mxu0 %v2761_v32  ;;  %3294 = vmatprep.mubr.msk.f32.mxu0 %vm3484_vm1, %v3483_v3 }
0x1c90   :  { %3288 = vmatprep.subr.mxu0 %v3483_v3 }
0x1c91   :  { %3289 = vmatpush3.msra.mxu0 %v2760_v48 }
0x1c92   :  { %3290 = vmatprep.subr.mxu0 %v3483_v3 }
0x1c93   :  { %3291 = vmatpush3.msra.mxu0 %v2759_v20 }
0x1c94   :  { %3292 = vmatprep.subr.mxu0 %v3483_v3 }
0x1c95   :  { %3293 = vmatpush3.msra.mxu0 %v2758_v46 }
0x1d4e   :  { %v2753_v1 = vpop.f32.mrf.mxu0 }
0x1d4f   :  { %v2754_v62 = vadd.f32 %v2906_v11, %v2753_v1 }
0x1d50   :  { %v3285_v26 = vpop.f32.mrf.mxu0 }
0x1d51   :  { %v2757_v22 = vmax.f32 %v2754_v62, 0.0 }
0x1d53   :  { %3295 = vmatmul.mubr.msk.f32.vlgmr.msra.gmra.mxu0 %vm73_vm0, %v2757_v22 }
0x1e13   :  { %v2838_v3 = vpop.f32.mrf.mxu0 }
0x1e14   :  { %v2839_v36 = vadd.f32 %v2908_v51, %v2838_v3 }
0x1e15   :  { %v3296_v8 = vpop.f32.mrf.mxu0 }
0x1e16   :  { %2843 = vst.msk [vmem:[#allocation3] sm:$0x3] %vm2842_vm13, %v2839_v36 }
0x1e17   :  { %3472 = shalt.err (!%p3469_p4)
}
0x1e18   :  { %2853 = dma.vmem_to_hbm [thread:$0]  %s2851_s29, 32, %s4613_s12, [#allocation4]  }
0x1e19   :  { %3481 = dma.done.wait [#allocation4], 32  }
0x1e1a   :  { %3482 = vsyncadd [#allocation4], 4294967264 }
0x1e1b   :  { %2857 = vsyncpa [#allocation4], 1 }

</bundles_post_ra>
